<compile_context>
chip_gen: v7x
topology: tpu7x:2x2x1
jax: 0.10.0
libtpu: 0.0.40
codegen_flags: <defaults>
</compile_context>

<pallas_src>
import jax
import jax.numpy as jnp
from jax.experimental import pallas as pl
from jax.experimental.pallas import tpu as pltpu


def _full_spec(shape):
    """BlockSpec covering the whole array as a single block (grid=(1,))."""
    zeros = (0,) * len(shape)
    return pl.BlockSpec(tuple(shape), lambda i: zeros)


def _maxpool2x2(h, n, hh, ww, c):
    """2x2 max-pool (stride 2) on a (n*hh*ww, c) row-major (n, y, x) slab.

    Returns a (n, hh//2, ww//2, c) value. Done purely on values (reshape +
    maximum of static slices) so no scratch round trips are needed.
    """
    h2, w2 = hh // 2, ww // 2
    v = h.reshape(n, h2, 2, w2, 2, c)
    v = jnp.maximum(v[:, :, 0], v[:, :, 1])          # max over y within the 2x2 window
    v = jnp.maximum(v[:, :, :, 0], v[:, :, :, 1])    # max over x within the 2x2 window
    return v                                         # (n, h2, w2, c)


def _make_fused_kernel(n, hgt, wid, c1, c2, c3):
    """Build the fused forward kernel for fixed (static) shapes."""
    h1s, w1s = hgt, wid                 # conv1 output spatial
    h2s, w2s = hgt // 2, wid // 2       # after pool1 (conv2 spatial)
    h3s, w3s = hgt // 4, wid // 4       # after pool2 (conv3 spatial)
    h4s, w4s = hgt // 8, wid // 8       # after pool3 (head spatial)

    def kernel(col1_ref, w1_ref, s1_ref, t1_ref,
               w2_ref, s2_ref, t2_ref,
               w3_ref, s3_ref, t3_ref,
               fw1_ref, fb1_ref, fw2_ref, fb2_ref,
               o_ref,
               pad2, col2, pad3, col3):
        # ---------------- layer 1: im2col GEMM (pre-packed in wrapper) ------
        a1 = jnp.dot(col1_ref[...], w1_ref[...],
                     preferred_element_type=jnp.float32)             # (n*H*W, c1)
        a1 = jnp.maximum(a1 * s1_ref[...] + t1_ref[...], 0.0)        # fused BN + ReLU
        p1 = _maxpool2x2(a1, n, h1s, w1s, c1)                        # (n, h2s, w2s, c1)

        # ---------------- layer 2: in-kernel pad + im2col + GEMM ------------
        pad2[...] = jnp.zeros_like(pad2)
        pad2[:, pl.ds(1, h2s), pl.ds(1, w2s), :] = p1
        for tap in range(9):
            dy, dx = tap // 3, tap % 3
            col2[:, pl.ds(tap * c1, c1)] = (
                pad2[:, pl.ds(dy, h2s), pl.ds(dx, w2s), :]
                .reshape(n * h2s * w2s, c1).astype(col2.dtype))
        a2 = jnp.dot(col2[...], w2_ref[...],
                     preferred_element_type=jnp.float32)             # (n*h2s*w2s, c2)
        a2 = jnp.maximum(a2 * s2_ref[...] + t2_ref[...], 0.0)
        p2 = _maxpool2x2(a2, n, h2s, w2s, c2)                        # (n, h3s, w3s, c2)

        # ---------------- layer 3 --------------------------------------------
        pad3[...] = jnp.zeros_like(pad3)
        pad3[:, pl.ds(1, h3s), pl.ds(1, w3s), :] = p2
        for tap in range(9):
            dy, dx = tap // 3, tap % 3
            col3[:, pl.ds(tap * c2, c2)] = (
                pad3[:, pl.ds(dy, h3s), pl.ds(dx, w3s), :]
                .reshape(n * h3s * w3s, c2).astype(col3.dtype))
        a3 = jnp.dot(col3[...], w3_ref[...],
                     preferred_element_type=jnp.float32)             # (n*h3s*w3s, c3)
        a3 = jnp.maximum(a3 * s3_ref[...] + t3_ref[...], 0.0)
        p3 = _maxpool2x2(a3, n, h3s, w3s, c3)                        # (n, h4s, w4s, c3)

        # ---------------- head: global avg pool + MLP ------------------------
        p3f = p3.reshape(n, h4s * w4s, c3)
        feat = p3f[:, 0, :]
        for i in range(1, h4s * w4s):
            feat = feat + p3f[:, i, :]
        feat = feat * (1.0 / float(h4s * w4s))                       # (n, c3)

        hfc = jnp.dot(feat.astype(fw1_ref.dtype), fw1_ref[...],
                      preferred_element_type=jnp.float32) + fb1_ref[...]
        hfc = jnp.maximum(hfc, 0.0)
        # TODO(synk): nn.Dropout(0.4) is identity at inference; no stochastic mask applied.
        o_ref[...] = jnp.dot(hfc.astype(fw2_ref.dtype), fw2_ref[...],
                             preferred_element_type=jnp.float32) + fb2_ref[...]

    return kernel


def baseline_forward(x_nchw, params):
    n, cin, hgt, wid = x_nchw.shape
    assert hgt % 8 == 0 and wid % 8 == 0, "spatial must be divisible by 8 (3x 2x2 pools)"
    c1, c2, c3 = 64, 128, 256
    nclass = params["fb2"].shape[-1]

    # Layer-1 im2col done once in the wrapper (fuses transpose + pad + patch
    # packing into one small XLA fusion) so the kernel's first GEMM operand is
    # a lane-dense (N*H*W, 9*Cin) bf16 slab instead of a Cin=3 lane layout.
    x = jnp.transpose(x_nchw, (0, 2, 3, 1)).astype(jnp.float32)       # NHWC
    xp = jnp.pad(x, ((0, 0), (1, 1), (1, 1), (0, 0)))
    col1 = jnp.concatenate(
        [xp[:, dy:dy + hgt, dx:dx + wid, :] for dy in range(3) for dx in range(3)],
        axis=-1).reshape(n * hgt * wid, 9 * cin).astype(jnp.bfloat16)

    h2s, w2s = hgt // 2, wid // 2
    h3s, w3s = hgt // 4, wid // 4

    kernel = _make_fused_kernel(n, hgt, wid, c1, c2, c3)
    out_shape = jax.ShapeDtypeStruct((n, nclass), jnp.float32)

    inputs = (col1,
              params["w1"], params["s1"], params["t1"],
              params["w2"], params["s2"], params["t2"],
              params["w3"], params["s3"], params["t3"],
              params["fw1"], params["fb1"], params["fw2"], params["fb2"])

    return pl.pallas_call(
        kernel,
        out_shape=out_shape,
        grid=(1,),
        in_specs=[_full_spec(a.shape) for a in inputs],
        out_specs=_full_spec((n, nclass)),
        scratch_shapes=[
            pltpu.VMEM((n, h2s + 2, w2s + 2, c1), jnp.float32),    # zero-padded act (layer-2 input)
            pltpu.VMEM((n * h2s * w2s, 9 * c1), jnp.bfloat16),     # im2col slab, layer 2
            pltpu.VMEM((n, h3s + 2, w3s + 2, c2), jnp.float32),    # zero-padded act (layer-3 input)
            pltpu.VMEM((n * h3s * w3s, 9 * c2), jnp.bfloat16),     # im2col slab, layer 3
        ],
        compiler_params=pltpu.CompilerParams(dimension_semantics=("arbitrary",)),
    )(*inputs)


# ----------------------------------------------------------------------------
# Deterministic synthetic parameters (shapes match the PyTorch module; BN in
# eval mode folded with the conv bias into a per-channel affine).
# ----------------------------------------------------------------------------
def init_params(key, in_channels=3, num_classes=10):
    chans = [in_channels, 64, 128, 256]
    keys = jax.random.split(key, 5)
    eps = 1e-5
    params = {}
    for li in range(3):
        cin, cout = chans[li], chans[li + 1]
        # Layout: w[(ky*3+kx)*cin + i, o] == torch_weight[o, i, ky, kx]
        w = jax.random.normal(keys[li], (9 * cin, cout), jnp.float32) * (1.0 / (3.0 * cin ** 0.5))
        conv_bias = 0.01 * jnp.cos(jnp.arange(cout, dtype=jnp.float32))
        gamma = 1.0 + 0.01 * jnp.sin(jnp.arange(cout, dtype=jnp.float32))
        beta = 0.02 * jnp.cos(0.5 * jnp.arange(cout, dtype=jnp.float32))
        run_mean = 0.001 * jnp.arange(cout, dtype=jnp.float32)
        run_var = 1.0 + 0.01 * (jnp.arange(cout, dtype=jnp.float32) % 7)
        scale = gamma / jnp.sqrt(run_var + eps)
        shift = beta + (conv_bias - run_mean) * scale
        params[f"w{li + 1}"] = w.astype(jnp.bfloat16)               # MXU operand -> bf16
        params[f"s{li + 1}"] = scale.reshape(1, cout)               # epilogue stays f32
        params[f"t{li + 1}"] = shift.reshape(1, cout)
    params["fw1"] = (jax.random.normal(keys[3], (256, 128), jnp.float32) / 16.0).astype(jnp.bfloat16)
    params["fb1"] = (0.01 * jnp.sin(jnp.arange(128, dtype=jnp.float32))).reshape(1, 128)
    params["fw2"] = (jax.random.normal(keys[4], (128, num_classes), jnp.float32)
                     / (128.0 ** 0.5)).astype(jnp.bfloat16)
    params["fb2"] = (0.01 * jnp.cos(jnp.arange(num_classes, dtype=jnp.float32))).reshape(1, num_classes)
    return params


if __name__ == "__main__":
    key = jax.random.PRNGKey(0)
    kx, kp = jax.random.split(key)
    x = jax.random.normal(kx, (2, 3, 16, 16), jnp.float32)   # NCHW, like the torch module
    params = init_params(kp, in_channels=3, num_classes=10)

    fwd = jax.jit(baseline_forward)
    out = fwd(x, params)
    out = jax.block_until_ready(out)
    assert out.shape == (2, 10), out.shape
    assert out.dtype == jnp.float32
    print("KERNEL_OK")
</pallas_src>

<mosaic_0001>
module attributes {stable_mosaic.version = 11 : i64} {
  func.func @kernel(%arg0: i32, %arg1: memref<512x27xbf16, #tpu.memory_space<vmem>>, %arg2: memref<27x64xbf16, #tpu.memory_space<vmem>>, %arg3: memref<1x64xf32, #tpu.memory_space<vmem>>, %arg4: memref<1x64xf32, #tpu.memory_space<vmem>>, %arg5: memref<576x128xbf16, #tpu.memory_space<vmem>>, %arg6: memref<1x128xf32, #tpu.memory_space<vmem>>, %arg7: memref<1x128xf32, #tpu.memory_space<vmem>>, %arg8: memref<1152x256xbf16, #tpu.memory_space<vmem>>, %arg9: memref<1x256xf32, #tpu.memory_space<vmem>>, %arg10: memref<1x256xf32, #tpu.memory_space<vmem>>, %arg11: memref<256x128xbf16, #tpu.memory_space<vmem>>, %arg12: memref<1x128xf32, #tpu.memory_space<vmem>>, %arg13: memref<128x10xbf16, #tpu.memory_space<vmem>>, %arg14: memref<1x10xf32, #tpu.memory_space<vmem>>, %arg15: memref<2x10xf32, #tpu.memory_space<vmem>>, %arg16: memref<2x10x10x64xf32, #tpu.memory_space<vmem>>, %arg17: memref<128x576xbf16, #tpu.memory_space<vmem>>, %arg18: memref<2x6x6x128xf32, #tpu.memory_space<vmem>>, %arg19: memref<32x1152xbf16, #tpu.memory_space<vmem>>) attributes {dimension_semantics = [#tpu.dimension_semantics<arbitrary>], iteration_bounds = array<i64: 1>, scalar_prefetch = 0 : i64, scratch_operands = 4 : i64, tpu.core_type = #tpu.core_type<tc>, window_params = [{pipeline_mode = #tpu.pipeline_mode<synchronous>, transform_indices = @transform_0, window_bounds = array<i64: 512, 27>}, {pipeline_mode = #tpu.pipeline_mode<synchronous>, transform_indices = @transform_1, window_bounds = array<i64: 27, 64>}, {pipeline_mode = #tpu.pipeline_mode<synchronous>, transform_indices = @transform_2, window_bounds = array<i64: 1, 64>}, {pipeline_mode = #tpu.pipeline_mode<synchronous>, transform_indices = @transform_3, window_bounds = array<i64: 1, 64>}, {pipeline_mode = #tpu.pipeline_mode<synchronous>, transform_indices = @transform_4, window_bounds = array<i64: 576, 128>}, {pipeline_mode = #tpu.pipeline_mode<synchronous>, transform_indices = @transform_5, window_bounds = array<i64: 1, 128>}, {pipeline_mode = #tpu.pipeline_mode<synchronous>, transform_indices = @transform_6, window_bounds = array<i64: 1, 128>}, {pipeline_mode = #tpu.pipeline_mode<synchronous>, transform_indices = @transform_7, window_bounds = array<i64: 1152, 256>}, {pipeline_mode = #tpu.pipeline_mode<synchronous>, transform_indices = @transform_8, window_bounds = array<i64: 1, 256>}, {pipeline_mode = #tpu.pipeline_mode<synchronous>, transform_indices = @transform_9, window_bounds = array<i64: 1, 256>}, {pipeline_mode = #tpu.pipeline_mode<synchronous>, transform_indices = @transform_10, window_bounds = array<i64: 256, 128>}, {pipeline_mode = #tpu.pipeline_mode<synchronous>, transform_indices = @transform_11, window_bounds = array<i64: 1, 128>}, {pipeline_mode = #tpu.pipeline_mode<synchronous>, transform_indices = @transform_12, window_bounds = array<i64: 128, 10>}, {pipeline_mode = #tpu.pipeline_mode<synchronous>, transform_indices = @transform_13, window_bounds = array<i64: 1, 10>}, {pipeline_mode = #tpu.pipeline_mode<synchronous>, transform_indices = @transform_14, window_bounds = array<i64: 2, 10>}]} {
    %c0 = arith.constant 0 : index
    %c0_0 = arith.constant 0 : index
    %0 = vector.load %arg1[%c0, %c0_0] : memref<512x27xbf16, #tpu.memory_space<vmem>>, vector<512x27xbf16>
    %c0_1 = arith.constant 0 : index
    %c0_2 = arith.constant 0 : index
    %1 = vector.load %arg2[%c0_1, %c0_2] : memref<27x64xbf16, #tpu.memory_space<vmem>>, vector<27x64xbf16>
    %cst = arith.constant dense<0.000000e+00> : vector<512x64xf32>
    %2 = tpu.matmul %0, %1, %cst {dimension_numbers = #tpu.dot_dimension_numbers<[1], [0], [0], [1], [0, 0, 1, 1], [], []>} : vector<512x27xbf16>, vector<27x64xbf16>, vector<512x64xf32> -> vector<512x64xf32>
    %c0_3 = arith.constant 0 : index
    %c0_4 = arith.constant 0 : index
    %3 = vector.load %arg3[%c0_3, %c0_4] : memref<1x64xf32, #tpu.memory_space<vmem>>, vector<1x64xf32>
    %4 = vector.broadcast %3 : vector<1x64xf32> to vector<512x64xf32>
    %5 = arith.mulf %2, %4 : vector<512x64xf32>
    %c0_5 = arith.constant 0 : index
    %c0_6 = arith.constant 0 : index
    %6 = vector.load %arg4[%c0_5, %c0_6] : memref<1x64xf32, #tpu.memory_space<vmem>>, vector<1x64xf32>
    %7 = vector.broadcast %6 : vector<1x64xf32> to vector<512x64xf32>
    %8 = arith.addf %5, %7 : vector<512x64xf32>
    %cst_7 = arith.constant 0.000000e+00 : f32
    %9 = vector.broadcast %cst_7 : f32 to vector<512x64xf32>
    %10 = arith.maximumf %8, %9 : vector<512x64xf32>
    %11 = vector.shape_cast %10 : vector<512x64xf32> to vector<2x8x2x8x2x64xf32>
    %12 = vector.extract_strided_slice %11 {offsets = [0, 0, 0, 0, 0, 0], sizes = [2, 8, 1, 8, 2, 64], strides = [1, 1, 1, 1, 1, 1]} : vector<2x8x2x8x2x64xf32> to vector<2x8x1x8x2x64xf32>
    %13 = vector.shape_cast %12 : vector<2x8x1x8x2x64xf32> to vector<2x8x8x2x64xf32>
    %14 = vector.extract_strided_slice %11 {offsets = [0, 0, 1, 0, 0, 0], sizes = [2, 8, 1, 8, 2, 64], strides = [1, 1, 1, 1, 1, 1]} : vector<2x8x2x8x2x64xf32> to vector<2x8x1x8x2x64xf32>
    %15 = vector.shape_cast %14 : vector<2x8x1x8x2x64xf32> to vector<2x8x8x2x64xf32>
    %16 = arith.maximumf %13, %15 : vector<2x8x8x2x64xf32>
    %17 = vector.extract_strided_slice %16 {offsets = [0, 0, 0, 0, 0], sizes = [2, 8, 8, 1, 64], strides = [1, 1, 1, 1, 1]} : vector<2x8x8x2x64xf32> to vector<2x8x8x1x64xf32>
    %18 = vector.shape_cast %17 : vector<2x8x8x1x64xf32> to vector<2x8x8x64xf32>
    %19 = vector.extract_strided_slice %16 {offsets = [0, 0, 0, 1, 0], sizes = [2, 8, 8, 1, 64], strides = [1, 1, 1, 1, 1]} : vector<2x8x8x2x64xf32> to vector<2x8x8x1x64xf32>
    %20 = vector.shape_cast %19 : vector<2x8x8x1x64xf32> to vector<2x8x8x64xf32>
    %21 = arith.maximumf %18, %20 : vector<2x8x8x64xf32>
    %cst_8 = arith.constant 0.000000e+00 : f32
    %22 = vector.broadcast %cst_8 : f32 to vector<2x10x10x64xf32>
    %c0_9 = arith.constant 0 : index
    %c0_10 = arith.constant 0 : index
    %c0_11 = arith.constant 0 : index
    %c0_12 = arith.constant 0 : index
    %23 = vector.load %arg16[%c0_9, %c0_10, %c0_11, %c0_12] : memref<2x10x10x64xf32, #tpu.memory_space<vmem>>, vector<2x10x10x64xf32>
    tpu.vector_store %arg16[%c0_9, %c0_10, %c0_11, %c0_12], %22 {strides = array<i32>} : memref<2x10x10x64xf32, #tpu.memory_space<vmem>>, vector<2x10x10x64xf32>,
    %c0_13 = arith.constant 0 : index
    %c1 = arith.constant 1 : index
    %c1_14 = arith.constant 1 : index
    %c0_15 = arith.constant 0 : index
    %24 = vector.load %arg16[%c0_13, %c1, %c1_14, %c0_15] : memref<2x10x10x64xf32, #tpu.memory_space<vmem>>, vector<2x8x8x64xf32>
    tpu.vector_store %arg16[%c0_13, %c1, %c1_14, %c0_15], %21 {strides = array<i32>} : memref<2x10x10x64xf32, #tpu.memory_space<vmem>>, vector<2x8x8x64xf32>,
    %c0_16 = arith.constant 0 : index
    %c0_17 = arith.constant 0 : index
    %c0_18 = arith.constant 0 : index
    %c0_19 = arith.constant 0 : index
    %25 = vector.load %arg16[%c0_16, %c0_17, %c0_18, %c0_19] : memref<2x10x10x64xf32, #tpu.memory_space<vmem>>, vector<2x8x8x64xf32>
    %26 = vector.shape_cast %25 : vector<2x8x8x64xf32> to vector<128x64xf32>
    %27 = arith.truncf %26 : vector<128x64xf32> to vector<128x64xbf16>
    %c0_20 = arith.constant 0 : index
    %c0_21 = arith.constant 0 : index
    %28 = vector.load %arg17[%c0_20, %c0_21] : memref<128x576xbf16, #tpu.memory_space<vmem>>, vector<128x64xbf16>
    tpu.vector_store %arg17[%c0_20, %c0_21], %27 {strides = array<i32>} : memref<128x576xbf16, #tpu.memory_space<vmem>>, vector<128x64xbf16>,
    %c0_22 = arith.constant 0 : index
    %c0_23 = arith.constant 0 : index
    %c1_24 = arith.constant 1 : index
    %c0_25 = arith.constant 0 : index
    %29 = vector.load %arg16[%c0_22, %c0_23, %c1_24, %c0_25] : memref<2x10x10x64xf32, #tpu.memory_space<vmem>>, vector<2x8x8x64xf32>
    %30 = vector.shape_cast %29 : vector<2x8x8x64xf32> to vector<128x64xf32>
    %31 = arith.truncf %30 : vector<128x64xf32> to vector<128x64xbf16>
    %c0_26 = arith.constant 0 : index
    %c64 = arith.constant 64 : index
    %32 = vector.load %arg17[%c0_26, %c64] : memref<128x576xbf16, #tpu.memory_space<vmem>>, vector<128x64xbf16>
    tpu.vector_store %arg17[%c0_26, %c64], %31 {strides = array<i32>} : memref<128x576xbf16, #tpu.memory_space<vmem>>, vector<128x64xbf16>,
    %c0_27 = arith.constant 0 : index
    %c0_28 = arith.constant 0 : index
    %c2 = arith.constant 2 : index
    %c0_29 = arith.constant 0 : index
    %33 = vector.load %arg16[%c0_27, %c0_28, %c2, %c0_29] : memref<2x10x10x64xf32, #tpu.memory_space<vmem>>, vector<2x8x8x64xf32>
    %34 = vector.shape_cast %33 : vector<2x8x8x64xf32> to vector<128x64xf32>
    %35 = arith.truncf %34 : vector<128x64xf32> to vector<128x64xbf16>
    %c0_30 = arith.constant 0 : index
    %c128 = arith.constant 128 : index
    %36 = vector.load %arg17[%c0_30, %c128] : memref<128x576xbf16, #tpu.memory_space<vmem>>, vector<128x64xbf16>
    tpu.vector_store %arg17[%c0_30, %c128], %35 {strides = array<i32>} : memref<128x576xbf16, #tpu.memory_space<vmem>>, vector<128x64xbf16>,
    %c0_31 = arith.constant 0 : index
    %c1_32 = arith.constant 1 : index
    %c0_33 = arith.constant 0 : index
    %c0_34 = arith.constant 0 : index
    %37 = vector.load %arg16[%c0_31, %c1_32, %c0_33, %c0_34] : memref<2x10x10x64xf32, #tpu.memory_space<vmem>>, vector<2x8x8x64xf32>
    %38 = vector.shape_cast %37 : vector<2x8x8x64xf32> to vector<128x64xf32>
    %39 = arith.truncf %38 : vector<128x64xf32> to vector<128x64xbf16>
    %c0_35 = arith.constant 0 : index
    %c192 = arith.constant 192 : index
    %40 = vector.load %arg17[%c0_35, %c192] : memref<128x576xbf16, #tpu.memory_space<vmem>>, vector<128x64xbf16>
    tpu.vector_store %arg17[%c0_35, %c192], %39 {strides = array<i32>} : memref<128x576xbf16, #tpu.memory_space<vmem>>, vector<128x64xbf16>,
    %c0_36 = arith.constant 0 : index
    %c1_37 = arith.constant 1 : index
    %c1_38 = arith.constant 1 : index
    %c0_39 = arith.constant 0 : index
    %41 = vector.load %arg16[%c0_36, %c1_37, %c1_38, %c0_39] : memref<2x10x10x64xf32, #tpu.memory_space<vmem>>, vector<2x8x8x64xf32>
    %42 = vector.shape_cast %41 : vector<2x8x8x64xf32> to vector<128x64xf32>
    %43 = arith.truncf %42 : vector<128x64xf32> to vector<128x64xbf16>
    %c0_40 = arith.constant 0 : index
    %c256 = arith.constant 256 : index
    %44 = vector.load %arg17[%c0_40, %c256] : memref<128x576xbf16, #tpu.memory_space<vmem>>, vector<128x64xbf16>
    tpu.vector_store %arg17[%c0_40, %c256], %43 {strides = array<i32>} : memref<128x576xbf16, #tpu.memory_space<vmem>>, vector<128x64xbf16>,
    %c0_41 = arith.constant 0 : index
    %c1_42 = arith.constant 1 : index
    %c2_43 = arith.constant 2 : index
    %c0_44 = arith.constant 0 : index
    %45 = vector.load %arg16[%c0_41, %c1_42, %c2_43, %c0_44] : memref<2x10x10x64xf32, #tpu.memory_space<vmem>>, vector<2x8x8x64xf32>
    %46 = vector.shape_cast %45 : vector<2x8x8x64xf32> to vector<128x64xf32>
    %47 = arith.truncf %46 : vector<128x64xf32> to vector<128x64xbf16>
    %c0_45 = arith.constant 0 : index
    %c320 = arith.constant 320 : index
    %48 = vector.load %arg17[%c0_45, %c320] : memref<128x576xbf16, #tpu.memory_space<vmem>>, vector<128x64xbf16>
    tpu.vector_store %arg17[%c0_45, %c320], %47 {strides = array<i32>} : memref<128x576xbf16, #tpu.memory_space<vmem>>, vector<128x64xbf16>,
    %c0_46 = arith.constant 0 : index
    %c2_47 = arith.constant 2 : index
    %c0_48 = arith.constant 0 : index
    %c0_49 = arith.constant 0 : index
    %49 = vector.load %arg16[%c0_46, %c2_47, %c0_48, %c0_49] : memref<2x10x10x64xf32, #tpu.memory_space<vmem>>, vector<2x8x8x64xf32>
    %50 = vector.shape_cast %49 : vector<2x8x8x64xf32> to vector<128x64xf32>
    %51 = arith.truncf %50 : vector<128x64xf32> to vector<128x64xbf16>
    %c0_50 = arith.constant 0 : index
    %c384 = arith.constant 384 : index
    %52 = vector.load %arg17[%c0_50, %c384] : memref<128x576xbf16, #tpu.memory_space<vmem>>, vector<128x64xbf16>
    tpu.vector_store %arg17[%c0_50, %c384], %51 {strides = array<i32>} : memref<128x576xbf16, #tpu.memory_space<vmem>>, vector<128x64xbf16>,
    %c0_51 = arith.constant 0 : index
    %c2_52 = arith.constant 2 : index
    %c1_53 = arith.constant 1 : index
    %c0_54 = arith.constant 0 : index
    %53 = vector.load %arg16[%c0_51, %c2_52, %c1_53, %c0_54] : memref<2x10x10x64xf32, #tpu.memory_space<vmem>>, vector<2x8x8x64xf32>
    %54 = vector.shape_cast %53 : vector<2x8x8x64xf32> to vector<128x64xf32>
    %55 = arith.truncf %54 : vector<128x64xf32> to vector<128x64xbf16>
    %c0_55 = arith.constant 0 : index
    %c448 = arith.constant 448 : index
    %56 = vector.load %arg17[%c0_55, %c448] : memref<128x576xbf16, #tpu.memory_space<vmem>>, vector<128x64xbf16>
    tpu.vector_store %arg17[%c0_55, %c448], %55 {strides = array<i32>} : memref<128x576xbf16, #tpu.memory_space<vmem>>, vector<128x64xbf16>,
    %c0_56 = arith.constant 0 : index
    %c2_57 = arith.constant 2 : index
    %c2_58 = arith.constant 2 : index
    %c0_59 = arith.constant 0 : index
    %57 = vector.load %arg16[%c0_56, %c2_57, %c2_58, %c0_59] : memref<2x10x10x64xf32, #tpu.memory_space<vmem>>, vector<2x8x8x64xf32>
    %58 = vector.shape_cast %57 : vector<2x8x8x64xf32> to vector<128x64xf32>
    %59 = arith.truncf %58 : vector<128x64xf32> to vector<128x64xbf16>
    %c0_60 = arith.constant 0 : index
    %c512 = arith.constant 512 : index
    %60 = vector.load %arg17[%c0_60, %c512] : memref<128x576xbf16, #tpu.memory_space<vmem>>, vector<128x64xbf16>
    tpu.vector_store %arg17[%c0_60, %c512], %59 {strides = array<i32>} : memref<128x576xbf16, #tpu.memory_space<vmem>>, vector<128x64xbf16>,
    %c0_61 = arith.constant 0 : index
    %c0_62 = arith.constant 0 : index
    %61 = vector.load %arg17[%c0_61, %c0_62] : memref<128x576xbf16, #tpu.memory_space<vmem>>, vector<128x576xbf16>
    %c0_63 = arith.constant 0 : index
    %c0_64 = arith.constant 0 : index
    %62 = vector.load %arg5[%c0_63, %c0_64] : memref<576x128xbf16, #tpu.memory_space<vmem>>, vector<576x128xbf16>
    %cst_65 = arith.constant dense<0.000000e+00> : vector<128x128xf32>
    %63 = tpu.matmul %61, %62, %cst_65 {dimension_numbers = #tpu.dot_dimension_numbers<[1], [0], [0], [1], [0, 0, 1, 1], [], []>} : vector<128x576xbf16>, vector<576x128xbf16>, vector<128x128xf32> -> vector<128x128xf32>
    %c0_66 = arith.constant 0 : index
    %c0_67 = arith.constant 0 : index
    %64 = vector.load %arg6[%c0_66, %c0_67] : memref<1x128xf32, #tpu.memory_space<vmem>>, vector<1x128xf32>
    %65 = vector.broadcast %64 : vector<1x128xf32> to vector<128x128xf32>
    %66 = arith.mulf %63, %65 : vector<128x128xf32>
    %c0_68 = arith.constant 0 : index
    %c0_69 = arith.constant 0 : index
    %67 = vector.load %arg7[%c0_68, %c0_69] : memref<1x128xf32, #tpu.memory_space<vmem>>, vector<1x128xf32>
    %68 = vector.broadcast %67 : vector<1x128xf32> to vector<128x128xf32>
    %69 = arith.addf %66, %68 : vector<128x128xf32>
    %cst_70 = arith.constant 0.000000e+00 : f32
    %70 = vector.broadcast %cst_70 : f32 to vector<128x128xf32>
    %71 = arith.maximumf %69, %70 : vector<128x128xf32>
    %72 = vector.shape_cast %71 : vector<128x128xf32> to vector<2x4x2x4x2x128xf32>
    %73 = vector.extract_strided_slice %72 {offsets = [0, 0, 0, 0, 0, 0], sizes = [2, 4, 1, 4, 2, 128], strides = [1, 1, 1, 1, 1, 1]} : vector<2x4x2x4x2x128xf32> to vector<2x4x1x4x2x128xf32>
    %74 = vector.shape_cast %73 : vector<2x4x1x4x2x128xf32> to vector<2x4x4x2x128xf32>
    %75 = vector.extract_strided_slice %72 {offsets = [0, 0, 1, 0, 0, 0], sizes = [2, 4, 1, 4, 2, 128], strides = [1, 1, 1, 1, 1, 1]} : vector<2x4x2x4x2x128xf32> to vector<2x4x1x4x2x128xf32>
    %76 = vector.shape_cast %75 : vector<2x4x1x4x2x128xf32> to vector<2x4x4x2x128xf32>
    %77 = arith.maximumf %74, %76 : vector<2x4x4x2x128xf32>
    %78 = vector.extract_strided_slice %77 {offsets = [0, 0, 0, 0, 0], sizes = [2, 4, 4, 1, 128], strides = [1, 1, 1, 1, 1]} : vector<2x4x4x2x128xf32> to vector<2x4x4x1x128xf32>
    %79 = vector.shape_cast %78 : vector<2x4x4x1x128xf32> to vector<2x4x4x128xf32>
    %80 = vector.extract_strided_slice %77 {offsets = [0, 0, 0, 1, 0], sizes = [2, 4, 4, 1, 128], strides = [1, 1, 1, 1, 1]} : vector<2x4x4x2x128xf32> to vector<2x4x4x1x128xf32>
    %81 = vector.shape_cast %80 : vector<2x4x4x1x128xf32> to vector<2x4x4x128xf32>
    %82 = arith.maximumf %79, %81 : vector<2x4x4x128xf32>
    %cst_71 = arith.constant 0.000000e+00 : f32
    %83 = vector.broadcast %cst_71 : f32 to vector<2x6x6x128xf32>
    %c0_72 = arith.constant 0 : index
    %c0_73 = arith.constant 0 : index
    %c0_74 = arith.constant 0 : index
    %c0_75 = arith.constant 0 : index
    %84 = vector.load %arg18[%c0_72, %c0_73, %c0_74, %c0_75] : memref<2x6x6x128xf32, #tpu.memory_space<vmem>>, vector<2x6x6x128xf32>
    tpu.vector_store %arg18[%c0_72, %c0_73, %c0_74, %c0_75], %83 {strides = array<i32>} : memref<2x6x6x128xf32, #tpu.memory_space<vmem>>, vector<2x6x6x128xf32>,
    %c0_76 = arith.constant 0 : index
    %c1_77 = arith.constant 1 : index
    %c1_78 = arith.constant 1 : index
    %c0_79 = arith.constant 0 : index
    %85 = vector.load %arg18[%c0_76, %c1_77, %c1_78, %c0_79] : memref<2x6x6x128xf32, #tpu.memory_space<vmem>>, vector<2x4x4x128xf32>
    tpu.vector_store %arg18[%c0_76, %c1_77, %c1_78, %c0_79], %82 {strides = array<i32>} : memref<2x6x6x128xf32, #tpu.memory_space<vmem>>, vector<2x4x4x128xf32>,
    %c0_80 = arith.constant 0 : index
    %c0_81 = arith.constant 0 : index
    %c0_82 = arith.constant 0 : index
    %c0_83 = arith.constant 0 : index
    %86 = vector.load %arg18[%c0_80, %c0_81, %c0_82, %c0_83] : memref<2x6x6x128xf32, #tpu.memory_space<vmem>>, vector<2x4x4x128xf32>
    %87 = vector.shape_cast %86 : vector<2x4x4x128xf32> to vector<32x128xf32>
    %88 = arith.truncf %87 : vector<32x128xf32> to vector<32x128xbf16>
    %c0_84 = arith.constant 0 : index
    %c0_85 = arith.constant 0 : index
    %89 = vector.load %arg19[%c0_84, %c0_85] : memref<32x1152xbf16, #tpu.memory_space<vmem>>, vector<32x128xbf16>
    tpu.vector_store %arg19[%c0_84, %c0_85], %88 {strides = array<i32>} : memref<32x1152xbf16, #tpu.memory_space<vmem>>, vector<32x128xbf16>,
    %c0_86 = arith.constant 0 : index
    %c0_87 = arith.constant 0 : index
    %c1_88 = arith.constant 1 : index
    %c0_89 = arith.constant 0 : index
    %90 = vector.load %arg18[%c0_86, %c0_87, %c1_88, %c0_89] : memref<2x6x6x128xf32, #tpu.memory_space<vmem>>, vector<2x4x4x128xf32>
    %91 = vector.shape_cast %90 : vector<2x4x4x128xf32> to vector<32x128xf32>
    %92 = arith.truncf %91 : vector<32x128xf32> to vector<32x128xbf16>
    %c0_90 = arith.constant 0 : index
    %c128_91 = arith.constant 128 : index
    %93 = vector.load %arg19[%c0_90, %c128_91] : memref<32x1152xbf16, #tpu.memory_space<vmem>>, vector<32x128xbf16>
    tpu.vector_store %arg19[%c0_90, %c128_91], %92 {strides = array<i32>} : memref<32x1152xbf16, #tpu.memory_space<vmem>>, vector<32x128xbf16>,
    %c0_92 = arith.constant 0 : index
    %c0_93 = arith.constant 0 : index
    %c2_94 = arith.constant 2 : index
    %c0_95 = arith.constant 0 : index
    %94 = vector.load %arg18[%c0_92, %c0_93, %c2_94, %c0_95] : memref<2x6x6x128xf32, #tpu.memory_space<vmem>>, vector<2x4x4x128xf32>
    %95 = vector.shape_cast %94 : vector<2x4x4x128xf32> to vector<32x128xf32>
    %96 = arith.truncf %95 : vector<32x128xf32> to vector<32x128xbf16>
    %c0_96 = arith.constant 0 : index
    %c256_97 = arith.constant 256 : index
    %97 = vector.load %arg19[%c0_96, %c256_97] : memref<32x1152xbf16, #tpu.memory_space<vmem>>, vector<32x128xbf16>
    tpu.vector_store %arg19[%c0_96, %c256_97], %96 {strides = array<i32>} : memref<32x1152xbf16, #tpu.memory_space<vmem>>, vector<32x128xbf16>,
    %c0_98 = arith.constant 0 : index
    %c1_99 = arith.constant 1 : index
    %c0_100 = arith.constant 0 : index
    %c0_101 = arith.constant 0 : index
    %98 = vector.load %arg18[%c0_98, %c1_99, %c0_100, %c0_101] : memref<2x6x6x128xf32, #tpu.memory_space<vmem>>, vector<2x4x4x128xf32>
    %99 = vector.shape_cast %98 : vector<2x4x4x128xf32> to vector<32x128xf32>
    %100 = arith.truncf %99 : vector<32x128xf32> to vector<32x128xbf16>
    %c0_102 = arith.constant 0 : index
    %c384_103 = arith.constant 384 : index
    %101 = vector.load %arg19[%c0_102, %c384_103] : memref<32x1152xbf16, #tpu.memory_space<vmem>>, vector<32x128xbf16>
    tpu.vector_store %arg19[%c0_102, %c384_103], %100 {strides = array<i32>} : memref<32x1152xbf16, #tpu.memory_space<vmem>>, vector<32x128xbf16>,
    %c0_104 = arith.constant 0 : index
    %c1_105 = arith.constant 1 : index
    %c1_106 = arith.constant 1 : index
    %c0_107 = arith.constant 0 : index
    %102 = vector.load %arg18[%c0_104, %c1_105, %c1_106, %c0_107] : memref<2x6x6x128xf32, #tpu.memory_space<vmem>>, vector<2x4x4x128xf32>
    %103 = vector.shape_cast %102 : vector<2x4x4x128xf32> to vector<32x128xf32>
    %104 = arith.truncf %103 : vector<32x128xf32> to vector<32x128xbf16>
    %c0_108 = arith.constant 0 : index
    %c512_109 = arith.constant 512 : index
    %105 = vector.load %arg19[%c0_108, %c512_109] : memref<32x1152xbf16, #tpu.memory_space<vmem>>, vector<32x128xbf16>
    tpu.vector_store %arg19[%c0_108, %c512_109], %104 {strides = array<i32>} : memref<32x1152xbf16, #tpu.memory_space<vmem>>, vector<32x128xbf16>,
    %c0_110 = arith.constant 0 : index
    %c1_111 = arith.constant 1 : index
    %c2_112 = arith.constant 2 : index
    %c0_113 = arith.constant 0 : index
    %106 = vector.load %arg18[%c0_110, %c1_111, %c2_112, %c0_113] : memref<2x6x6x128xf32, #tpu.memory_space<vmem>>, vector<2x4x4x128xf32>
    %107 = vector.shape_cast %106 : vector<2x4x4x128xf32> to vector<32x128xf32>
    %108 = arith.truncf %107 : vector<32x128xf32> to vector<32x128xbf16>
    %c0_114 = arith.constant 0 : index
    %c640 = arith.constant 640 : index
    %109 = vector.load %arg19[%c0_114, %c640] : memref<32x1152xbf16, #tpu.memory_space<vmem>>, vector<32x128xbf16>
    tpu.vector_store %arg19[%c0_114, %c640], %108 {strides = array<i32>} : memref<32x1152xbf16, #tpu.memory_space<vmem>>, vector<32x128xbf16>,
    %c0_115 = arith.constant 0 : index
    %c2_116 = arith.constant 2 : index
    %c0_117 = arith.constant 0 : index
    %c0_118 = arith.constant 0 : index
    %110 = vector.load %arg18[%c0_115, %c2_116, %c0_117, %c0_118] : memref<2x6x6x128xf32, #tpu.memory_space<vmem>>, vector<2x4x4x128xf32>
    %111 = vector.shape_cast %110 : vector<2x4x4x128xf32> to vector<32x128xf32>
    %112 = arith.truncf %111 : vector<32x128xf32> to vector<32x128xbf16>
    %c0_119 = arith.constant 0 : index
    %c768 = arith.constant 768 : index
    %113 = vector.load %arg19[%c0_119, %c768] : memref<32x1152xbf16, #tpu.memory_space<vmem>>, vector<32x128xbf16>
    tpu.vector_store %arg19[%c0_119, %c768], %112 {strides = array<i32>} : memref<32x1152xbf16, #tpu.memory_space<vmem>>, vector<32x128xbf16>,
    %c0_120 = arith.constant 0 : index
    %c2_121 = arith.constant 2 : index
    %c1_122 = arith.constant 1 : index
    %c0_123 = arith.constant 0 : index
    %114 = vector.load %arg18[%c0_120, %c2_121, %c1_122, %c0_123] : memref<2x6x6x128xf32, #tpu.memory_space<vmem>>, vector<2x4x4x128xf32>
    %115 = vector.shape_cast %114 : vector<2x4x4x128xf32> to vector<32x128xf32>
    %116 = arith.truncf %115 : vector<32x128xf32> to vector<32x128xbf16>
    %c0_124 = arith.constant 0 : index
    %c896 = arith.constant 896 : index
    %117 = vector.load %arg19[%c0_124, %c896] : memref<32x1152xbf16, #tpu.memory_space<vmem>>, vector<32x128xbf16>
    tpu.vector_store %arg19[%c0_124, %c896], %116 {strides = array<i32>} : memref<32x1152xbf16, #tpu.memory_space<vmem>>, vector<32x128xbf16>,
    %c0_125 = arith.constant 0 : index
    %c2_126 = arith.constant 2 : index
    %c2_127 = arith.constant 2 : index
    %c0_128 = arith.constant 0 : index
    %118 = vector.load %arg18[%c0_125, %c2_126, %c2_127, %c0_128] : memref<2x6x6x128xf32, #tpu.memory_space<vmem>>, vector<2x4x4x128xf32>
    %119 = vector.shape_cast %118 : vector<2x4x4x128xf32> to vector<32x128xf32>
    %120 = arith.truncf %119 : vector<32x128xf32> to vector<32x128xbf16>
    %c0_129 = arith.constant 0 : index
    %c1024 = arith.constant 1024 : index
    %121 = vector.load %arg19[%c0_129, %c1024] : memref<32x1152xbf16, #tpu.memory_space<vmem>>, vector<32x128xbf16>
    tpu.vector_store %arg19[%c0_129, %c1024], %120 {strides = array<i32>} : memref<32x1152xbf16, #tpu.memory_space<vmem>>, vector<32x128xbf16>,
    %c0_130 = arith.constant 0 : index
    %c0_131 = arith.constant 0 : index
    %122 = vector.load %arg19[%c0_130, %c0_131] : memref<32x1152xbf16, #tpu.memory_space<vmem>>, vector<32x1152xbf16>
    %c0_132 = arith.constant 0 : index
    %c0_133 = arith.constant 0 : index
    %123 = vector.load %arg8[%c0_132, %c0_133] : memref<1152x256xbf16, #tpu.memory_space<vmem>>, vector<1152x256xbf16>
    %cst_134 = arith.constant dense<0.000000e+00> : vector<32x256xf32>
    %124 = tpu.matmul %122, %123, %cst_134 {dimension_numbers = #tpu.dot_dimension_numbers<[1], [0], [0], [1], [0, 0, 1, 1], [], []>} : vector<32x1152xbf16>, vector<1152x256xbf16>, vector<32x256xf32> -> vector<32x256xf32>
    %c0_135 = arith.constant 0 : index
    %c0_136 = arith.constant 0 : index
    %125 = vector.load %arg9[%c0_135, %c0_136] : memref<1x256xf32, #tpu.memory_space<vmem>>, vector<1x256xf32>
    %126 = vector.broadcast %125 : vector<1x256xf32> to vector<32x256xf32>
    %127 = arith.mulf %124, %126 : vector<32x256xf32>
    %c0_137 = arith.constant 0 : index
    %c0_138 = arith.constant 0 : index
    %128 = vector.load %arg10[%c0_137, %c0_138] : memref<1x256xf32, #tpu.memory_space<vmem>>, vector<1x256xf32>
    %129 = vector.broadcast %128 : vector<1x256xf32> to vector<32x256xf32>
    %130 = arith.addf %127, %129 : vector<32x256xf32>
    %cst_139 = arith.constant 0.000000e+00 : f32
    %131 = vector.broadcast %cst_139 : f32 to vector<32x256xf32>
    %132 = arith.maximumf %130, %131 : vector<32x256xf32>
    %133 = vector.shape_cast %132 : vector<32x256xf32> to vector<2x2x2x2x2x256xf32>
    %134 = vector.extract_strided_slice %133 {offsets = [0, 0, 0, 0, 0, 0], sizes = [2, 2, 1, 2, 2, 256], strides = [1, 1, 1, 1, 1, 1]} : vector<2x2x2x2x2x256xf32> to vector<2x2x1x2x2x256xf32>
    %135 = vector.shape_cast %134 : vector<2x2x1x2x2x256xf32> to vector<2x2x2x2x256xf32>
    %136 = vector.extract_strided_slice %133 {offsets = [0, 0, 1, 0, 0, 0], sizes = [2, 2, 1, 2, 2, 256], strides = [1, 1, 1, 1, 1, 1]} : vector<2x2x2x2x2x256xf32> to vector<2x2x1x2x2x256xf32>
    %137 = vector.shape_cast %136 : vector<2x2x1x2x2x256xf32> to vector<2x2x2x2x256xf32>
    %138 = arith.maximumf %135, %137 : vector<2x2x2x2x256xf32>
    %139 = vector.extract_strided_slice %138 {offsets = [0, 0, 0, 0, 0], sizes = [2, 2, 2, 1, 256], strides = [1, 1, 1, 1, 1]} : vector<2x2x2x2x256xf32> to vector<2x2x2x1x256xf32>
    %140 = vector.shape_cast %139 : vector<2x2x2x1x256xf32> to vector<2x2x2x256xf32>
    %141 = vector.extract_strided_slice %138 {offsets = [0, 0, 0, 1, 0], sizes = [2, 2, 2, 1, 256], strides = [1, 1, 1, 1, 1]} : vector<2x2x2x2x256xf32> to vector<2x2x2x1x256xf32>
    %142 = vector.shape_cast %141 : vector<2x2x2x1x256xf32> to vector<2x2x2x256xf32>
    %143 = arith.maximumf %140, %142 : vector<2x2x2x256xf32>
    %144 = vector.shape_cast %143 : vector<2x2x2x256xf32> to vector<2x4x256xf32>
    %145 = vector.extract_strided_slice %144 {offsets = [0, 0, 0], sizes = [2, 1, 256], strides = [1, 1, 1]} : vector<2x4x256xf32> to vector<2x1x256xf32>
    %146 = vector.shape_cast %145 : vector<2x1x256xf32> to vector<2x256xf32>
    %147 = vector.extract_strided_slice %144 {offsets = [0, 1, 0], sizes = [2, 1, 256], strides = [1, 1, 1]} : vector<2x4x256xf32> to vector<2x1x256xf32>
    %148 = vector.shape_cast %147 : vector<2x1x256xf32> to vector<2x256xf32>
    %149 = arith.addf %146, %148 : vector<2x256xf32>
    %150 = vector.extract_strided_slice %144 {offsets = [0, 2, 0], sizes = [2, 1, 256], strides = [1, 1, 1]} : vector<2x4x256xf32> to vector<2x1x256xf32>
    %151 = vector.shape_cast %150 : vector<2x1x256xf32> to vector<2x256xf32>
    %152 = arith.addf %149, %151 : vector<2x256xf32>
    %153 = vector.extract_strided_slice %144 {offsets = [0, 3, 0], sizes = [2, 1, 256], strides = [1, 1, 1]} : vector<2x4x256xf32> to vector<2x1x256xf32>
    %154 = vector.shape_cast %153 : vector<2x1x256xf32> to vector<2x256xf32>
    %155 = arith.addf %152, %154 : vector<2x256xf32>
    %cst_140 = arith.constant 2.500000e-01 : f32
    %156 = vector.broadcast %cst_140 : f32 to vector<2x256xf32>
    %157 = arith.mulf %155, %156 : vector<2x256xf32>
    %158 = arith.truncf %157 : vector<2x256xf32> to vector<2x256xbf16>
    %c0_141 = arith.constant 0 : index
    %c0_142 = arith.constant 0 : index
    %159 = vector.load %arg11[%c0_141, %c0_142] : memref<256x128xbf16, #tpu.memory_space<vmem>>, vector<256x128xbf16>
    %cst_143 = arith.constant dense<0.000000e+00> : vector<2x128xf32>
    %160 = tpu.matmul %158, %159, %cst_143 {dimension_numbers = #tpu.dot_dimension_numbers<[1], [0], [0], [1], [0, 0, 1, 1], [], []>} : vector<2x256xbf16>, vector<256x128xbf16>, vector<2x128xf32> -> vector<2x128xf32>
    %c0_144 = arith.constant 0 : index
    %c0_145 = arith.constant 0 : index
    %161 = vector.load %arg12[%c0_144, %c0_145] : memref<1x128xf32, #tpu.memory_space<vmem>>, vector<1x128xf32>
    %162 = vector.broadcast %161 : vector<1x128xf32> to vector<2x128xf32>
    %163 = arith.addf %160, %162 : vector<2x128xf32>
    %cst_146 = arith.constant 0.000000e+00 : f32
    %164 = vector.broadcast %cst_146 : f32 to vector<2x128xf32>
    %165 = arith.maximumf %163, %164 : vector<2x128xf32>
    %166 = arith.truncf %165 : vector<2x128xf32> to vector<2x128xbf16>
    %c0_147 = arith.constant 0 : index
    %c0_148 = arith.constant 0 : index
    %167 = vector.load %arg13[%c0_147, %c0_148] : memref<128x10xbf16, #tpu.memory_space<vmem>>, vector<128x10xbf16>
    %cst_149 = arith.constant dense<0.000000e+00> : vector<2x10xf32>
    %168 = tpu.matmul %166, %167, %cst_149 {dimension_numbers = #tpu.dot_dimension_numbers<[1], [0], [0], [1], [0, 0, 1, 1], [], []>} : vector<2x128xbf16>, vector<128x10xbf16>, vector<2x10xf32> -> vector<2x10xf32>
    %c0_150 = arith.constant 0 : index
    %c0_151 = arith.constant 0 : index
    %169 = vector.load %arg14[%c0_150, %c0_151] : memref<1x10xf32, #tpu.memory_space<vmem>>, vector<1x10xf32>
    %170 = vector.broadcast %169 : vector<1x10xf32> to vector<2x10xf32>
    %171 = arith.addf %168, %170 : vector<2x10xf32>
    %c0_152 = arith.constant 0 : index
    %c0_153 = arith.constant 0 : index
    %172 = vector.load %arg15[%c0_152, %c0_153] : memref<2x10xf32, #tpu.memory_space<vmem>>, vector<2x10xf32>
    tpu.vector_store %arg15[%c0_152, %c0_153], %171 {strides = array<i32>} : memref<2x10xf32, #tpu.memory_space<vmem>>, vector<2x10xf32>,
    return
  }
  func.func @transform_0(%arg0: i32) -> (i32, i32) {
    %c0_i32 = arith.constant 0 : i32
    %c0_i32_0 = arith.constant 0 : i32
    %c0_i32_1 = arith.constant 0 : i32
    return %c0_i32, %c0_i32_0 : i32, i32
  }
  func.func @transform_1(%arg0: i32) -> (i32, i32) {
    %c0_i32 = arith.constant 0 : i32
    %c0_i32_0 = arith.constant 0 : i32
    %c0_i32_1 = arith.constant 0 : i32
    return %c0_i32, %c0_i32_0 : i32, i32
  }
  func.func @transform_2(%arg0: i32) -> (i32, i32) {
    %c0_i32 = arith.constant 0 : i32
    %c0_i32_0 = arith.constant 0 : i32
    %c0_i32_1 = arith.constant 0 : i32
    return %c0_i32, %c0_i32_0 : i32, i32
  }
  func.func @transform_3(%arg0: i32) -> (i32, i32) {
    %c0_i32 = arith.constant 0 : i32
    %c0_i32_0 = arith.constant 0 : i32
    %c0_i32_1 = arith.constant 0 : i32
    return %c0_i32, %c0_i32_0 : i32, i32
  }
  func.func @transform_4(%arg0: i32) -> (i32, i32) {
    %c0_i32 = arith.constant 0 : i32
    %c0_i32_0 = arith.constant 0 : i32
    %c0_i32_1 = arith.constant 0 : i32
    return %c0_i32, %c0_i32_0 : i32, i32
  }
  func.func @transform_5(%arg0: i32) -> (i32, i32) {
    %c0_i32 = arith.constant 0 : i32
    %c0_i32_0 = arith.constant 0 : i32
    %c0_i32_1 = arith.constant 0 : i32
    return %c0_i32, %c0_i32_0 : i32, i32
  }
  func.func @transform_6(%arg0: i32) -> (i32, i32) {
    %c0_i32 = arith.constant 0 : i32
    %c0_i32_0 = arith.constant 0 : i32
    %c0_i32_1 = arith.constant 0 : i32
    return %c0_i32, %c0_i32_0 : i32, i32
  }
  func.func @transform_7(%arg0: i32) -> (i32, i32) {
    %c0_i32 = arith.constant 0 : i32
    %c0_i32_0 = arith.constant 0 : i32
    %c0_i32_1 = arith.constant 0 : i32
    return %c0_i32, %c0_i32_0 : i32, i32
  }
  func.func @transform_8(%arg0: i32) -> (i32, i32) {
    %c0_i32 = arith.constant 0 : i32
    %c0_i32_0 = arith.constant 0 : i32
    %c0_i32_1 = arith.constant 0 : i32
    return %c0_i32, %c0_i32_0 : i32, i32
  }
  func.func @transform_9(%arg0: i32) -> (i32, i32) {
    %c0_i32 = arith.constant 0 : i32
    %c0_i32_0 = arith.constant 0 : i32
    %c0_i32_1 = arith.constant 0 : i32
    return %c0_i32, %c0_i32_0 : i32, i32
  }
  func.func @transform_10(%arg0: i32) -> (i32, i32) {
    %c0_i32 = arith.constant 0 : i32
    %c0_i32_0 = arith.constant 0 : i32
    %c0_i32_1 = arith.constant 0 : i32
    return %c0_i32, %c0_i32_0 : i32, i32
  }
  func.func @transform_11(%arg0: i32) -> (i32, i32) {
    %c0_i32 = arith.constant 0 : i32
    %c0_i32_0 = arith.constant 0 : i32
    %c0_i32_1 = arith.constant 0 : i32
    return %c0_i32, %c0_i32_0 : i32, i32
  }
  func.func @transform_12(%arg0: i32) -> (i32, i32) {
    %c0_i32 = arith.constant 0 : i32
    %c0_i32_0 = arith.constant 0 : i32
    %c0_i32_1 = arith.constant 0 : i32
    return %c0_i32, %c0_i32_0 : i32, i32
  }
  func.func @transform_13(%arg0: i32) -> (i32, i32) {
    %c0_i32 = arith.constant 0 : i32
    %c0_i32_0 = arith.constant 0 : i32
    %c0_i32_1 = arith.constant 0 : i32
    return %c0_i32, %c0_i32_0 : i32, i32
  }
  func.func @transform_14(%arg0: i32) -> (i32, i32) {
    %c0_i32 = arith.constant 0 : i32
    %c0_i32_0 = arith.constant 0 : i32
    %c0_i32_1 = arith.constant 0 : i32
    return %c0_i32, %c0_i32_0 : i32, i32
  }
}

</mosaic_0001>

<bundles_post_ra>
// kernel: baseline_forward.1
= control target key start
LH: loop header
LB: loop body
LE: loop exit
PB: predicated region body
PF: predicated region fallthrough
CT: control target
= control target key end

     0   :  { %vm385_vm0 = vcmask 1044480   ;;  %vm386_vm1 = vcmask 1045504   ;;  %v8905_v2 = vmov 65535   ;;  %vm288_vm2 = vcmask 220160   ;;  %s11126_s0 = inlined_call_operand.vmem [shape: bf16[512,27], index: 0, kind: input, shape index: {}]   ;;  %s11127_s1 = inlined_call_operand.vmem [shape: bf16[27,64], index: 1, kind: input, shape index: {}]   ;;  %s11128_s2 = inlined_call_operand.vmem [shape: f32[1,64], index: 2, kind: input, shape index: {}]   ;;  %s11129_s3 = inlined_call_operand.vmem [shape: f32[1,64], index: 3, kind: input, shape index: {}]   ;;  %s11130_s4 = inlined_call_operand.vmem [shape: bf16[576,128], index: 4, kind: input, shape index: {}]   ;;  %s11131_s5 = inlined_call_operand.vmem [shape: f32[1,128], index: 5, kind: input, shape index: {}]   ;;  %s11132_s6 = inlined_call_operand.vmem [shape: f32[1,128], index: 6, kind: input, shape index: {}]   ;;  %s11133_s7 = inlined_call_operand.vmem [shape: bf16[1152,256], index: 7, kind: input, shape index: {}]   ;;  %s11134_s8 = inlined_call_operand.vmem [shape: f32[1,256], index: 8, kind: input, shape index: {}]   ;;  %s11135_s9 = inlined_call_operand.vmem [shape: f32[1,256], index: 9, kind: input, shape index: {}]   ;;  %s11136_s10 = inlined_call_operand.vmem [shape: bf16[256,128], index: 10, kind: input, shape index: {}]   ;;  %s11137_s11 = inlined_call_operand.vmem [shape: f32[1,128], index: 11, kind: input, shape index: {}]   ;;  %s11138_s12 = inlined_call_operand.vmem [shape: bf16[128,10], index: 12, kind: input, shape index: {}]   ;;  %s11139_s13 = inlined_call_operand.vmem [shape: f32[1,10], index: 13, kind: input, shape index: {}]   ;;  %s11140_s14 = inlined_call_operand.hbm [shape: f32[2,10], index: 14, kind: output, shape index: {}]  }
   0x1   :  { %v8531_v0 = vld [vmem:[%s11127_s1] sm:$0xff]   ;;  %v8532_v1 = vld [vmem:[%s11127_s1 + $0x8] sm:$0x3f]   ;;  %v387_v3 = vsel %vm385_vm0, 4294967295, %v8905_v2  ;;  %v8535_v8 = vld [vmem:[%s11126_s0 + $0x10] sm:$0xff]   ;;  %vm3063_vm3 = vcmask 523264  }
   0x2   :  { %8380 = vmatprep.subr.bf16.mxu0 %v8531_v0  ;;  %v8533_v4 = vld [vmem:[%s11126_s0] sm:$0xff]   ;;  %v388_v5 = vsel %vm386_vm1, %v387_v3, 0  ;;  %v8534_v7 = vld [vmem:[%s11126_s0 + $0x8] sm:$0xff]   ;;  %v8536_v9 = vld [vmem:[%s11126_s0 + $0x18] sm:$0xff]   ;;  %vm3065_vm4 = vcmask 517120   ;;  %v11141_v35 = vmov 0.0  }
   0x3   :  { %8381 = vmatpush3.bf16.msra.mxu0 %v8531_v0  ;;  %v390_v6 = vand.u32 %v8532_v1, %v388_v5  ;;  %8384 = vmatprep.mubr.msk.bf16.mxu0 %vm288_vm2, %v8533_v4  ;;  %v8537_v10 = vld [vmem:[%s11126_s0 + $0x20] sm:$0xff]   ;;  %v8538_v11 = vld [vmem:[%s11126_s0 + $0x28] sm:$0xff]   ;;  %v8539_v12 = vld [vmem:[%s11126_s0 + $0x30] sm:$0xff]   ;;  %3067 = vst.msk [vmem:[#allocation2 + $0x10] sm:$0xff] %vm3063_vm3, %v11141_v35 }
   0x4   :  { %v8540_v13 = vld [vmem:[%s11126_s0 + $0x38] sm:$0xff]   ;;  %v8541_v14 = vld [vmem:[%s11126_s0 + $0x40] sm:$0xff]   ;;  %v8542_v15 = vld [vmem:[%s11126_s0 + $0x48] sm:$0xff]   ;;  %3068 = vst.msk [vmem:[#allocation2 + $0x18] sm:$0x3] %vm3065_vm4, %v11141_v35 }
   0x5   :  { %8382 = vmatprep.subr.bf16.mxu0 %v390_v6  ;;  %v8543_v16 = vld [vmem:[%s11126_s0 + $0x50] sm:$0xff]   ;;  %v8544_v17 = vld [vmem:[%s11126_s0 + $0x58] sm:$0xff]   ;;  %v8545_v18 = vld [vmem:[%s11126_s0 + $0x60] sm:$0xff]   ;;  %3064 = vst.msk [vmem:[#allocation2] sm:$0xff] %vm3063_vm3, %v11141_v35 }
   0x6   :  { %v8546_v19 = vld [vmem:[%s11126_s0 + $0x68] sm:$0xff]   ;;  %v8547_v20 = vld [vmem:[%s11126_s0 + $0x70] sm:$0xff]   ;;  %v8548_v21 = vld [vmem:[%s11126_s0 + $0x78] sm:$0xff]   ;;  %3066 = vst.msk [vmem:[#allocation2 + $0x8] sm:$0x3] %vm3065_vm4, %v11141_v35 }
   0x7   :  { %8383 = vmatpush3.bf16.msra.mxu0 %v390_v6  ;;  %v8549_v22 = vld [vmem:[%s11126_s0 + $0x80] sm:$0xff]   ;;  %v8550_v23 = vld [vmem:[%s11126_s0 + $0x88] sm:$0xff]   ;;  %v8551_v24 = vld [vmem:[%s11126_s0 + $0x90] sm:$0xff]   ;;  %3069 = vst.msk [vmem:[#allocation2 + $0x20] sm:$0xff] %vm3063_vm3, %v11141_v35 }
   0x8   :  { %v8552_v25 = vld [vmem:[%s11126_s0 + $0x98] sm:$0xff]   ;;  %v8553_v26 = vld [vmem:[%s11126_s0 + $0xa0] sm:$0xff]   ;;  %v8554_v27 = vld [vmem:[%s11126_s0 + $0xa8] sm:$0xff]   ;;  %3070 = vst.msk [vmem:[#allocation2 + $0x28] sm:$0x3] %vm3065_vm4, %v11141_v35 }
   0x9   :  { %v8555_v28 = vld [vmem:[%s11126_s0 + $0xb0] sm:$0xff]   ;;  %v8556_v29 = vld [vmem:[%s11126_s0 + $0xb8] sm:$0xff]   ;;  %v8557_v30 = vld [vmem:[%s11126_s0 + $0xc0] sm:$0xff]   ;;  %3071 = vst.msk [vmem:[#allocation2 + $0x30] sm:$0xff] %vm3063_vm3, %v11141_v35 }
   0xa   :  { %8385 = vmatmul.mubr.msk.bf16.vlgmr.msra.gmra.mrb[0].mxu0 %vm288_vm2, %v8534_v7  ;;  %v8558_v31 = vld [vmem:[%s11126_s0 + $0xc8] sm:$0xff]   ;;  %v8559_v32 = vld [vmem:[%s11126_s0 + $0xd0] sm:$0xff]   ;;  %v8560_v33 = vld [vmem:[%s11126_s0 + $0xd8] sm:$0xff]   ;;  %3072 = vst.msk [vmem:[#allocation2 + $0x38] sm:$0x3] %vm3065_vm4, %v11141_v35 }
   0xb   :  { %8388 = vmatprep.mubr.msk.bf16.mxu0 %vm288_vm2, %v8535_v8  ;;  %v8561_v34 = vld [vmem:[%s11126_s0 + $0xe0] sm:$0xff]   ;;  %3073 = vst.msk [vmem:[#allocation2 + $0x40] sm:$0xff] %vm3063_vm3, %v11141_v35  ;;  %3075 = vst.msk [vmem:[#allocation2 + $0x50] sm:$0xff] %vm3063_vm3, %v11141_v35  ;;  %v8562_v36 = vld [vmem:[%s11126_s0 + $0xe8] sm:$0xff]  }
   0xc   :  { %3074 = vst.msk [vmem:[#allocation2 + $0x48] sm:$0x3] %vm3065_vm4, %v11141_v35  ;;  %3076 = vst.msk [vmem:[#allocation2 + $0x58] sm:$0x3] %vm3065_vm4, %v11141_v35  ;;  %v8563_v37 = vld [vmem:[%s11126_s0 + $0xf0] sm:$0xff]   ;;  %v8564_v38 = vld [vmem:[%s11126_s0 + $0xf8] sm:$0xff]  }
   0xd   :  { %3077 = vst.msk [vmem:[#allocation2 + $0x60] sm:$0xff] %vm3063_vm3, %v11141_v35  ;;  %3079 = vst.msk [vmem:[#allocation2 + $0x70] sm:$0xff] %vm3063_vm3, %v11141_v35 }
   0xe   :  { %3078 = vst.msk [vmem:[#allocation2 + $0x68] sm:$0x3] %vm3065_vm4, %v11141_v35  ;;  %3080 = vst.msk [vmem:[#allocation2 + $0x78] sm:$0x3] %vm3065_vm4, %v11141_v35 }
   0xf   :  { %3081 = vst.msk [vmem:[#allocation2 + $0x80] sm:$0xff] %vm3063_vm3, %v11141_v35  ;;  %3083 = vst.msk [vmem:[#allocation2 + $0x90] sm:$0xff] %vm3063_vm3, %v11141_v35 }
  0x10   :  { %3082 = vst.msk [vmem:[#allocation2 + $0x88] sm:$0x3] %vm3065_vm4, %v11141_v35  ;;  %3084 = vst.msk [vmem:[#allocation2 + $0x98] sm:$0x3] %vm3065_vm4, %v11141_v35 }
  0x11   :  { %3085 = vst.msk [vmem:[#allocation2 + $0xa0] sm:$0xff] %vm3063_vm3, %v11141_v35  ;;  %3087 = vst.msk [vmem:[#allocation2 + $0xb0] sm:$0xff] %vm3063_vm3, %v11141_v35 }
  0x12   :  { %8389 = vmatmul.mubr.msk.bf16.gmra.mrb[4].mxu0 %vm288_vm2, %v8536_v9  ;;  %3086 = vst.msk [vmem:[#allocation2 + $0xa8] sm:$0x3] %vm3065_vm4, %v11141_v35  ;;  %3088 = vst.msk [vmem:[#allocation2 + $0xb8] sm:$0x3] %vm3065_vm4, %v11141_v35 }
  0x13   :  { %8392 = vmatprep.mubr.msk.bf16.mxu0 %vm288_vm2, %v8537_v10  ;;  %3089 = vst.msk [vmem:[#allocation2 + $0xc0] sm:$0xff] %vm3063_vm3, %v11141_v35  ;;  %3091 = vst.msk [vmem:[#allocation2 + $0xd0] sm:$0xff] %vm3063_vm3, %v11141_v35 }
  0x14   :  { %3090 = vst.msk [vmem:[#allocation2 + $0xc8] sm:$0x3] %vm3065_vm4, %v11141_v35  ;;  %3092 = vst.msk [vmem:[#allocation2 + $0xd8] sm:$0x3] %vm3065_vm4, %v11141_v35 }
  0x15   :  { %3093 = vst.msk [vmem:[#allocation2 + $0xe0] sm:$0xff] %vm3063_vm3, %v11141_v35  ;;  %3095 = vst.msk [vmem:[#allocation2 + $0xf0] sm:$0xff] %vm3063_vm3, %v11141_v35 }
  0x16   :  { %3094 = vst.msk [vmem:[#allocation2 + $0xe8] sm:$0x3] %vm3065_vm4, %v11141_v35  ;;  %3096 = vst.msk [vmem:[#allocation2 + $0xf8] sm:$0x3] %vm3065_vm4, %v11141_v35 }
  0x17   :  { %3097 = vst.msk [vmem:[#allocation2 + $0x100] sm:$0xff] %vm3063_vm3, %v11141_v35  ;;  %3099 = vst.msk [vmem:[#allocation2 + $0x110] sm:$0xff] %vm3063_vm3, %v11141_v35 }
  0x18   :  { %3098 = vst.msk [vmem:[#allocation2 + $0x108] sm:$0x3] %vm3065_vm4, %v11141_v35  ;;  %3100 = vst.msk [vmem:[#allocation2 + $0x118] sm:$0x3] %vm3065_vm4, %v11141_v35 }
  0x19   :  { %3101 = vst.msk [vmem:[#allocation2 + $0x120] sm:$0xff] %vm3063_vm3, %v11141_v35  ;;  %3103 = vst.msk [vmem:[#allocation2 + $0x130] sm:$0xff] %vm3063_vm3, %v11141_v35 }
  0x1a   :  { %8393 = vmatmul.mubr.msk.bf16.gmra.mrb[8].mxu0 %vm288_vm2, %v8538_v11  ;;  %3102 = vst.msk [vmem:[#allocation2 + $0x128] sm:$0x3] %vm3065_vm4, %v11141_v35  ;;  %3104 = vst.msk [vmem:[#allocation2 + $0x138] sm:$0x3] %vm3065_vm4, %v11141_v35 }
  0x1b   :  { %8396 = vmatprep.mubr.msk.bf16.mxu0 %vm288_vm2, %v8539_v12  ;;  %5564 = vst [vmem:[#allocation4] sm:$0x3f] %v11141_v35  ;;  %5565 = vst [vmem:[#allocation4 + $0x8] sm:$0x3f] %v11141_v35 }
  0x1c   :  { %5566 = vst [vmem:[#allocation4 + $0x10] sm:$0x3f] %v11141_v35  ;;  %5567 = vst [vmem:[#allocation4 + $0x18] sm:$0x3f] %v11141_v35 }
  0x1d   :  { %5568 = vst [vmem:[#allocation4 + $0x20] sm:$0x3f] %v11141_v35  ;;  %5569 = vst [vmem:[#allocation4 + $0x28] sm:$0x3f] %v11141_v35 }
  0x1e   :  { %5570 = vst [vmem:[#allocation4 + $0x30] sm:$0x3f] %v11141_v35  ;;  %5571 = vst [vmem:[#allocation4 + $0x38] sm:$0x3f] %v11141_v35 }
  0x1f   :  { %5572 = vst [vmem:[#allocation4 + $0x40] sm:$0x3f] %v11141_v35  ;;  %5573 = vst [vmem:[#allocation4 + $0x48] sm:$0x3f] %v11141_v35 }
  0x20   :  { %5574 = vst [vmem:[#allocation4 + $0x50] sm:$0x3f] %v11141_v35  ;;  %5575 = vst [vmem:[#allocation4 + $0x58] sm:$0x3f] %v11141_v35 }
  0x22   :  { %8397 = vmatmul.mubr.msk.bf16.gmra.mrb[12].mxu0 %vm288_vm2, %v8540_v13 }
  0x23   :  { %8400 = vmatprep.mubr.msk.bf16.mxu0 %vm288_vm2, %v8541_v14 }
  0x2a   :  { %8401 = vmatmul.mubr.msk.bf16.gmra.mrb[16].mxu0 %vm288_vm2, %v8542_v15 }
  0x2b   :  { %8404 = vmatprep.mubr.msk.bf16.mxu0 %vm288_vm2, %v8543_v16 }
  0x32   :  { %8405 = vmatmul.mubr.msk.bf16.gmra.mrb[20].mxu0 %vm288_vm2, %v8544_v17 }
  0x33   :  { %8408 = vmatprep.mubr.msk.bf16.mxu0 %vm288_vm2, %v8545_v18 }
  0x3a   :  { %8409 = vmatmul.mubr.msk.bf16.gmra.mrb[24].mxu0 %vm288_vm2, %v8546_v19 }
  0x3b   :  { %8412 = vmatprep.mubr.msk.bf16.mxu0 %vm288_vm2, %v8547_v20 }
  0x42   :  { %8413 = vmatmul.mubr.msk.bf16.gmra.mrb[28].mxu0 %vm288_vm2, %v8548_v21 }
  0x43   :  { %8416 = vmatprep.mubr.msk.bf16.mxu0 %vm288_vm2, %v8549_v22 }
  0x4a   :  { %8417 = vmatmul.mubr.msk.bf16.gmra.mrb[32].mxu0 %vm288_vm2, %v8550_v23 }
  0x4b   :  { %8420 = vmatprep.mubr.msk.bf16.mxu0 %vm288_vm2, %v8551_v24 }
  0x52   :  { %8421 = vmatmul.mubr.msk.bf16.gmra.mrb[36].mxu0 %vm288_vm2, %v8552_v25 }
  0x53   :  { %8424 = vmatprep.mubr.msk.bf16.mxu0 %vm288_vm2, %v8553_v26 }
  0x5a   :  { %8425 = vmatmul.mubr.msk.bf16.gmra.mrb[40].mxu0 %vm288_vm2, %v8554_v27 }
  0x5b   :  { %8428 = vmatprep.mubr.msk.bf16.mxu0 %vm288_vm2, %v8555_v28 }
  0x62   :  { %8429 = vmatmul.mubr.msk.bf16.gmra.mrb[44].mxu0 %vm288_vm2, %v8556_v29 }
  0x63   :  { %8432 = vmatprep.mubr.msk.bf16.mxu0 %vm288_vm2, %v8557_v30 }
  0x6a   :  { %8433 = vmatmul.mubr.msk.bf16.gmra.mrb[48].mxu0 %vm288_vm2, %v8558_v31 }
  0x6b   :  { %8436 = vmatprep.mubr.msk.bf16.mxu0 %vm288_vm2, %v8559_v32 }
  0x72   :  { %8437 = vmatmul.mubr.msk.bf16.gmra.mrb[52].mxu0 %vm288_vm2, %v8560_v33 }
  0x73   :  { %8440 = vmatprep.mubr.msk.bf16.mxu0 %vm288_vm2, %v8561_v34 }
  0x7a   :  { %8441 = vmatmul.mubr.msk.bf16.gmra.mrb[56].mxu0 %vm288_vm2, %v8562_v36 }
  0x7b   :  { %8444 = vmatprep.mubr.msk.bf16.mxu0 %vm288_vm2, %v8563_v37 }
  0x7c   :  { %19 = vsyncpa [#allocation7], 0  ;;  %v8907_v39 = vmov 1983009808   ;;  %v955_v41 = vlaneseq  ;;  %v9216_v42 = vld [vmem:[%s11128_s2] ss:$0 sm:$0xff] }
  0x7d   :  { %v953_v40 = vunpack.c.l.s4 %v8907_v39  ;;  %v9223_v46 = vld [vmem:[%s11129_s3] ss:$0 sm:$0xff]  ;;  %vm3745_vm5 = vcmask 1041409   ;;  %vm3747_vm6 = vcmask 1042434   ;;  %vm3749_vm7 = vcmask 1043459   ;;  %s8908_s18 = smov 64  }
  0x7e   :  { %v9218_v44 = vshrl.u32 %v955_v41, 7  ;;  %vm3751_vm8 = vcmask 1044484   ;;  %vm3753_vm9 = vcmask 1045509   ;;  %vm3755_vm10 = vcmask 1046534  }
  0x7f   :  { %v954_v43 = vunpack.c.0.s8 %v953_v40  ;;  %vm3757_vm11 = vcmask 1047559   ;;  %vm3985_vm12 = vcmask 1048064   ;;  %vm8910_vm13 = vmmov 0  }
  0x80   :  { %11145 = vst [vmem:[#allocation9_spill] sm:$0xff] %v9218_v44  ;;  %v9239_v2 = vsub.s32 0, %v9218_v44  ;;  %vm7707_vm14 = vcmask 74752  }
  0x81   :  { %v9229_v52 = vsub.s32 %v954_v43, %v9218_v44 }
  0x82   :  { %8445 = vmatmul.mubr.msk.bf16.gmra.mrb[60].mxu0 %vm288_vm2, %v8564_v38 }
  0xdd   :  { %v8386_v45 = vpop.f32.mrb[0].mxu0 }
  0xde   :  { %v690_v47 = vmul.f32 %v8386_v45, %v9216_v42  ;;  %v426_v48 = vpop.f32.mrb[1].mxu0 }
  0xdf   :  { %v688_v49 = vmul.f32 %v9216_v42, %v426_v48  ;;  %v8387_v50 = vpop.f32.mrb[2].mxu0 }
  0xe0   :  { %v761_v51 = vadd.f32 %v9223_v46, %v690_v47  ;;  %v691_v53 = vmul.f32 %v8387_v50, %v9216_v42  ;;  %v429_v54 = vpop.f32.mrb[3].mxu0 }
  0xe1   :  { %v759_v55 = vadd.f32 %v9223_v46, %v688_v49  ;;  %v689_v56 = vmul.f32 %v9216_v42, %v429_v54 }
  0xe2   :  { %v825_v57 = vmax.f32 %v761_v51, 0.0  ;;  %v762_v58 = vadd.f32 %v9223_v46, %v691_v53 }
  0xe3   :  { %v823_v59 = vmax.f32 %v759_v55, 0.0  ;;  %v760_v60 = vadd.f32 %v9223_v46, %v689_v56 }
  0xe4   :  { %v985_v61 = vcombine.high %v825_v57, %v825_v57  ;;  %v992_v62 = vrot.slane %v825_v57, %v9229_v52  ;;  %v826_v63 = vmax.f32 %v762_v58, 0.0 }
  0xe5   :  { %v951_v0 = vcombine.high %v823_v59, %v823_v59  ;;  %v958_v1 = vrot.slane %v823_v59, %v9229_v52  ;;  %v824_v3 = vmax.f32 %v760_v60, 0.0  ;;  %v8390_v4 = vpop.f32.mrb[4].mxu0 }
  0xe6   :  { %v999_v5 = vrot.slane %v985_v61, %v9229_v52  ;;  %v1000_v6 = vcombine.high %v992_v62, %v992_v62  ;;  %v1002_v7 = vcombine.high %v826_v63, %v826_v63  ;;  %v1009_v8 = vrot.slane %v826_v63, %v9229_v52  ;;  %v442_v9 = vpop.f32.mrb[5].mxu0 }
  0xe7   :  { %v965_v10 = vrot.slane %v951_v0, %v9229_v52  ;;  %v966_v11 = vcombine.high %v958_v1, %v958_v1  ;;  %v2295_v12 = vmax.f32 %v958_v1, %v992_v62  ;;  %v968_v13 = vcombine.high %v824_v3, %v824_v3  ;;  %v8391_v14 = vpop.f32.mrb[6].mxu0 }
  0xe8   :  { %v1001_v15 = vcombine.high %v999_v5, %v999_v5  ;;  %v1016_v16 = vrot.slane %v1002_v7, %v9229_v52  ;;  %v1017_v17 = vcombine.high %v1009_v8, %v1009_v8  ;;  %v975_v18 = vrot.slane %v824_v3, %v9229_v52  ;;  %v445_v19 = vpop.f32.mrb[7].mxu0 }
  0xe9   :  { %v967_v20 = vcombine.high %v965_v10, %v965_v10  ;;  %v2296_v21 = vmax.f32 %v966_v11, %v1000_v6  ;;  %v2297_v22 = vmax.f32 %v965_v10, %v999_v5  ;;  %v7791_v23 = vrot.slane %v2295_v12, 9 }
  0xea   :  { %v1018_v24 = vcombine.high %v1016_v16, %v1016_v16  ;;  %v982_v25 = vrot.slane %v968_v13, %v9229_v52  ;;  %v983_v26 = vcombine.high %v975_v18, %v975_v18  ;;  %v2299_v27 = vmax.f32 %v975_v18, %v1009_v8 }
  0xeb   :  { %v2298_v28 = vmax.f32 %v967_v20, %v1001_v15  ;;  %v7792_v29 = vrot.slane %v2296_v21, 9  ;;  %v7793_v30 = vrot.slane %v2297_v22, 9  ;;  %v2935_v31 = vmax.f32 %v2295_v12, %v7791_v23 }
  0xec   :  { %v984_v32 = vcombine.high %v982_v25, %v982_v25  ;;  %v2300_v33 = vmax.f32 %v983_v26, %v1017_v17  ;;  %v2301_v34 = vmax.f32 %v982_v25, %v1016_v16  ;;  %v7795_v36 = vrot.slane %v2299_v27, 9 }
  0xed   :  { %v7794_v37 = vrot.slane %v2298_v28, 9  ;;  %v2936_v38 = vmax.f32 %v2296_v21, %v7792_v29  ;;  %v2937_v39 = vmax.f32 %v2297_v22, %v7793_v30  ;;  %v3236_v40 = vrot.slane %v2935_v31, %v9239_v2  ;;  %v8394_v41 = vpop.f32.mrb[8].mxu0 }
  0xee   :  { %v2302_v43 = vmax.f32 %v984_v32, %v1018_v24  ;;  %v7796_v45 = vrot.slane %v2300_v33, 9  ;;  %v7797_v47 = vrot.slane %v2301_v34, 9  ;;  %v2939_v48 = vmax.f32 %v2299_v27, %v7795_v36  ;;  %v458_v49 = vpop.f32.mrb[9].mxu0 }
  0xef   :  { %v2938_v50 = vmax.f32 %v2298_v28, %v7794_v37  ;;  %v3240_v51 = vrot.slane %v2936_v38, %v9239_v2  ;;  %v3244_v53 = vrot.slane %v2937_v39, %v9239_v2  ;;  %v694_v54 = vmul.f32 %v8390_v4, %v9216_v42  ;;  %v8395_v55 = vpop.f32.mrb[10].mxu0 }
  0xf0   :  { %v7798_v56 = vrot.slane %v2302_v43, 9  ;;  %v2940_v57 = vmax.f32 %v2300_v33, %v7796_v45  ;;  %v2941_v58 = vmax.f32 %v2301_v34, %v7797_v47  ;;  %v3252_v59 = vrot.slane %v2939_v48, %v9239_v2  ;;  %v9252_v60 = vpop.f32.mrb[11].mxu0 }
  0xf1   :  { %v3248_v61 = vrot.slane %v2938_v50, %v9239_v2  ;;  %v3746_v62 = vsel %vm3745_vm5, %v3240_v51, %v3236_v40  ;;  %v765_v63 = vadd.f32 %v9223_v46, %v694_v54  ;;  %v692_v0 = vmul.f32 %v9216_v42, %v442_v9 }
  0xf2   :  { %v3748_v1 = vsel %vm3747_vm6, %v3244_v53, %v3746_v62  ;;  %v2942_v3 = vmax.f32 %v2302_v43, %v7798_v56  ;;  %v3256_v4 = vrot.slane %v2940_v57, %v9239_v2  ;;  %v3260_v5 = vrot.slane %v2941_v58, %v9239_v2 }
  0xf3   :  { %v3750_v6 = vsel %vm3749_vm7, %v3248_v61, %v3748_v1  ;;  %v829_v7 = vmax.f32 %v765_v63, 0.0  ;;  %v763_v8 = vadd.f32 %v9223_v46, %v692_v0  ;;  %v695_v10 = vmul.f32 %v8391_v14, %v9216_v42 }
  0xf4   :  { %v3264_v11 = vrot.slane %v2942_v3, %v9239_v2  ;;  %v3752_v12 = vsel %vm3751_vm8, %v3252_v59, %v3750_v6  ;;  %v693_v9 = vmul.f32 %v9216_v42, %v445_v19  ;;  %v698_v13 = vmul.f32 %v8394_v41, %v9216_v42 }
  0xf5   :  { %v3754_v15 = vsel %vm3753_vm9, %v3256_v4, %v3752_v12  ;;  %v1053_v16 = vcombine.high %v829_v7, %v829_v7  ;;  %v1060_v17 = vrot.slane %v829_v7, %v9229_v52  ;;  %v827_v18 = vmax.f32 %v763_v8, 0.0  ;;  %v9270_v20 = vpop.f32.mrb[12].mxu0 }
  0xf6   :  { %v3756_v21 = vsel %vm3755_vm10, %v3260_v5, %v3754_v15  ;;  %v766_v14 = vadd.f32 %v9223_v46, %v695_v10  ;;  %v764_v22 = vadd.f32 %v9223_v46, %v693_v9  ;;  %v769_v23 = vadd.f32 %v9223_v46, %v698_v13  ;;  %v9276_v24 = vpop.f32.mrb[13].mxu0 }
  0xf7   :  { %v3758_v19 = vsel %vm3757_vm11, %v3264_v11, %v3756_v21  ;;  %v1067_v25 = vrot.slane %v1053_v16, %v9229_v52  ;;  %v1068_v26 = vcombine.high %v1060_v17, %v1060_v17  ;;  %v1019_v27 = vcombine.high %v827_v18, %v827_v18  ;;  %v9280_v28 = vpop.f32.mrb[14].mxu0 }
  0xf8   :  { %3881 = vst.msk [vmem:[#allocation2 + $0x11] sm:$0xff] %vm3063_vm3, %v3758_v19  ;;  %v1026_v29 = vrot.slane %v827_v18, %v9229_v52  ;;  %v830_v30 = vmax.f32 %v766_v14, 0.0  ;;  %v828_v31 = vmax.f32 %v764_v22, 0.0  ;;  %v833_v32 = vmax.f32 %v769_v23, 0.0  ;;  %v9284_v33 = vpop.f32.mrb[15].mxu0 }
  0xf9   :  { %v1069_v34 = vcombine.high %v1067_v25, %v1067_v25  ;;  %v1033_v36 = vrot.slane %v1019_v27, %v9229_v52  ;;  %v696_v37 = vmul.f32 %v9216_v42, %v458_v49  ;;  %v699_v38 = vmul.f32 %v8395_v55, %v9216_v42 }
  0xfa   :  { %v1034_v39 = vcombine.high %v1026_v29, %v1026_v29  ;;  %v2303_v40 = vmax.f32 %v1026_v29, %v1060_v17  ;;  %v1070_v41 = vcombine.high %v830_v30, %v830_v30  ;;  %v1077_v43 = vrot.slane %v830_v30, %v9229_v52 }
  0xfb   :  { %v1035_v45 = vcombine.high %v1033_v36, %v1033_v36  ;;  %v2305_v47 = vmax.f32 %v1033_v36, %v1067_v25  ;;  %v1036_v48 = vcombine.high %v828_v31, %v828_v31  ;;  %v1043_v50 = vrot.slane %v828_v31, %v9229_v52 }
  0xfc   :  { %v2304_v51 = vmax.f32 %v1034_v39, %v1068_v26  ;;  %v7799_v53 = vrot.slane %v2303_v40, 9  ;;  %v1084_v54 = vrot.slane %v1070_v41, %v9229_v52  ;;  %v1085_v56 = vcombine.high %v1077_v43, %v1077_v43 }
  0xfd   :  { %v2306_v57 = vmax.f32 %v1035_v45, %v1069_v34  ;;  %v7801_v58 = vrot.slane %v2305_v47, 9  ;;  %v1050_v49 = vrot.slane %v1036_v48, %v9229_v52  ;;  %v1051_v55 = vcombine.high %v1043_v50, %v1043_v50  ;;  %v9293_v59 = vpop.f32.mrb[16].mxu0 }
  0xfe   :  { %v7800_v61 = vrot.slane %v2304_v51, 9  ;;  %v2943_v62 = vmax.f32 %v2303_v40, %v7799_v53  ;;  %v1086_v63 = vcombine.high %v1084_v54, %v1084_v54  ;;  %v2307_v0 = vmax.f32 %v1043_v50, %v1077_v43  ;;  %v9295_v1 = vpop.f32.mrb[17].mxu0 }
  0xff   :  { %v7802_v3 = vrot.slane %v2306_v57, 9  ;;  %v2945_v4 = vmax.f32 %v2305_v47, %v7801_v58  ;;  %v1052_v5 = vcombine.high %v1050_v49, %v1050_v49  ;;  %v2308_v6 = vmax.f32 %v1051_v55, %v1085_v56  ;;  %v9297_v7 = vpop.f32.mrb[18].mxu0 }
 0x100   :  { %v2944_v8 = vmax.f32 %v2304_v51, %v7800_v61  ;;  %v3268_v10 = vrot.slane %v2943_v62, %v9239_v2  ;;  %v2309_v11 = vmax.f32 %v1050_v49, %v1084_v54  ;;  %v7803_v12 = vrot.slane %v2307_v0, 9  ;;  %v9300_v9 = vpop.f32.mrb[19].mxu0 }
 0x101   :  { %v2946_v13 = vmax.f32 %v2306_v57, %v7802_v3  ;;  %v3276_v15 = vrot.slane %v2945_v4, %v9239_v2  ;;  %v2310_v16 = vmax.f32 %v1052_v5, %v1086_v63  ;;  %v7804_v17 = vrot.slane %v2308_v6, 9 }
 0x102   :  { %v3272_v18 = vrot.slane %v2944_v8, %v9239_v2  ;;  %v7805_v21 = vrot.slane %v2309_v11, 9  ;;  %v2947_v14 = vmax.f32 %v2307_v0, %v7803_v12  ;;  %v1121_v22 = vcombine.high %v833_v32, %v833_v32 }
 0x103   :  { %v3280_v23 = vrot.slane %v2946_v13, %v9239_v2  ;;  %v7806_v19 = vrot.slane %v2310_v16, 9  ;;  %v2948_v25 = vmax.f32 %v2308_v6, %v7804_v17  ;;  %v1128_v26 = vrot.slane %v833_v32, %v9229_v52 }
 0x104   :  { %v3759_v27 = vsel %vm3745_vm5, %v3272_v18, %v3268_v10  ;;  %v2949_v29 = vmax.f32 %v2309_v11, %v7805_v21  ;;  %v3284_v30 = vrot.slane %v2947_v14, %v9239_v2  ;;  %v1135_v31 = vrot.slane %v1121_v22, %v9229_v52 }
 0x105   :  { %v3760_v34 = vsel %vm3747_vm6, %v3276_v15, %v3759_v27  ;;  %v2950_v36 = vmax.f32 %v2310_v16, %v7806_v19  ;;  %v3288_v39 = vrot.slane %v2948_v25, %v9239_v2  ;;  %v1136_v40 = vcombine.high %v1128_v26, %v1128_v26  ;;  %v9311_v41 = vpop.f32.mrb[20].mxu0 }
 0x106   :  { %v3292_v43 = vrot.slane %v2949_v29, %v9239_v2  ;;  %v3761_v45 = vsel %vm3749_vm7, %v3280_v23, %v3760_v34  ;;  %v1137_v32 = vcombine.high %v1135_v31, %v1135_v31  ;;  %v767_v47 = vadd.f32 %v9223_v46, %v696_v37  ;;  %v9316_v48 = vpop.f32.mrb[21].mxu0 }
 0x107   :  { %v3296_v50 = vrot.slane %v2950_v36, %v9239_v2  ;;  %v3762_v51 = vsel %vm3751_vm8, %v3284_v30, %v3761_v45  ;;  %v770_v53 = vadd.f32 %v9223_v46, %v699_v38  ;;  %v697_v54 = vmul.f32 %v9216_v42, %v9252_v60  ;;  %v9323_v56 = vpop.f32.mrb[22].mxu0 }
 0x108   :  { %v3763_v57 = vsel %vm3753_vm9, %v3288_v39, %v3762_v51  ;;  %v831_v58 = vmax.f32 %v767_v47, 0.0  ;;  %v702_v49 = vmul.f32 %v9270_v20, %v9216_v42  ;;  %v700_v37 = vmul.f32 %v9216_v42, %v9276_v24  ;;  %v9330_v55 = vpop.f32.mrb[23].mxu0 }
 0x109   :  { %v3764_v61 = vsel %vm3755_vm10, %v3292_v43, %v3763_v57  ;;  %v834_v62 = vmax.f32 %v770_v53, 0.0  ;;  %v768_v38 = vadd.f32 %v9223_v46, %v697_v54  ;;  %v9336_v60 = vmul.f32 %v9280_v28, %v9216_v42 }
 0x10a   :  { %v3765_v63 = vsel %vm3757_vm11, %v3296_v50, %v3764_v61  ;;  %v1087_v0 = vcombine.high %v831_v58, %v831_v58  ;;  %v1094_v3 = vrot.slane %v831_v58, %v9229_v52  ;;  %v773_v20 = vadd.f32 %v9223_v46, %v702_v49 }
 0x10b   :  { %3882 = vst.msk [vmem:[#allocation2 + $0x21] sm:$0xff] %vm3063_vm3, %v3765_v63  ;;  %v1138_v24 = vcombine.high %v834_v62, %v834_v62  ;;  %v1145_v4 = vrot.slane %v834_v62, %v9229_v52  ;;  %v832_v5 = vmax.f32 %v768_v38, 0.0  ;;  %v771_v6 = vadd.f32 %v9223_v46, %v700_v37 }
 0x10c   :  { %v1101_v8 = vrot.slane %v1087_v0, %v9229_v52  ;;  %v1102_v10 = vcombine.high %v1094_v3, %v1094_v3  ;;  %v2311_v28 = vmax.f32 %v1094_v3, %v1128_v26  ;;  %v837_v11 = vmax.f32 %v773_v20, 0.0 }
 0x10d   :  { %v1152_v12 = vrot.slane %v1138_v24, %v9229_v52  ;;  %v1153_v13 = vcombine.high %v1145_v4, %v1145_v4  ;;  %v1104_v15 = vcombine.high %v832_v5, %v832_v5  ;;  %v1111_v16 = vrot.slane %v832_v5, %v9229_v52  ;;  %v9347_v17 = vpop.f32.mrb[24].mxu0 }
 0x10e   :  { %v1103_v18 = vcombine.high %v1101_v8, %v1101_v8  ;;  %v2312_v21 = vmax.f32 %v1102_v10, %v1136_v40  ;;  %v2313_v14 = vmax.f32 %v1101_v8, %v1135_v31  ;;  %v7807_v22 = vrot.slane %v2311_v28, 9  ;;  %v9349_v23 = vpop.f32.mrb[25].mxu0 }
 0x10f   :  { %v1154_v19 = vcombine.high %v1152_v12, %v1152_v12  ;;  %v1118_v25 = vrot.slane %v1104_v15, %v9229_v52  ;;  %v1119_v27 = vcombine.high %v1111_v16, %v1111_v16  ;;  %v2315_v26 = vmax.f32 %v1111_v16, %v1145_v4  ;;  %v9352_v29 = vpop.f32.mrb[26].mxu0 }
 0x110   :  { %v2314_v30 = vmax.f32 %v1103_v18, %v1137_v32  ;;  %v7808_v34 = vrot.slane %v2312_v21, 9  ;;  %v7809_v36 = vrot.slane %v2313_v14, 9  ;;  %v2951_v39 = vmax.f32 %v2311_v28, %v7807_v22  ;;  %v9354_v43 = vpop.f32.mrb[27].mxu0 }
 0x111   :  { %v1120_v45 = vcombine.high %v1118_v25, %v1118_v25  ;;  %v2316_v47 = vmax.f32 %v1119_v27, %v1153_v13  ;;  %v2317_v40 = vmax.f32 %v1118_v25, %v1152_v12  ;;  %v7811_v31 = vrot.slane %v2315_v26, 9 }
 0x112   :  { %v7810_v50 = vrot.slane %v2314_v30, 9  ;;  %v2952_v51 = vmax.f32 %v2312_v21, %v7808_v34  ;;  %v2953_v53 = vmax.f32 %v2313_v14, %v7809_v36  ;;  %v3300_v54 = vrot.slane %v2951_v39, %v9239_v2 }
 0x113   :  { %v2318_v57 = vmax.f32 %v1120_v45, %v1154_v19  ;;  %v7812_v58 = vrot.slane %v2316_v47, 9  ;;  %v7813_v49 = vrot.slane %v2317_v40, 9  ;;  %v2955_v37 = vmax.f32 %v2315_v26, %v7811_v31 }
 0x114   :  { %v2954_v61 = vmax.f32 %v2314_v30, %v7810_v50  ;;  %v3304_v32 = vrot.slane %v2952_v51, %v9239_v2  ;;  %v3308_v62 = vrot.slane %v2953_v53, %v9239_v2  ;;  %v1189_v38 = vcombine.high %v837_v11, %v837_v11 }
 0x115   :  { %v7814_v63 = vrot.slane %v2318_v57, 9  ;;  %v2956_v0 = vmax.f32 %v2316_v47, %v7812_v58  ;;  %v2957_v3 = vmax.f32 %v2317_v40, %v7813_v49  ;;  %v3316_v20 = vrot.slane %v2955_v37, %v9239_v2  ;;  %v9360_v24 = vpop.f32.mrb[28].mxu0 }
 0x116   :  { %v3312_v4 = vrot.slane %v2954_v61, %v9239_v2  ;;  %v3766_v5 = vsel %vm3745_vm5, %v3304_v32, %v3300_v54  ;;  %v1196_v8 = vrot.slane %v837_v11, %v9229_v52  ;;  %v1203_v10 = vrot.slane %v1189_v38, %v9229_v52  ;;  %v9366_v28 = vpop.f32.mrb[29].mxu0 }
 0x117   :  { %v3767_v12 = vsel %vm3747_vm6, %v3308_v62, %v3766_v5  ;;  %v2958_v13 = vmax.f32 %v2318_v57, %v7814_v63  ;;  %v3320_v15 = vrot.slane %v2956_v0, %v9239_v2  ;;  %v3324_v16 = vrot.slane %v2957_v3, %v9239_v2  ;;  %v9371_v18 = vpop.f32.mrb[30].mxu0 }
 0x118   :  { %v3768_v21 = vsel %vm3749_vm7, %v3312_v4, %v3767_v12  ;;  %v1204_v14 = vcombine.high %v1196_v8, %v1196_v8  ;;  %v1205_v22 = vcombine.high %v1203_v10, %v1203_v10  ;;  %v835_v19 = vmax.f32 %v771_v6, 0.0  ;;  %v9374_v25 = vpop.f32.mrb[31].mxu0 }
 0x119   :  { %v3328_v11 = vrot.slane %v2958_v13, %v9239_v2  ;;  %v3769_v27 = vsel %vm3751_vm8, %v3316_v20, %v3768_v21  ;;  %v774_v26 = vadd.f32 %v9223_v46, %v9336_v60  ;;  %v701_v30 = vmul.f32 %v9216_v42, %v9284_v33 }
 0x11a   :  { %v3770_v34 = vsel %vm3753_vm9, %v3320_v15, %v3769_v27  ;;  %v1155_v36 = vcombine.high %v835_v19, %v835_v19  ;;  %v1162_v39 = vrot.slane %v835_v19, %v9229_v52  ;;  %v706_v6 = vmul.f32 %v9293_v59, %v9216_v42 }
 0x11b   :  { %v3771_v45 = vsel %vm3755_vm10, %v3324_v16, %v3770_v34  ;;  %v838_v47 = vmax.f32 %v774_v26, 0.0  ;;  %v772_v40 = vadd.f32 %v9223_v46, %v701_v30  ;;  %v9390_v31 = vmul.f32 %v9216_v42, %v9295_v1 }
 0x11c   :  { %v3772_v60 = vsel %vm3757_vm11, %v3328_v11, %v3771_v45  ;;  %v1169_v33 = vrot.slane %v1155_v36, %v9229_v52  ;;  %v1170_v50 = vcombine.high %v1162_v39, %v1162_v39  ;;  %v2319_v51 = vmax.f32 %v1162_v39, %v1196_v8 }
 0x11d   :  { %3883 = vst.msk [vmem:[#allocation2 + $0x31] sm:$0xff] %vm3063_vm3, %v3772_v60  ;;  %v1206_v53 = vcombine.high %v838_v47, %v838_v47  ;;  %v1213_v59 = vrot.slane %v838_v47, %v9229_v52  ;;  %v836_v54 = vmax.f32 %v772_v40, 0.0  ;;  %v777_v57 = vadd.f32 %v9223_v46, %v706_v6  ;;  %v9397_v58 = vpop.f32.mrb[32].mxu0 }
 0x11e   :  { %v1171_v49 = vcombine.high %v1169_v33, %v1169_v33  ;;  %v2320_v37 = vmax.f32 %v1170_v50, %v1204_v14  ;;  %v2321_v1 = vmax.f32 %v1169_v33, %v1203_v10  ;;  %v7815_v61 = vrot.slane %v2319_v51, 9  ;;  %v9399_v32 = vpop.f32.mrb[33].mxu0 }
 0x11f   :  { %v1220_v62 = vrot.slane %v1206_v53, %v9229_v52  ;;  %v1221_v38 = vcombine.high %v1213_v59, %v1213_v59  ;;  %v1172_v63 = vcombine.high %v836_v54, %v836_v54  ;;  %v1179_v0 = vrot.slane %v836_v54, %v9229_v52  ;;  %v9403_v3 = vpop.f32.mrb[34].mxu0 }
 0x120   :  { %v2322_v20 = vmax.f32 %v1171_v49, %v1205_v22  ;;  %v7816_v4 = vrot.slane %v2320_v37, 9  ;;  %v7817_v5 = vrot.slane %v2321_v1, 9  ;;  %v2959_v8 = vmax.f32 %v2319_v51, %v7815_v61  ;;  %v9405_v12 = vpop.f32.mrb[35].mxu0 }
 0x121   :  { %v1222_v13 = vcombine.high %v1220_v62, %v1220_v62  ;;  %v1186_v10 = vrot.slane %v1172_v63, %v9229_v52  ;;  %v1187_v15 = vcombine.high %v1179_v0, %v1179_v0  ;;  %v2323_v16 = vmax.f32 %v1179_v0, %v1213_v59 }
 0x122   :  { %v7818_v21 = vrot.slane %v2322_v20, 9  ;;  %v2960_v14 = vmax.f32 %v2320_v37, %v7816_v4  ;;  %v2961_v19 = vmax.f32 %v2321_v1, %v7817_v5  ;;  %v3332_v11 = vrot.slane %v2959_v8, %v9239_v2 }
 0x123   :  { %v1188_v27 = vcombine.high %v1186_v10, %v1186_v10  ;;  %v2324_v26 = vmax.f32 %v1187_v15, %v1221_v38  ;;  %v2325_v30 = vmax.f32 %v1186_v10, %v1220_v62  ;;  %v7819_v34 = vrot.slane %v2323_v16, 9 }
 0x124   :  { %v2962_v22 = vmax.f32 %v2322_v20, %v7818_v21  ;;  %v3336_v36 = vrot.slane %v2960_v14, %v9239_v2  ;;  %v3340_v39 = vrot.slane %v2961_v19, %v9239_v2  ;;  %v841_v6 = vmax.f32 %v777_v57, 0.0 }
 0x125   :  { %v2326_v45 = vmax.f32 %v1188_v27, %v1222_v13  ;;  %v7820_v47 = vrot.slane %v2324_v26, 9  ;;  %v7821_v40 = vrot.slane %v2325_v30, 9  ;;  %v2963_v60 = vmax.f32 %v2323_v16, %v7819_v34  ;;  %v9411_v33 = vpop.f32.mrb[36].mxu0 }
 0x126   :  { %v3344_v50 = vrot.slane %v2962_v22, %v9239_v2  ;;  %v3773_v51 = vsel %vm3745_vm5, %v3336_v36, %v3332_v11  ;;  %v1257_v53 = vcombine.high %v841_v6, %v841_v6  ;;  %v1264_v59 = vrot.slane %v841_v6, %v9229_v52  ;;  %v9416_v54 = vpop.f32.mrb[37].mxu0 }
 0x127   :  { %v3774_v49 = vsel %vm3747_vm6, %v3340_v39, %v3773_v51  ;;  %v7822_v37 = vrot.slane %v2326_v45, 9  ;;  %v2964_v1 = vmax.f32 %v2324_v26, %v7820_v47  ;;  %v2965_v57 = vmax.f32 %v2325_v30, %v7821_v40  ;;  %v9419_v61 = vpop.f32.mrb[38].mxu0 }
 0x128   :  { %v3348_v62 = vrot.slane %v2963_v60, %v9239_v2  ;;  %v3775_v38 = vsel %vm3749_vm7, %v3344_v50, %v3774_v49  ;;  %v1271_v63 = vrot.slane %v1257_v53, %v9229_v52  ;;  %v1272_v0 = vcombine.high %v1264_v59, %v1264_v59  ;;  %v9424_v20 = vpop.f32.mrb[39].mxu0 }
 0x129   :  { %v2966_v4 = vmax.f32 %v2326_v45, %v7822_v37  ;;  %v3352_v5 = vrot.slane %v2964_v1, %v9239_v2  ;;  %v3356_v8 = vrot.slane %v2965_v57, %v9239_v2  ;;  %v775_v13 = vadd.f32 %v9223_v46, %v9390_v31 }
 0x12a   :  { %v3776_v10 = vsel %vm3751_vm8, %v3348_v62, %v3775_v38  ;;  %v1273_v15 = vcombine.high %v1271_v63, %v1271_v63  ;;  %v707_v16 = vmul.f32 %v9297_v7, %v9216_v42  ;;  %v705_v21 = vmul.f32 %v9216_v42, %v9300_v9 }
 0x12b   :  { %v3360_v14 = vrot.slane %v2966_v4, %v9239_v2  ;;  %v3777_v19 = vsel %vm3753_vm9, %v3352_v5, %v3776_v10  ;;  %v839_v11 = vmax.f32 %v775_v13, 0.0  ;;  %v710_v27 = vmul.f32 %v9311_v41, %v9216_v42 }
 0x12c   :  { %v3778_v26 = vsel %vm3755_vm10, %v3356_v8, %v3777_v19  ;;  %v778_v31 = vadd.f32 %v9223_v46, %v707_v16  ;;  %v776_v30 = vadd.f32 %v9223_v46, %v705_v21  ;;  %v708_v7 = vmul.f32 %v9216_v42, %v9316_v48 }
 0x12d   :  { %v3779_v34 = vsel %vm3757_vm11, %v3360_v14, %v3778_v26  ;;  %v1223_v9 = vcombine.high %v839_v11, %v839_v11  ;;  %v1230_v22 = vrot.slane %v839_v11, %v9229_v52  ;;  %v781_v36 = vadd.f32 %v9223_v46, %v710_v27  ;;  %v9447_v39 = vpop.f32.mrb[40].mxu0 }
 0x12e   :  { %3884 = vst.msk [vmem:[#allocation2 + $0x41] sm:$0xff] %vm3063_vm3, %v3779_v34  ;;  %v842_v41 = vmax.f32 %v778_v31, 0.0  ;;  %v840_v6 = vmax.f32 %v776_v30, 0.0  ;;  %v9451_v45 = vadd.f32 %v9223_v46, %v708_v7  ;;  %v9455_v47 = vmul.f32 %v9323_v56, %v9216_v42  ;;  %v9457_v48 = vpop.f32.mrb[41].mxu0 }
 0x12f   :  { %v1237_v40 = vrot.slane %v1223_v9, %v9229_v52  ;;  %v1238_v60 = vcombine.high %v1230_v22, %v1230_v22  ;;  %v2327_v50 = vmax.f32 %v1230_v22, %v1264_v59  ;;  %v845_v51 = vmax.f32 %v781_v36, 0.0  ;;  %v9460_v53 = vpop.f32.mrb[42].mxu0 }
 0x130   :  { %v1274_v49 = vcombine.high %v842_v41, %v842_v41  ;;  %v1281_v37 = vrot.slane %v842_v41, %v9229_v52  ;;  %v1240_v1 = vcombine.high %v840_v6, %v840_v6  ;;  %v1247_v57 = vrot.slane %v840_v6, %v9229_v52  ;;  %v9464_v62 = vpop.f32.mrb[43].mxu0 }
 0x131   :  { %v1239_v38 = vcombine.high %v1237_v40, %v1237_v40  ;;  %v2328_v56 = vmax.f32 %v1238_v60, %v1272_v0  ;;  %v2329_v4 = vmax.f32 %v1237_v40, %v1271_v63  ;;  %v7823_v5 = vrot.slane %v2327_v50, 9 }
 0x132   :  { %v1288_v8 = vrot.slane %v1274_v49, %v9229_v52  ;;  %v1289_v13 = vcombine.high %v1281_v37, %v1281_v37  ;;  %v1254_v59 = vrot.slane %v1240_v1, %v9229_v52  ;;  %v1255_v10 = vcombine.high %v1247_v57, %v1247_v57 }
 0x133   :  { %v2330_v16 = vmax.f32 %v1239_v38, %v1273_v15  ;;  %v7824_v21 = vrot.slane %v2328_v56, 9  ;;  %v7825_v14 = vrot.slane %v2329_v4, 9  ;;  %v2967_v19 = vmax.f32 %v2327_v50, %v7823_v5 }
 0x134   :  { %v1290_v11 = vcombine.high %v1288_v8, %v1288_v8  ;;  %v1256_v27 = vcombine.high %v1254_v59, %v1254_v59  ;;  %v2331_v26 = vmax.f32 %v1247_v57, %v1281_v37  ;;  %v2332_v31 = vmax.f32 %v1255_v10, %v1289_v13 }
 0x135   :  { %v7826_v30 = vrot.slane %v2330_v16, 9  ;;  %v2968_v7 = vmax.f32 %v2328_v56, %v7824_v21  ;;  %v2969_v34 = vmax.f32 %v2329_v4, %v7825_v14  ;;  %v3364_v63 = vrot.slane %v2967_v19, %v9239_v2  ;;  %v9469_v0 = vpop.f32.mrb[44].mxu0  ;;  %v4027_v14 = vld [vmem:[#allocation2 + $0x20] sm:$0xff] }
 0x136   :  { %v2333_v9 = vmax.f32 %v1254_v59, %v1288_v8  ;;  %v2334_v22 = vmax.f32 %v1256_v27, %v1290_v11  ;;  %v7827_v36 = vrot.slane %v2331_v26, 9  ;;  %v7828_v41 = vrot.slane %v2332_v31, 9  ;;  %v9471_v6 = vpop.f32.mrb[45].mxu0 }
 0x137   :  { %v2970_v15 = vmax.f32 %v2330_v16, %v7826_v30  ;;  %v3368_v40 = vrot.slane %v2968_v7, %v9239_v2  ;;  %v3372_v60 = vrot.slane %v2969_v34, %v9239_v2  ;;  %v1325_v50 = vcombine.high %v845_v51, %v845_v51  ;;  %v9475_v49 = vpop.f32.mrb[46].mxu0  ;;  %v4026_v34 = vld [vmem:[#allocation2 + $0x10] sm:$0xff] }
 0x138   :  { %v7829_v37 = vrot.slane %v2333_v9, 9  ;;  %v7830_v1 = vrot.slane %v2334_v22, 9  ;;  %v2971_v57 = vmax.f32 %v2331_v26, %v7827_v36  ;;  %v2972_v38 = vmax.f32 %v2332_v31, %v7828_v41  ;;  %v9477_v56 = vpop.f32.mrb[47].mxu0 }
 0x139   :  { %v3376_v4 = vrot.slane %v2970_v15, %v9239_v2  ;;  %v3780_v5 = vsel %vm3745_vm5, %v3368_v40, %v3364_v63  ;;  %v1332_v8 = vrot.slane %v845_v51, %v9229_v52  ;;  %v1339_v13 = vrot.slane %v1325_v50, %v9229_v52  ;;  %v3929_v63 = vld [vmem:[#allocation2 + $0x1] sm:$0xff] }
 0x13a   :  { %v3781_v59 = vsel %vm3747_vm6, %v3372_v60, %v3780_v5  ;;  %v2973_v10 = vmax.f32 %v2333_v9, %v7829_v37  ;;  %v2974_v16 = vmax.f32 %v2334_v22, %v7830_v1  ;;  %v3380_v21 = vrot.slane %v2971_v57, %v9239_v2  ;;  %v3930_v9 = vld [vmem:[#allocation2 + $0x11] sm:$0xff]  ;;  %v8565_v1 = vld [vmem:[%s11130_s4 + $0x40] sm:$0xff]  }
 0x13b   :  { %v3384_v19 = vrot.slane %v2972_v38, %v9239_v2  ;;  %v3782_v11 = vsel %vm3749_vm7, %v3376_v4, %v3781_v59  ;;  %v1340_v27 = vcombine.high %v1332_v8, %v1332_v8  ;;  %v1341_v26 = vcombine.high %v1339_v13, %v1339_v13  ;;  %8209 = vmatprep.subr.bf16.mxu0 %v8565_v1 }
 0x13c   :  { %v3388_v31 = vrot.slane %v2973_v10, %v9239_v2  ;;  %v3392_v30 = vrot.slane %v2974_v16, %v9239_v2  ;;  %v3783_v51 = vsel %vm3751_vm8, %v3380_v21, %v3782_v11  ;;  %v843_v7 = vmax.f32 %v9451_v45, 0.0 }
 0x13d   :  { %v3784_v22 = vsel %vm3753_vm9, %v3384_v19, %v3783_v51  ;;  %v782_v36 = vadd.f32 %v9223_v46, %v9455_v47  ;;  %v709_v41 = vmul.f32 %v9216_v42, %v9330_v55  ;;  %v4042_v15 = vpack.c.bf16 %v4027_v14, %v4026_v34  ;;  %v9496_v40 = vpop.f32.mrb[48].mxu0 }
 0x13e   :  { %v3785_v60 = vsel %vm3755_vm10, %v3388_v31, %v3784_v22  ;;  %v1291_v50 = vcombine.high %v843_v7, %v843_v7  ;;  %v1298_v37 = vrot.slane %v843_v7, %v9229_v52  ;;  %v714_v45 = vmul.f32 %v9347_v17, %v9216_v42  ;;  %v9505_v57 = vpop.f32.mrb[49].mxu0 }
 0x13f   :  { %v3786_v47 = vsel %vm3757_vm11, %v3392_v30, %v3785_v60  ;;  %v846_v55 = vmax.f32 %v782_v36, 0.0  ;;  %v780_v38 = vadd.f32 %v9223_v46, %v709_v41  ;;  %4058 = vrot.lane.b32.xlu0 %v4042_v15, %s8908_s18  ;;  %v3945_v4 = vpack.c.bf16 %v3930_v9, %v3929_v63  ;;  %v9510_v5 = vpop.f32.mrb[50].mxu0 }
 0x140   :  { %3885 = vst.msk [vmem:[#allocation2 + $0x51] sm:$0xff] %vm3063_vm3, %v3786_v47  ;;  %v1305_v17 = vrot.slane %v1291_v50, %v9229_v52  ;;  %v1306_v59 = vcombine.high %v1298_v37, %v1298_v37  ;;  %v2335_v10 = vmax.f32 %v1298_v37, %v1332_v8  ;;  %v785_v16 = vadd.f32 %v9223_v46, %v714_v45  ;;  %v9515_v21 = vpop.f32.mrb[51].mxu0 }
 0x141   :  { %v1342_v14 = vcombine.high %v846_v55, %v846_v55  ;;  %v1349_v19 = vrot.slane %v846_v55, %v9229_v52  ;;  %v844_v11 = vmax.f32 %v780_v38, 0.0  ;;  %v712_v31 = vmul.f32 %v9216_v42, %v9349_v23 }
 0x142   :  { %v1307_v30 = vcombine.high %v1305_v17, %v1305_v17  ;;  %v2336_v51 = vmax.f32 %v1306_v59, %v1340_v27  ;;  %v2337_v7 = vmax.f32 %v1305_v17, %v1339_v13  ;;  %v7831_v34 = vrot.slane %v2335_v10, 9 }
 0x143   :  { %v1356_v63 = vrot.slane %v1342_v14, %v9229_v52  ;;  %v1357_v9 = vcombine.high %v1349_v19, %v1349_v19  ;;  %v1308_v8 = vcombine.high %v844_v11, %v844_v11  ;;  %v1315_v46 = vrot.slane %v844_v11, %v9229_v52  ;;  %3961 = vrot.lane.b32.xlu0 %v3945_v4, %s8908_s18 }
 0x144   :  { %v2338_v22 = vmax.f32 %v1307_v30, %v1341_v26  ;;  %v7832_v36 = vrot.slane %v2336_v51, 9  ;;  %v7833_v41 = vrot.slane %v2337_v7, 9  ;;  %v2975_v15 = vmax.f32 %v2335_v10, %v7831_v34 }
 0x145   :  { %v1358_v60 = vcombine.high %v1356_v63, %v1356_v63  ;;  %v1322_v50 = vrot.slane %v1308_v8, %v9229_v52  ;;  %v1323_v42 = vcombine.high %v1315_v46, %v1315_v46  ;;  %v2339_v23 = vmax.f32 %v1315_v46, %v1349_v19  ;;  %v9524_v27 = vpop.f32.mrb[52].mxu0 }
 0x146   :  { %v7834_v13 = vrot.slane %v2338_v22, 9  ;;  %v2976_v37 = vmax.f32 %v2336_v51, %v7832_v36  ;;  %v2977_v45 = vmax.f32 %v2337_v7, %v7833_v41  ;;  %v3396_v1 = vrot.slane %v2975_v15, %v9239_v2  ;;  %v9527_v47 = vpop.f32.mrb[53].mxu0 }
 0x147   :  { %v1324_v55 = vcombine.high %v1322_v50, %v1322_v50  ;;  %v2340_v38 = vmax.f32 %v1323_v42, %v1357_v9  ;;  %v2341_v26 = vmax.f32 %v1322_v50, %v1356_v63  ;;  %v7835_v4 = vrot.slane %v2339_v23, 9  ;;  %v9531_v19 = vpop.f32.mrb[54].mxu0  ;;  %v8566_v9 = vld [vmem:[%s11130_s4] sm:$0xff]  }
 0x148   :  { %v2978_v17 = vmax.f32 %v2338_v22, %v7834_v13  ;;  %v3400_v59 = vrot.slane %v2976_v37, %v9239_v2  ;;  %v3404_v10 = vrot.slane %v2977_v45, %v9239_v2  ;;  %v849_v14 = vmax.f32 %v785_v16, 0.0  ;;  %v9540_v15 = vpop.f32.mrb[55].mxu0  ;;  %8210 = vmatpush3.bf16.msra.mxu0 %v8566_v9 }
 0x149   :  { %v2342_v11 = vmax.f32 %v1324_v55, %v1358_v60  ;;  %v7836_v30 = vrot.slane %v2340_v38, 9  ;;  %v7837_v51 = vrot.slane %v2341_v26, 9  ;;  %v2979_v7 = vmax.f32 %v2339_v23, %v7835_v4  ;;  %v9557_v4 = vld [vmem:[%s11128_s2] ss:$0 sm:$0xff] }
 0x14a   :  { %v3408_v34 = vrot.slane %v2978_v17, %v9239_v2  ;;  %v3787_v8 = vsel %vm3745_vm5, %v3400_v59, %v3396_v1  ;;  %v1393_v46 = vcombine.high %v849_v14, %v849_v14  ;;  %v1400_v63 = vrot.slane %v849_v14, %v9229_v52  ;;  %v9550_v1 = vld [vmem:[%s11129_s3] ss:$0 sm:$0xff] }
 0x14b   :  { %v3788_v22 = vsel %vm3747_vm6, %v3404_v10, %v3787_v8  ;;  %v7838_v16 = vrot.slane %v2342_v11, 9  ;;  %v2980_v36 = vmax.f32 %v2340_v38, %v7836_v30  ;;  %v2981_v41 = vmax.f32 %v2341_v26, %v7837_v51 }
 0x14c   :  { %v3412_v60 = vrot.slane %v2979_v7, %v9239_v2  ;;  %v3789_v50 = vsel %vm3749_vm7, %v3408_v34, %v3788_v22  ;;  %v1407_v42 = vrot.slane %v1393_v46, %v9229_v52  ;;  %v1408_v23 = vcombine.high %v1400_v63, %v1400_v63 }
 0x14d   :  { %v2982_v13 = vmax.f32 %v2342_v11, %v7838_v16  ;;  %v3416_v37 = vrot.slane %v2980_v36, %v9239_v2  ;;  %v3420_v45 = vrot.slane %v2981_v41, %v9239_v2  ;;  %v783_v55 = vadd.f32 %v9550_v1, %v712_v31 }
 0x14e   :  { %v3790_v38 = vsel %vm3751_vm8, %v3412_v60, %v3789_v50  ;;  %v1409_v26 = vcombine.high %v1407_v42, %v1407_v42  ;;  %v715_v17 = vmul.f32 %v9557_v4, %v9352_v29  ;;  %v713_v59 = vmul.f32 %v9557_v4, %v9354_v43  ;;  %v9584_v50 = vpop.f32.mrb[56].mxu0 }
 0x14f   :  { %v3424_v10 = vrot.slane %v2982_v13, %v9239_v2  ;;  %v3791_v14 = vsel %vm3753_vm9, %v3416_v37, %v3790_v38  ;;  %v847_v11 = vmax.f32 %v783_v55, 0.0  ;;  %v718_v31 = vmul.f32 %v9557_v4, %v9360_v24  ;;  %v9588_v38 = vpop.f32.mrb[57].mxu0 }
 0x150   :  { %v3792_v30 = vsel %vm3755_vm10, %v3420_v45, %v3791_v14  ;;  %v786_v51 = vadd.f32 %v9550_v1, %v715_v17  ;;  %v784_v7 = vadd.f32 %v9550_v1, %v713_v59  ;;  %v716_v29 = vmul.f32 %v9557_v4, %v9366_v28 }
 0x151   :  { %v3793_v34 = vsel %vm3757_vm11, %v3424_v10, %v3792_v30  ;;  %v1359_v43 = vcombine.high %v847_v11, %v847_v11  ;;  %v1366_v8 = vrot.slane %v847_v11, %v9229_v52  ;;  %v789_v46 = vadd.f32 %v9550_v1, %v718_v31 }
 0x152   :  { %3886 = vst.msk [vmem:[#allocation2 + $0x61] sm:$0xff] %vm3063_vm3, %v3793_v34  ;;  %v850_v9 = vmax.f32 %v786_v51, 0.0  ;;  %v848_v24 = vmax.f32 %v784_v7, 0.0  ;;  %v9577_v22 = vadd.f32 %v9550_v1, %v716_v29  ;;  %v9581_v16 = vmul.f32 %v9557_v4, %v9371_v18 }
 0x153   :  { %v1373_v28 = vrot.slane %v1359_v43, %v9229_v52  ;;  %v1374_v36 = vcombine.high %v1366_v8, %v1366_v8  ;;  %v2343_v41 = vmax.f32 %v1366_v8, %v1400_v63  ;;  %v853_v60 = vmax.f32 %v789_v46, 0.0 }
 0x154   :  { %v1410_v13 = vcombine.high %v850_v9, %v850_v9  ;;  %v1417_v37 = vrot.slane %v850_v9, %v9229_v52  ;;  %v1376_v45 = vcombine.high %v848_v24, %v848_v24  ;;  %v1383_v55 = vrot.slane %v848_v24, %v9229_v52 }
 0x155   :  { %v1375_v17 = vcombine.high %v1373_v28, %v1373_v28  ;;  %v2344_v59 = vmax.f32 %v1374_v36, %v1408_v23  ;;  %v2345_v10 = vmax.f32 %v1373_v28, %v1407_v42  ;;  %v7839_v18 = vrot.slane %v2343_v41, 9 }
 0x156   :  { %v1424_v14 = vrot.slane %v1410_v13, %v9229_v52  ;;  %v1425_v11 = vcombine.high %v1417_v37, %v1417_v37  ;;  %v1390_v63 = vrot.slane %v1376_v45, %v9229_v52  ;;  %v1391_v31 = vcombine.high %v1383_v55, %v1383_v55 }
 0x157   :  { %v2346_v30 = vmax.f32 %v1375_v17, %v1409_v26  ;;  %v7840_v51 = vrot.slane %v2344_v59, 9  ;;  %v7841_v7 = vrot.slane %v2345_v10, 9  ;;  %v2983_v29 = vmax.f32 %v2343_v41, %v7839_v18  ;;  %v9595_v41 = vpop.f32.mrb[58].mxu0 }
 0x158   :  { %v1426_v34 = vcombine.high %v1424_v14, %v1424_v14  ;;  %v1392_v43 = vcombine.high %v1390_v63, %v1390_v63  ;;  %v2347_v8 = vmax.f32 %v1383_v55, %v1417_v37  ;;  %v2348_v46 = vmax.f32 %v1391_v31, %v1425_v11 }
 0x159   :  { %v7842_v9 = vrot.slane %v2346_v30, 9  ;;  %v2984_v24 = vmax.f32 %v2344_v59, %v7840_v51  ;;  %v2985_v35 = vmax.f32 %v2345_v10, %v7841_v7  ;;  %v3428_v42 = vrot.slane %v2983_v29, %v9239_v2  ;;  %v4029_v7 = vld [vmem:[#allocation2 + $0x40] sm:$0xff]  ;;  %v9603_v29 = vpop.f32.mrb[59].mxu0 }
 0x15a   :  { %v2349_v23 = vmax.f32 %v1390_v63, %v1424_v14  ;;  %v2350_v28 = vmax.f32 %v1392_v43, %v1426_v34  ;;  %v7843_v36 = vrot.slane %v2347_v8, 9  ;;  %v7844_v13 = vrot.slane %v2348_v46, 9 }
 0x15b   :  { %v2986_v44 = vmax.f32 %v2346_v30, %v7842_v9  ;;  %v3432_v45 = vrot.slane %v2984_v24, %v9239_v2  ;;  %v3436_v26 = vrot.slane %v2985_v35, %v9239_v2  ;;  %v1461_v17 = vcombine.high %v853_v60, %v853_v60 }
 0x15c   :  { %v7845_v18 = vrot.slane %v2349_v23, 9  ;;  %v7846_v37 = vrot.slane %v2350_v28, 9  ;;  %v2987_v55 = vmax.f32 %v2347_v8, %v7843_v36  ;;  %v2988_v11 = vmax.f32 %v2348_v46, %v7844_v13 }
 0x15d   :  { %v3440_v59 = vrot.slane %v2986_v44, %v9239_v2  ;;  %v3794_v10 = vsel %vm3745_vm5, %v3432_v45, %v3428_v42  ;;  %v1468_v14 = vrot.slane %v853_v60, %v9229_v52  ;;  %v1475_v63 = vrot.slane %v1461_v17, %v9229_v52  ;;  %v4028_v42 = vld [vmem:[#allocation2 + $0x30] sm:$0xff] }
 0x15e   :  { %v3795_v31 = vsel %vm3747_vm6, %v3436_v26, %v3794_v10  ;;  %v2989_v30 = vmax.f32 %v2349_v23, %v7845_v18  ;;  %v2990_v51 = vmax.f32 %v2350_v28, %v7846_v37  ;;  %v3444_v35 = vrot.slane %v2987_v55, %v9239_v2  ;;  %v3932_v23 = vld [vmem:[#allocation2 + $0x31] sm:$0xff]  ;;  %v8567_v55 = vld [vmem:[%s11130_s4 + $0x48] sm:$0xff]  }
 0x15f   :  { %v3448_v34 = vrot.slane %v2988_v11, %v9239_v2  ;;  %v3796_v43 = vsel %vm3749_vm7, %v3440_v59, %v3795_v31  ;;  %v1476_v44 = vcombine.high %v1468_v14, %v1468_v14  ;;  %v1477_v8 = vcombine.high %v1475_v63, %v1475_v63  ;;  %8211 = vmatprep.subr.bf16.mxu0 %v8567_v55 }
 0x160   :  { %v3452_v46 = vrot.slane %v2989_v30, %v9239_v2  ;;  %v3456_v60 = vrot.slane %v2990_v51, %v9239_v2  ;;  %v3797_v9 = vsel %vm3751_vm8, %v3444_v35, %v3796_v43  ;;  %v851_v24 = vmax.f32 %v9577_v22, 0.0  ;;  %v3931_v22 = vld [vmem:[#allocation2 + $0x21] sm:$0xff]  ;;  %v9629_v51 = vpop.f32.mrb[60].mxu0 }
 0x161   :  { %v3798_v28 = vsel %vm3753_vm9, %v3448_v34, %v3797_v9  ;;  %v790_v36 = vadd.f32 %v9550_v1, %v9581_v16  ;;  %v717_v13 = vmul.f32 %v9557_v4, %v9374_v25  ;;  %v4043_v45 = vpack.c.bf16 %v4029_v7, %v4028_v42 }
 0x162   :  { %v3799_v26 = vsel %vm3755_vm10, %v3452_v46, %v3798_v28  ;;  %v1427_v17 = vcombine.high %v851_v24, %v851_v24  ;;  %v1434_v18 = vrot.slane %v851_v24, %v9229_v52  ;;  %v722_v37 = vmul.f32 %v9557_v4, %v9397_v58 }
 0x163   :  { %v3800_v11 = vsel %vm3757_vm11, %v3456_v60, %v3799_v26  ;;  %v854_v16 = vmax.f32 %v790_v36, 0.0  ;;  %v788_v59 = vadd.f32 %v9550_v1, %v717_v13  ;;  %4060 = vrot.lane.b32.xlu1 %v4043_v45, %s8908_s18  ;;  %v3946_v25 = vpack.c.bf16 %v3932_v23, %v3931_v22  ;;  %v9637_v36 = vpop.f32.mrb[61].mxu0 }
 0x164   :  { %3887 = vst.msk [vmem:[#allocation2 + $0x71] sm:$0xff] %vm3063_vm3, %v3800_v11  ;;  %v1441_v10 = vrot.slane %v1427_v17, %v9229_v52  ;;  %v1442_v31 = vcombine.high %v1434_v18, %v1434_v18  ;;  %v2351_v30 = vmax.f32 %v1434_v18, %v1468_v14  ;;  %v793_v58 = vadd.f32 %v9550_v1, %v722_v37 }
 0x165   :  { %v1478_v35 = vcombine.high %v854_v16, %v854_v16  ;;  %v1485_v7 = vrot.slane %v854_v16, %v9229_v52  ;;  %v852_v34 = vmax.f32 %v788_v59, 0.0  ;;  %v720_v43 = vmul.f32 %v9557_v4, %v9399_v32 }
 0x166   :  { %v1443_v46 = vcombine.high %v1441_v10, %v1441_v10  ;;  %v2352_v60 = vmax.f32 %v1442_v31, %v1476_v44  ;;  %v2353_v9 = vmax.f32 %v1441_v10, %v1475_v63  ;;  %v7847_v24 = vrot.slane %v2351_v30, 9 }
 0x167   :  { %v1492_v42 = vrot.slane %v1478_v35, %v9229_v52  ;;  %v1493_v23 = vcombine.high %v1485_v7, %v1485_v7  ;;  %v1444_v14 = vcombine.high %v852_v34, %v852_v34  ;;  %v1451_v28 = vrot.slane %v852_v34, %v9229_v52  ;;  %3963 = vrot.lane.b32.xlu1 %v3946_v25, %s8908_s18  ;;  %v9643_v34 = vpop.f32.mrb[62].mxu0 }
 0x168   :  { %v2354_v13 = vmax.f32 %v1443_v46, %v1477_v8  ;;  %v7848_v45 = vrot.slane %v2352_v60, 9  ;;  %v7849_v26 = vrot.slane %v2353_v9, 9  ;;  %v2991_v17 = vmax.f32 %v2351_v30, %v7847_v24 }
 0x169   :  { %v1494_v18 = vcombine.high %v1492_v42, %v1492_v42  ;;  %v1458_v32 = vrot.slane %v1444_v14, %v9229_v52  ;;  %v1459_v44 = vcombine.high %v1451_v28, %v1451_v28  ;;  %v2355_v63 = vmax.f32 %v1451_v28, %v1485_v7 }
 0x16a   :  { %v7850_v37 = vrot.slane %v2354_v13, 9  ;;  %v2992_v22 = vmax.f32 %v2352_v60, %v7848_v45  ;;  %v2993_v55 = vmax.f32 %v2353_v9, %v7849_v26  ;;  %v3460_v11 = vrot.slane %v2991_v17, %v9239_v2  ;;  %v9652_v17 = vpop.f32.mrb[63].mxu0 }
 0x16b   :  { %v1460_v16 = vcombine.high %v1458_v32, %v1458_v32  ;;  %v2356_v59 = vmax.f32 %v1459_v44, %v1493_v23  ;;  %v2357_v10 = vmax.f32 %v1458_v32, %v1492_v42  ;;  %v7851_v25 = vrot.slane %v2355_v63, 9  ;;  %v8568_v23 = vld [vmem:[%s11130_s4 + $0x8] sm:$0xff]  }
 0x16c   :  { %v2994_v31 = vmax.f32 %v2354_v13, %v7850_v37  ;;  %v3464_v8 = vrot.slane %v2992_v22, %v9239_v2  ;;  %v3468_v35 = vrot.slane %v2993_v55, %v9239_v2  ;;  %v857_v30 = vmax.f32 %v793_v58, 0.0  ;;  %v3934_v37 = vld [vmem:[#allocation2 + $0x51] sm:$0xff]  ;;  %8212 = vmatpush3.bf16.msra.mxu0 %v8568_v23 }
 0x16d   :  { %v2358_v46 = vmax.f32 %v1460_v16, %v1494_v18  ;;  %v7852_v24 = vrot.slane %v2356_v59, 9  ;;  %v7853_v7 = vrot.slane %v2357_v10, 9  ;;  %v2995_v14 = vmax.f32 %v2355_v63, %v7851_v25 }
 0x16e   :  { %v3472_v60 = vrot.slane %v2994_v31, %v9239_v2  ;;  %v3801_v9 = vsel %vm3745_vm5, %v3464_v8, %v3460_v11  ;;  %v1529_v28 = vcombine.high %v857_v30, %v857_v30  ;;  %v1536_v42 = vrot.slane %v857_v30, %v9229_v52  ;;  %v3933_v8 = vld [vmem:[#allocation2 + $0x41] sm:$0xff] }
 0x16f   :  { %v3802_v13 = vsel %vm3747_vm6, %v3468_v35, %v3801_v9  ;;  %v7854_v58 = vrot.slane %v2358_v46, 9  ;;  %v2996_v45 = vmax.f32 %v2356_v59, %v7852_v24  ;;  %v2997_v26 = vmax.f32 %v2357_v10, %v7853_v7 }
 0x170   :  { %v3476_v18 = vrot.slane %v2995_v14, %v9239_v2  ;;  %v3803_v32 = vsel %vm3749_vm7, %v3472_v60, %v3802_v13  ;;  %v1543_v44 = vrot.slane %v1529_v28, %v9229_v52  ;;  %v1544_v63 = vcombine.high %v1536_v42, %v1536_v42 }
 0x171   :  { %v2998_v22 = vmax.f32 %v2358_v46, %v7854_v58  ;;  %v3480_v55 = vrot.slane %v2996_v45, %v9239_v2  ;;  %v3484_v11 = vrot.slane %v2997_v26, %v9239_v2  ;;  %v791_v16 = vadd.f32 %v9550_v1, %v720_v43 }
 0x172   :  { %v3804_v59 = vsel %vm3751_vm8, %v3476_v18, %v3803_v32  ;;  %v1545_v10 = vcombine.high %v1543_v44, %v1543_v44  ;;  %v723_v25 = vmul.f32 %v9557_v4, %v9403_v3  ;;  %v721_v31 = vmul.f32 %v9557_v4, %v9405_v12 }
 0x173   :  { %v3488_v35 = vrot.slane %v2998_v22, %v9239_v2  ;;  %v3805_v30 = vsel %vm3753_vm9, %v3480_v55, %v3804_v59  ;;  %v855_v46 = vmax.f32 %v791_v16, 0.0  ;;  %v3947_v24 = vpack.c.bf16 %v3934_v37, %v3933_v8 }
 0x174   :  { %v3806_v7 = vsel %vm3755_vm10, %v3484_v11, %v3805_v30  ;;  %v794_v43 = vadd.f32 %v9550_v1, %v723_v25  ;;  %v792_v14 = vadd.f32 %v9550_v1, %v721_v31  ;;  %v726_v60 = vmul.f32 %v9557_v4, %v9411_v33 }
 0x175   :  { %v3807_v3 = vsel %vm3757_vm11, %v3488_v35, %v3806_v7  ;;  %v1495_v9 = vcombine.high %v855_v46, %v855_v46  ;;  %v1502_v12 = vrot.slane %v855_v46, %v9229_v52  ;;  %3965 = vrot.lane.b32.xlu1 %v3947_v24, %s8908_s18  ;;  %v724_v28 = vmul.f32 %v9557_v4, %v9416_v54 }
 0x176   :  { %3888 = vst.msk [vmem:[#allocation2 + $0x81] sm:$0xff] %vm3063_vm3, %v3807_v3  ;;  %v858_v23 = vmax.f32 %v794_v43, 0.0  ;;  %v856_v13 = vmax.f32 %v792_v14, 0.0  ;;  %v797_v58 = vadd.f32 %v9550_v1, %v726_v60  ;;  %v727_v45 = vmul.f32 %v9557_v4, %v9419_v61 }
 0x177   :  { %v1509_v33 = vrot.slane %v1495_v9, %v9229_v52  ;;  %v1510_v26 = vcombine.high %v1502_v12, %v1502_v12  ;;  %v2359_v18 = vmax.f32 %v1502_v12, %v1536_v42  ;;  %v795_v32 = vadd.f32 %v9550_v1, %v724_v28 }
 0x178   :  { %v1546_v37 = vcombine.high %v858_v23, %v858_v23  ;;  %v1553_v22 = vrot.slane %v858_v23, %v9229_v52  ;;  %v1512_v55 = vcombine.high %v856_v13, %v856_v13  ;;  %v1519_v54 = vrot.slane %v856_v13, %v9229_v52 }
 0x179   :  { %v1511_v11 = vcombine.high %v1509_v33, %v1509_v33  ;;  %v2360_v16 = vmax.f32 %v1510_v26, %v1544_v63  ;;  %v2361_v59 = vmax.f32 %v1509_v33, %v1543_v44  ;;  %v7855_v25 = vrot.slane %v2359_v18, 9 }
 0x17a   :  { %v1560_v31 = vrot.slane %v1546_v37, %v9229_v52  ;;  %v1561_v8 = vcombine.high %v1553_v22, %v1553_v22  ;;  %v1526_v61 = vrot.slane %v1512_v55, %v9229_v52  ;;  %v1527_v35 = vcombine.high %v1519_v54, %v1519_v54 }
 0x17b   :  { %v2362_v30 = vmax.f32 %v1511_v11, %v1545_v10  ;;  %v7856_v42 = vrot.slane %v2360_v16, 9  ;;  %v7857_v46 = vrot.slane %v2361_v59, 9  ;;  %v2999_v24 = vmax.f32 %v2359_v18, %v7855_v25 }
 0x17c   :  { %v1562_v7 = vcombine.high %v1560_v31, %v1560_v31  ;;  %v1528_v43 = vcombine.high %v1526_v61, %v1526_v61  ;;  %v2363_v14 = vmax.f32 %v1519_v54, %v1553_v22  ;;  %v2364_v60 = vmax.f32 %v1527_v35, %v1561_v8 }
 0x17d   :  { %v7858_v3 = vrot.slane %v2362_v30, 9  ;;  %v3000_v9 = vmax.f32 %v2360_v16, %v7856_v42  ;;  %v3001_v12 = vmax.f32 %v2361_v59, %v7857_v46  ;;  %v3492_v44 = vrot.slane %v2999_v24, %v9239_v2  ;;  %v4031_v24 = vld [vmem:[#allocation2 + $0x60] sm:$0xff] }
 0x17e   :  { %v2365_v63 = vmax.f32 %v1526_v61, %v1560_v31  ;;  %v2366_v28 = vmax.f32 %v1528_v43, %v1562_v7  ;;  %v7859_v23 = vrot.slane %v2363_v14, 9  ;;  %v7860_v13 = vrot.slane %v2364_v60, 9 }
 0x17f   :  { %v3002_v33 = vmax.f32 %v2362_v30, %v7858_v3  ;;  %v3496_v26 = vrot.slane %v3000_v9, %v9239_v2  ;;  %v3500_v10 = vrot.slane %v3001_v12, %v9239_v2  ;;  %v861_v37 = vmax.f32 %v797_v58, 0.0 }
 0x180   :  { %v7861_v18 = vrot.slane %v2365_v63, 9  ;;  %v7862_v55 = vrot.slane %v2366_v28, 9  ;;  %v3003_v11 = vmax.f32 %v2363_v14, %v7859_v23  ;;  %v3004_v22 = vmax.f32 %v2364_v60, %v7860_v13 }
 0x181   :  { %v3504_v54 = vrot.slane %v3002_v33, %v9239_v2  ;;  %v3808_v16 = vsel %vm3745_vm5, %v3496_v26, %v3492_v44  ;;  %v1597_v59 = vcombine.high %v861_v37, %v861_v37  ;;  %v1604_v25 = vrot.slane %v861_v37, %v9229_v52  ;;  %v8569_v26 = vld [vmem:[%s11130_s4 + $0x50] sm:$0xff]  }
 0x182   :  { %v3809_v31 = vsel %vm3747_vm6, %v3500_v10, %v3808_v16  ;;  %v3005_v8 = vmax.f32 %v2365_v63, %v7861_v18  ;;  %v3006_v61 = vmax.f32 %v2366_v28, %v7862_v55  ;;  %v3508_v35 = vrot.slane %v3003_v11, %v9239_v2  ;;  %v4030_v63 = vld [vmem:[#allocation2 + $0x50] sm:$0xff]  ;;  %v8571_v18 = vld [vmem:[%s11130_s4 + $0x58] sm:$0xff]   ;;  %8213 = vmatprep.subr.bf16.mxu0 %v8569_v26  ;;  %v8574_v26 = vld [vmem:[%s11130_s4 + $0x20] sm:$0xff]  }
 0x183   :  { %v3512_v30 = vrot.slane %v3004_v22, %v9239_v2  ;;  %v3810_v58 = vsel %vm3749_vm7, %v3504_v54, %v3809_v31  ;;  %v1611_v42 = vrot.slane %v1597_v59, %v9229_v52  ;;  %v1612_v46 = vcombine.high %v1604_v25, %v1604_v25 }
 0x184   :  { %v3516_v7 = vrot.slane %v3005_v8, %v9239_v2  ;;  %v3520_v43 = vrot.slane %v3006_v61, %v9239_v2  ;;  %v3811_v14 = vsel %vm3751_vm8, %v3508_v35, %v3810_v58  ;;  %v859_v60 = vmax.f32 %v795_v32, 0.0  ;;  %v8570_v32 = vld [vmem:[%s11130_s4 + $0x10] sm:$0xff]  }
 0x185   :  { %v3812_v3 = vsel %vm3753_vm9, %v3512_v30, %v3811_v14  ;;  %v1613_v9 = vcombine.high %v1611_v42, %v1611_v42  ;;  %v798_v12 = vadd.f32 %v9550_v1, %v727_v45  ;;  %v725_v44 = vmul.f32 %v9557_v4, %v9424_v20  ;;  %8214 = vmatpush3.bf16.msra.mxu0 %v8570_v32 }
 0x186   :  { %v3813_v28 = vsel %vm3755_vm10, %v3516_v7, %v3812_v3  ;;  %v1563_v23 = vcombine.high %v859_v60, %v859_v60  ;;  %v1570_v13 = vrot.slane %v859_v60, %v9229_v52  ;;  %v4044_v33 = vpack.c.bf16 %v4031_v24, %v4030_v63  ;;  %8215 = vmatprep.subr.bf16.mxu0 %v8571_v18 }
 0x187   :  { %v3814_v45 = vsel %vm3757_vm11, %v3520_v43, %v3813_v28  ;;  %v862_v10 = vmax.f32 %v798_v12, 0.0  ;;  %v796_v20 = vadd.f32 %v9550_v1, %v725_v44  ;;  %v730_v37 = vmul.f32 %v9557_v4, %v9447_v39  ;;  %v8573_v43 = vld [vmem:[%s11130_s4 + $0x60] sm:$0xff]  }
 0x188   :  { %3889 = vst.msk [vmem:[#allocation2 + $0xb1] sm:$0xff] %vm3063_vm3, %v3814_v45  ;;  %v1577_v55 = vrot.slane %v1563_v23, %v9229_v52  ;;  %v1578_v11 = vcombine.high %v1570_v13, %v1570_v13  ;;  %v2367_v22 = vmax.f32 %v1570_v13, %v1604_v25  ;;  %4062 = vrot.lane.b32.xlu0 %v4044_v33, %s8908_s18  ;;  %v8572_v25 = vld [vmem:[%s11130_s4 + $0x18] sm:$0xff]  }
 0x189   :  { %v9725_v54 = vmul.f32 %v9557_v4, %v9457_v48  ;;  %v1614_v16 = vcombine.high %v862_v10, %v862_v10  ;;  %v1621_v59 = vrot.slane %v862_v10, %v9229_v52  ;;  %v860_v39 = vmax.f32 %v796_v20, 0.0  ;;  %8216 = vmatpush3.bf16.msra.mxu0 %v8572_v25 }
 0x18a   :  { %v801_v31 = vadd.f32 %v9550_v1, %v730_v37  ;;  %v1579_v8 = vcombine.high %v1577_v55, %v1577_v55  ;;  %v2368_v61 = vmax.f32 %v1578_v11, %v1612_v46  ;;  %v2369_v35 = vmax.f32 %v1577_v55, %v1611_v42  ;;  %8217 = vmatprep.subr.bf16.mxu0 %v8573_v43  ;;  %v8575_v11 = vld [vmem:[%s11130_s4 + $0x68] sm:$0xff]  }
 0x18b   :  { %v7863_v30 = vrot.slane %v2367_v22, 9  ;;  %v1628_v58 = vrot.slane %v1614_v16, %v9229_v52  ;;  %v1629_v48 = vcombine.high %v1621_v59, %v1621_v59  ;;  %v1580_v24 = vcombine.high %v860_v39, %v860_v39 }
 0x18c   :  { %v1587_v7 = vrot.slane %v860_v39, %v9229_v52  ;;  %v2370_v14 = vmax.f32 %v1579_v8, %v1613_v9  ;;  %v7864_v46 = vrot.slane %v2368_v61, 9  ;;  %v7865_v42 = vrot.slane %v2369_v35, 9 }
 0x18d   :  { %v3007_v60 = vmax.f32 %v2367_v22, %v7863_v30  ;;  %v1630_v3 = vcombine.high %v1628_v58, %v1628_v58  ;;  %v1594_v12 = vrot.slane %v1580_v24, %v9229_v52  ;;  %v865_v55 = vmax.f32 %v801_v31, 0.0  ;;  %8218 = vmatpush3.bf16.msra.mxu0 %v8574_v26  ;;  %v8576_v31 = vld [vmem:[%s11130_s4 + $0x28] sm:$0xff]  }
 0x18e   :  { %v1595_v44 = vcombine.high %v1587_v7, %v1587_v7  ;;  %v2371_v63 = vmax.f32 %v1587_v7, %v1621_v59  ;;  %v7866_v28 = vrot.slane %v2370_v14, 9  ;;  %v3008_v23 = vmax.f32 %v2368_v61, %v7864_v46  ;;  %8219 = vmatprep.subr.bf16.mxu0 %v8575_v11  ;;  %v3935_v26 = vld [vmem:[#allocation2 + $0x61] sm:$0xff] }
 0x18f   :  { %v3009_v13 = vmax.f32 %v2369_v35, %v7865_v42  ;;  %v3524_v33 = vrot.slane %v3007_v60, %v9239_v2  ;;  %v1596_v32 = vcombine.high %v1594_v12, %v1594_v12  ;;  %v2373_v45 = vmax.f32 %v1594_v12, %v1628_v58  ;;  %v3936_v42 = vld [vmem:[#allocation2 + $0x71] sm:$0xff] }
 0x190   :  { %v2372_v9 = vmax.f32 %v1595_v44, %v1629_v48  ;;  %v7867_v10 = vrot.slane %v2371_v63, 9  ;;  %v3010_v20 = vmax.f32 %v2370_v14, %v7866_v28  ;;  %v3528_v37 = vrot.slane %v3008_v23, %v9239_v2  ;;  %v8577_v60 = vld [vmem:[%s11130_s4 + $0x70] sm:$0xff]  }
 0x191   :  { %v3532_v18 = vrot.slane %v3009_v13, %v9239_v2  ;;  %v2374_v22 = vmax.f32 %v1596_v32, %v1630_v3  ;;  %v7869_v59 = vrot.slane %v2373_v45, 9  ;;  %v1665_v35 = vcombine.high %v865_v55, %v865_v55  ;;  %8220 = vmatpush3.bf16.msra.mxu0 %v8576_v31  ;;  %v8578_v32 = vld [vmem:[%s11130_s4 + $0x30] sm:$0xff]  }
 0x192   :  { %v7868_v16 = vrot.slane %v2372_v9, 9  ;;  %v3011_v39 = vmax.f32 %v2371_v63, %v7867_v10  ;;  %v3536_v8 = vrot.slane %v3010_v20, %v9239_v2  ;;  %v3815_v61 = vsel %vm3745_vm5, %v3528_v37, %v3524_v33  ;;  %8221 = vmatprep.subr.bf16.mxu0 %v8577_v60 }
 0x193   :  { %v1672_v30 = vrot.slane %v865_v55, %v9229_v52  ;;  %v3816_v25 = vsel %vm3747_vm6, %v3532_v18, %v3815_v61  ;;  %v7870_v58 = vrot.slane %v2374_v22, 9  ;;  %v3013_v24 = vmax.f32 %v2373_v45, %v7869_v59  ;;  %v8579_v18 = vld [vmem:[%s11130_s4 + $0x78] sm:$0xff]  }
 0x194   :  { %v3012_v48 = vmax.f32 %v2372_v9, %v7868_v16  ;;  %v3540_v7 = vrot.slane %v3011_v39, %v9239_v2  ;;  %v3817_v43 = vsel %vm3749_vm7, %v3536_v8, %v3816_v25  ;;  %v1679_v14 = vrot.slane %v1665_v35, %v9229_v52  ;;  %v8580_v61 = vld [vmem:[%s11130_s4 + $0x38] sm:$0xff]  }
 0x195   :  { %v1680_v46 = vcombine.high %v1672_v30, %v1672_v30  ;;  %v3014_v3 = vmax.f32 %v2374_v22, %v7870_v58  ;;  %v3548_v44 = vrot.slane %v3013_v24, %v9239_v2  ;;  %v799_v63 = vadd.f32 %v9550_v1, %v9725_v54  ;;  %8222 = vmatpush3.bf16.msra.mxu0 %v8578_v32 }
 0x196   :  { %v3544_v12 = vrot.slane %v3012_v48, %v9239_v2  ;;  %v3818_v28 = vsel %vm3751_vm8, %v3540_v7, %v3817_v43  ;;  %v1681_v23 = vcombine.high %v1679_v14, %v1679_v14  ;;  %v731_v13 = vmul.f32 %v9557_v4, %v9460_v53  ;;  %8223 = vmatprep.subr.bf16.mxu0 %v8579_v18 }
 0x197   :  { %v729_v33 = vmul.f32 %v9557_v4, %v9464_v62  ;;  %v3552_v9 = vrot.slane %v3014_v3, %v9239_v2  ;;  %v863_v54 = vmax.f32 %v799_v63, 0.0  ;;  %v3948_v10 = vpack.c.bf16 %v3936_v42, %v3935_v26 }
 0x198   :  { %v3819_v45 = vsel %vm3753_vm9, %v3544_v12, %v3818_v28  ;;  %v802_v53 = vadd.f32 %v9550_v1, %v731_v13  ;;  %v734_v62 = vmul.f32 %v9557_v4, %v9469_v0  ;;  %v732_v16 = vmul.f32 %v9557_v4, %v9471_v6 }
 0x199   :  { %v3820_v20 = vsel %vm3755_vm10, %v3548_v44, %v3819_v45  ;;  %v800_v37 = vadd.f32 %v9550_v1, %v729_v33  ;;  %v1631_v11 = vcombine.high %v863_v54, %v863_v54  ;;  %v1638_v22 = vrot.slane %v863_v54, %v9229_v52  ;;  %3967 = vrot.lane.b32.xlu1 %v3948_v10, %s8908_s18 }
 0x19a   :  { %v3821_v55 = vsel %vm3757_vm11, %v3552_v9, %v3820_v20  ;;  %v866_v59 = vmax.f32 %v802_v53, 0.0  ;;  %v805_v0 = vadd.f32 %v9550_v1, %v734_v62  ;;  %v9791_v8 = vmul.f32 %v9557_v4, %v9475_v49  ;;  %8224 = vmatpush3.bf16.msra.mxu0 %v8580_v61 }
 0x19b   :  { %3890 = vst.msk [vmem:[#allocation2 + $0xc1] sm:$0xff] %vm3063_vm3, %v3821_v55  ;;  %v864_v39 = vmax.f32 %v800_v37, 0.0  ;;  %v1645_v35 = vrot.slane %v1631_v11, %v9229_v52  ;;  %v1646_v31 = vcombine.high %v1638_v22, %v1638_v22  ;;  %v2375_v25 = vmax.f32 %v1638_v22, %v1672_v30 }
 0x19c   :  { %v803_v6 = vadd.f32 %v9550_v1, %v732_v16  ;;  %v1682_v58 = vcombine.high %v866_v59, %v866_v59  ;;  %v1689_v48 = vrot.slane %v866_v59, %v9229_v52  ;;  %v869_v11 = vmax.f32 %v805_v0, 0.0 }
 0x19d   :  { %v1648_v24 = vcombine.high %v864_v39, %v864_v39  ;;  %v1655_v7 = vrot.slane %v864_v39, %v9229_v52  ;;  %v1647_v49 = vcombine.high %v1645_v35, %v1645_v35  ;;  %v2376_v43 = vmax.f32 %v1646_v31, %v1680_v46 }
 0x19e   :  { %v2377_v42 = vmax.f32 %v1645_v35, %v1679_v14  ;;  %v7871_v60 = vrot.slane %v2375_v25, 9  ;;  %v1696_v3 = vrot.slane %v1682_v58, %v9229_v52  ;;  %v1697_v12 = vcombine.high %v1689_v48, %v1689_v48 }
 0x19f   :  { %v1662_v44 = vrot.slane %v1648_v24, %v9229_v52  ;;  %v1663_v63 = vcombine.high %v1655_v7, %v1655_v7  ;;  %v2378_v30 = vmax.f32 %v1647_v49, %v1681_v23  ;;  %v7872_v28 = vrot.slane %v2376_v43, 9 }
 0x1a0   :  { %v7873_v13 = vrot.slane %v2377_v42, 9  ;;  %v3015_v33 = vmax.f32 %v2375_v25, %v7871_v60  ;;  %v1698_v26 = vcombine.high %v1696_v3, %v1696_v3  ;;  %v2379_v9 = vmax.f32 %v1655_v7, %v1689_v48  ;;  %v4033_v60 = vld [vmem:[#allocation2 + $0x80] sm:$0xff] }
 0x1a1   :  { %v1664_v32 = vcombine.high %v1662_v44, %v1662_v44  ;;  %v2380_v45 = vmax.f32 %v1663_v63, %v1697_v12  ;;  %v7874_v54 = vrot.slane %v2378_v30, 9  ;;  %v3016_v10 = vmax.f32 %v2376_v43, %v7872_v28 }
 0x1a2   :  { %v3017_v46 = vmax.f32 %v2377_v42, %v7873_v13  ;;  %v3556_v14 = vrot.slane %v3015_v33, %v9239_v2  ;;  %v2381_v20 = vmax.f32 %v1662_v44, %v1696_v3  ;;  %v7875_v37 = vrot.slane %v2379_v9, 9 }
 0x1a3   :  { %v2382_v53 = vmax.f32 %v1664_v32, %v1698_v26  ;;  %v7876_v62 = vrot.slane %v2380_v45, 9  ;;  %v3018_v18 = vmax.f32 %v2378_v30, %v7874_v54  ;;  %v3560_v55 = vrot.slane %v3016_v10, %v9239_v2  ;;  %v4032_v26 = vld [vmem:[#allocation2 + $0x70] sm:$0xff] }
 0x1a4   :  { %v3564_v23 = vrot.slane %v3017_v46, %v9239_v2  ;;  %v7877_v22 = vrot.slane %v2381_v20, 9  ;;  %v3019_v59 = vmax.f32 %v2379_v9, %v7875_v37  ;;  %v1733_v31 = vcombine.high %v869_v11, %v869_v11 }
 0x1a5   :  { %v7878_v16 = vrot.slane %v2382_v53, 9  ;;  %v3020_v39 = vmax.f32 %v2380_v45, %v7876_v62  ;;  %v3568_v61 = vrot.slane %v3018_v18, %v9239_v2  ;;  %v3822_v35 = vsel %vm3745_vm5, %v3560_v55, %v3556_v14 }
 0x1a6   :  { %v1740_v25 = vrot.slane %v869_v11, %v9229_v52  ;;  %v3823_v58 = vsel %vm3747_vm6, %v3564_v23, %v3822_v35  ;;  %v3021_v48 = vmax.f32 %v2381_v20, %v7877_v22  ;;  %v3572_v7 = vrot.slane %v3019_v59, %v9239_v2 }
 0x1a7   :  { %v3022_v24 = vmax.f32 %v2382_v53, %v7878_v16  ;;  %v3576_v49 = vrot.slane %v3020_v39, %v9239_v2  ;;  %v3824_v0 = vsel %vm3749_vm7, %v3568_v61, %v3823_v58  ;;  %v1747_v43 = vrot.slane %v1733_v31, %v9229_v52 }
 0x1a8   :  { %v1748_v42 = vcombine.high %v1740_v25, %v1740_v25  ;;  %v3580_v3 = vrot.slane %v3021_v48, %v9239_v2  ;;  %v3825_v44 = vsel %vm3751_vm8, %v3572_v7, %v3824_v0  ;;  %v867_v63 = vmax.f32 %v803_v6, 0.0 }
 0x1a9   :  { %v3584_v12 = vrot.slane %v3022_v24, %v9239_v2  ;;  %v3826_v30 = vsel %vm3753_vm9, %v3576_v49, %v3825_v44  ;;  %v1749_v28 = vcombine.high %v1747_v43, %v1747_v43  ;;  %v806_v13 = vadd.f32 %v9550_v1, %v9791_v8 }
 0x1aa   :  { %v733_v33 = vmul.f32 %v9557_v4, %v9477_v56  ;;  %v3827_v32 = vsel %vm3755_vm10, %v3580_v3, %v3826_v30  ;;  %v1699_v9 = vcombine.high %v867_v63, %v867_v63  ;;  %v1706_v45 = vrot.slane %v867_v63, %v9229_v52 }
 0x1ab   :  { %v4045_v54 = vpack.c.bf16 %v4033_v60, %v4032_v26  ;;  %v3828_v10 = vsel %vm3757_vm11, %v3584_v12, %v3827_v32  ;;  %v870_v46 = vmax.f32 %v806_v13, 0.0  ;;  %v738_v14 = vmul.f32 %v9557_v4, %v9496_v40 }
 0x1ac   :  { %v804_v6 = vadd.f32 %v9550_v1, %v733_v33  ;;  %3891 = vst.msk [vmem:[#allocation2 + $0xd1] sm:$0xff] %vm3063_vm3, %v3828_v10  ;;  %v1713_v8 = vrot.slane %v1699_v9, %v9229_v52  ;;  %v1714_v56 = vcombine.high %v1706_v45, %v1706_v45  ;;  %v2383_v20 = vmax.f32 %v1706_v45, %v1740_v25 }
 0x1ad   :  { %4064 = vrot.lane.b32.xlu0 %v4045_v54, %s8908_s18  ;;  %v736_v53 = vmul.f32 %v9557_v4, %v9505_v57  ;;  %v1750_v37 = vcombine.high %v870_v46, %v870_v46  ;;  %v1757_v62 = vrot.slane %v870_v46, %v9229_v52  ;;  %v809_v55 = vadd.f32 %v9550_v1, %v738_v14 }
 0x1ae   :  { %v868_v18 = vmax.f32 %v804_v6, 0.0  ;;  %v1715_v23 = vcombine.high %v1713_v8, %v1713_v8  ;;  %v2384_v11 = vmax.f32 %v1714_v56, %v1748_v42  ;;  %v2385_v40 = vmax.f32 %v1713_v8, %v1747_v43 }
 0x1af   :  { %v7879_v22 = vrot.slane %v2383_v20, 9  ;;  %v1764_v16 = vrot.slane %v1750_v37, %v9229_v52  ;;  %v1765_v59 = vcombine.high %v1757_v62, %v1757_v62  ;;  %v873_v13 = vmax.f32 %v809_v55, 0.0  ;;  %v3937_v55 = vld [vmem:[#allocation2 + $0xa1] sm:$0xff] }
 0x1b0   :  { %v1716_v39 = vcombine.high %v868_v18, %v868_v18  ;;  %v1723_v61 = vrot.slane %v868_v18, %v9229_v52  ;;  %v2386_v35 = vmax.f32 %v1715_v23, %v1749_v28  ;;  %v7880_v31 = vrot.slane %v2384_v11, 9  ;;  %v3938_v23 = vld [vmem:[#allocation2 + $0xb1] sm:$0xff] }
 0x1b1   :  { %v7881_v25 = vrot.slane %v2385_v40, 9  ;;  %v3023_v57 = vmax.f32 %v2383_v20, %v7879_v22  ;;  %v1766_v58 = vcombine.high %v1764_v16, %v1764_v16  ;;  %v1801_v10 = vcombine.high %v873_v13, %v873_v13 }
 0x1b2   :  { %v1730_v48 = vrot.slane %v1716_v39, %v9229_v52  ;;  %v1731_v24 = vcombine.high %v1723_v61, %v1723_v61  ;;  %v2387_v7 = vmax.f32 %v1723_v61, %v1757_v62  ;;  %v7882_v49 = vrot.slane %v2386_v35, 9 }
 0x1b3   :  { %v3024_v0 = vmax.f32 %v2384_v11, %v7880_v31  ;;  %v3025_v42 = vmax.f32 %v2385_v40, %v7881_v25  ;;  %v3588_v43 = vrot.slane %v3023_v57, %v9239_v2  ;;  %v1808_v46 = vrot.slane %v873_v13, %v9229_v52 }
 0x1b4   :  { %v1732_v60 = vcombine.high %v1730_v48, %v1730_v48  ;;  %v2388_v3 = vmax.f32 %v1731_v24, %v1765_v59  ;;  %v2389_v12 = vmax.f32 %v1730_v48, %v1764_v16  ;;  %v7883_v44 = vrot.slane %v2387_v7, 9 }
 0x1b5   :  { %v3026_v63 = vmax.f32 %v2386_v35, %v7882_v49  ;;  %v3592_v30 = vrot.slane %v3024_v0, %v9239_v2  ;;  %v3596_v28 = vrot.slane %v3025_v42, %v9239_v2  ;;  %v1815_v62 = vrot.slane %v1801_v10, %v9229_v52 }
 0x1b6   :  { %v2390_v33 = vmax.f32 %v1732_v60, %v1766_v58  ;;  %v7884_v26 = vrot.slane %v2388_v3, 9  ;;  %v7885_v32 = vrot.slane %v2389_v12, 9  ;;  %v3027_v9 = vmax.f32 %v2387_v7, %v7883_v44  ;;  %v9877_v60 = vld [vmem:[%s11128_s2] ss:$0 sm:$0xff] }
 0x1b7   :  { %v3600_v45 = vrot.slane %v3026_v63, %v9239_v2  ;;  %v3829_v54 = vsel %vm3745_vm5, %v3592_v30, %v3588_v43  ;;  %v1816_v18 = vcombine.high %v1808_v46, %v1808_v46  ;;  %v807_v16 = vadd.f32 %v9550_v1, %v736_v53 }
 0x1b8   :  { %v3830_v6 = vsel %vm3747_vm6, %v3596_v28, %v3829_v54  ;;  %v7886_v14 = vrot.slane %v2390_v33, 9  ;;  %v3028_v8 = vmax.f32 %v2388_v3, %v7884_v26  ;;  %v3029_v56 = vmax.f32 %v2389_v12, %v7885_v32 }
 0x1b9   :  { %v3604_v20 = vrot.slane %v3027_v9, %v9239_v2  ;;  %v3831_v37 = vsel %vm3749_vm7, %v3600_v45, %v3830_v6  ;;  %v1817_v39 = vcombine.high %v1815_v62, %v1815_v62  ;;  %v739_v61 = vmul.f32 %v9557_v4, %v9510_v5 }
 0x1ba   :  { %v3030_v11 = vmax.f32 %v2390_v33, %v7886_v14  ;;  %v3608_v40 = vrot.slane %v3028_v8, %v9239_v2  ;;  %v3612_v22 = vrot.slane %v3029_v56, %v9239_v2  ;;  %v737_v35 = vmul.f32 %v9557_v4, %v9515_v21  ;;  %v9890_v56 = vld [vmem:[%s11130_s4 + $0x100] sm:$0xff]  }
 0x1bb   :  { %v3832_v59 = vsel %vm3751_vm8, %v3604_v20, %v3831_v37  ;;  %v871_v57 = vmax.f32 %v807_v16, 0.0  ;;  %v3949_v58 = vpack.c.bf16 %v3938_v23, %v3937_v55  ;;  %v810_v24 = vadd.f32 %v9550_v1, %v739_v61  ;;  %8448 = vmatprep.subr.bf16.mxu0 %v9890_v56 }
 0x1bc   :  { %v3616_v31 = vrot.slane %v3030_v11, %v9239_v2  ;;  %v3833_v25 = vsel %vm3753_vm9, %v3608_v40, %v3832_v59  ;;  %v808_v53 = vadd.f32 %v9550_v1, %v737_v35  ;;  %v742_v7 = vmul.f32 %v9557_v4, %v9524_v27  ;;  %v9871_v1 = vld [vmem:[%s11129_s3] ss:$0 sm:$0xff] }
 0x1bd   :  { %v3834_v48 = vsel %vm3755_vm10, %v3612_v22, %v3833_v25  ;;  %v1767_v49 = vcombine.high %v871_v57, %v871_v57  ;;  %v1774_v21 = vrot.slane %v871_v57, %v9229_v52  ;;  %3969 = vrot.lane.b32.xlu1 %v3949_v58, %s8908_s18  ;;  %v740_v0 = vmul.f32 %v9557_v4, %v9527_v47 }
 0x1be   :  { %v3835_v5 = vsel %vm3757_vm11, %v3616_v31, %v3834_v48  ;;  %v874_v42 = vmax.f32 %v810_v24, 0.0  ;;  %v872_v43 = vmax.f32 %v808_v53, 0.0  ;;  %v813_v27 = vadd.f32 %v9871_v1, %v742_v7 }
 0x1bf   :  { %3892 = vst.msk [vmem:[#allocation2 + $0xe1] sm:$0xff] %vm3063_vm3, %v3835_v5  ;;  %v743_v3 = vmul.f32 %v9877_v60, %v9531_v19  ;;  %v1781_v47 = vrot.slane %v1767_v49, %v9229_v52  ;;  %v1782_v4 = vcombine.high %v1774_v21, %v1774_v21  ;;  %v2391_v12 = vmax.f32 %v1774_v21, %v1808_v46 }
 0x1c0   :  { %v811_v44 = vadd.f32 %v9871_v1, %v740_v0  ;;  %v1818_v63 = vcombine.high %v874_v42, %v874_v42  ;;  %v1825_v30 = vrot.slane %v874_v42, %v9229_v52  ;;  %v1784_v28 = vcombine.high %v872_v43, %v872_v43 }
 0x1c1   :  { %v1791_v13 = vrot.slane %v872_v43, %v9229_v52  ;;  %v1783_v33 = vcombine.high %v1781_v47, %v1781_v47  ;;  %v2392_v26 = vmax.f32 %v1782_v4, %v1816_v18  ;;  %v2393_v32 = vmax.f32 %v1781_v47, %v1815_v62 }
 0x1c2   :  { %v7887_v9 = vrot.slane %v2391_v12, 9  ;;  %v1832_v45 = vrot.slane %v1818_v63, %v9229_v52  ;;  %v1833_v54 = vcombine.high %v1825_v30, %v1825_v30  ;;  %v1798_v19 = vrot.slane %v1784_v28, %v9229_v52  ;;  %v9904_v63 = vld [vmem:[#allocation2 + $0xc0] sm:$0xff] }
 0x1c3   :  { %v1799_v10 = vcombine.high %v1791_v13, %v1791_v13  ;;  %v2394_v6 = vmax.f32 %v1783_v33, %v1817_v39  ;;  %v7888_v46 = vrot.slane %v2392_v26, 9  ;;  %v7889_v14 = vrot.slane %v2393_v32, 9 }
 0x1c4   :  { %v3031_v8 = vmax.f32 %v2391_v12, %v7887_v9  ;;  %v1834_v20 = vcombine.high %v1832_v45, %v1832_v45  ;;  %v1800_v37 = vcombine.high %v1798_v19, %v1798_v19  ;;  %v2395_v18 = vmax.f32 %v1791_v13, %v1825_v30 }
 0x1c5   :  { %v2396_v62 = vmax.f32 %v1799_v10, %v1833_v54  ;;  %v7890_v55 = vrot.slane %v2394_v6, 9  ;;  %v3032_v23 = vmax.f32 %v2392_v26, %v7888_v46  ;;  %v3033_v11 = vmax.f32 %v2393_v32, %v7889_v14  ;;  %v9913_v54 = vld [vmem:[#allocation2 + $0xb0] sm:$0xff] }
 0x1c6   :  { %v3620_v40 = vrot.slane %v3031_v8, %v9239_v2  ;;  %v2397_v22 = vmax.f32 %v1798_v19, %v1832_v45  ;;  %v2398_v16 = vmax.f32 %v1800_v37, %v1834_v20  ;;  %v7891_v59 = vrot.slane %v2395_v18, 9 }
 0x1c7   :  { %v7892_v39 = vrot.slane %v2396_v62, 9  ;;  %v3034_v61 = vmax.f32 %v2394_v6, %v7890_v55  ;;  %v3624_v35 = vrot.slane %v3032_v23, %v9239_v2  ;;  %v3628_v31 = vrot.slane %v3033_v11, %v9239_v2 }
 0x1c8   :  { %v877_v25 = vmax.f32 %v813_v27, 0.0  ;;  %v7893_v57 = vrot.slane %v2397_v22, 9  ;;  %v7894_v58 = vrot.slane %v2398_v16, 9  ;;  %v3035_v48 = vmax.f32 %v2395_v18, %v7891_v59 }
 0x1c9   :  { %v3036_v24 = vmax.f32 %v2396_v62, %v7892_v39  ;;  %v3632_v53 = vrot.slane %v3034_v61, %v9239_v2  ;;  %v3836_v7 = vsel %vm3745_vm5, %v3624_v35, %v3620_v40  ;;  %v875_v33 = vmax.f32 %v811_v44, 0.0 }
 0x1ca   :  { %v1869_v5 = vcombine.high %v877_v25, %v877_v25  ;;  %v1876_v49 = vrot.slane %v877_v25, %v9229_v52  ;;  %v3837_v21 = vsel %vm3747_vm6, %v3628_v31, %v3836_v7  ;;  %v3037_v0 = vmax.f32 %v2397_v22, %v7893_v57 }
 0x1cb   :  { %v3038_v42 = vmax.f32 %v2398_v16, %v7894_v58  ;;  %v3636_v43 = vrot.slane %v3035_v48, %v9239_v2  ;;  %v3640_v47 = vrot.slane %v3036_v24, %v9239_v2  ;;  %v3838_v27 = vsel %vm3749_vm7, %v3632_v53, %v3837_v21  ;;  %v8582_v58 = vld [vmem:[%s11130_s4 + $0xc0] sm:$0xff]  }
 0x1cc   :  { %v1883_v4 = vrot.slane %v1869_v5, %v9229_v52  ;;  %v1884_v12 = vcombine.high %v1876_v49, %v1876_v49  ;;  %v3644_v30 = vrot.slane %v3037_v0, %v9239_v2  ;;  %v814_v9 = vadd.f32 %v9871_v1, %v743_v3  ;;  %v8583_v48 = vld [vmem:[%s11130_s4 + $0x80] sm:$0xff]   ;;  %8273 = vmatprep.subr.bf16.mxu1 %v8582_v58 }
 0x1cd   :  { %v3648_v28 = vrot.slane %v3038_v42, %v9239_v2  ;;  %v3839_v13 = vsel %vm3751_vm8, %v3636_v43, %v3838_v27  ;;  %v741_v45 = vmul.f32 %v9877_v60, %v9540_v15  ;;  %v1835_v10 = vcombine.high %v875_v33, %v875_v33  ;;  %8274 = vmatpush3.bf16.msra.mxu1 %v8583_v48 }
 0x1ce   :  { %v3840_v26 = vsel %vm3753_vm9, %v3640_v47, %v3839_v13  ;;  %v1885_v32 = vcombine.high %v1883_v4, %v1883_v4  ;;  %v1842_v6 = vrot.slane %v875_v33, %v9229_v52  ;;  %v4046_v46 = vpack.c.bf16 %v9904_v63, %v9913_v54 }
 0x1cf   :  { %v3841_v19 = vsel %vm3755_vm10, %v3644_v30, %v3840_v26  ;;  %v878_v14 = vmax.f32 %v814_v9, 0.0  ;;  %v812_v8 = vadd.f32 %v9871_v1, %v741_v45  ;;  %v746_v3 = vmul.f32 %v9877_v60, %v9584_v50 }
 0x1d0   :  { %v3842_v44 = vsel %vm3757_vm11, %v3648_v28, %v3841_v19  ;;  %v1849_v15 = vrot.slane %v1835_v10, %v9229_v52  ;;  %v1850_v20 = vcombine.high %v1842_v6, %v1842_v6  ;;  %v2399_v37 = vmax.f32 %v1842_v6, %v1876_v49  ;;  %4066 = vrot.lane.b32.xlu0 %v4046_v46, %s8908_s18 }
 0x1d1   :  { %3893 = vst.msk [vmem:[#allocation2 + $0xf1] sm:$0xff] %vm3063_vm3, %v3842_v44  ;;  %v744_v18 = vmul.f32 %v9877_v60, %v9588_v38  ;;  %v1886_v62 = vcombine.high %v878_v14, %v878_v14  ;;  %v1893_v55 = vrot.slane %v878_v14, %v9229_v52  ;;  %v876_v23 = vmax.f32 %v812_v8, 0.0 }
 0x1d2   :  { %v817_v11 = vadd.f32 %v9871_v1, %v746_v3  ;;  %v1851_v40 = vcombine.high %v1849_v15, %v1849_v15  ;;  %v2400_v22 = vmax.f32 %v1850_v20, %v1884_v12  ;;  %v2401_v50 = vmax.f32 %v1849_v15, %v1883_v4 }
 0x1d3   :  { %v7895_v16 = vrot.slane %v2399_v37, 9  ;;  %v1900_v59 = vrot.slane %v1886_v62, %v9229_v52  ;;  %v1901_v39 = vcombine.high %v1893_v55, %v1893_v55  ;;  %v1852_v61 = vcombine.high %v876_v23, %v876_v23  ;;  %v9949_v62 = vld [vmem:[#allocation2 + $0xd1] sm:$0xff] }
 0x1d4   :  { %v1859_v35 = vrot.slane %v876_v23, %v9229_v52  ;;  %v2402_v31 = vmax.f32 %v1851_v40, %v1885_v32  ;;  %v7896_v25 = vrot.slane %v2400_v22, 9  ;;  %v7897_v57 = vrot.slane %v2401_v50, 9 }
 0x1d5   :  { %v3039_v38 = vmax.f32 %v2399_v37, %v7895_v16  ;;  %v1902_v24 = vcombine.high %v1900_v59, %v1900_v59  ;;  %v1866_v53 = vrot.slane %v1852_v61, %v9229_v52  ;;  %v881_v13 = vmax.f32 %v817_v11, 0.0 }
 0x1d6   :  { %v1867_v7 = vcombine.high %v1859_v35, %v1859_v35  ;;  %v2403_v5 = vmax.f32 %v1859_v35, %v1893_v55  ;;  %v7898_v49 = vrot.slane %v2402_v31, 9  ;;  %v3040_v21 = vmax.f32 %v2400_v22, %v7896_v25 }
 0x1d7   :  { %v3041_v0 = vmax.f32 %v2401_v50, %v7897_v57  ;;  %v3652_v42 = vrot.slane %v3039_v38, %v9239_v2  ;;  %v1868_v43 = vcombine.high %v1866_v53, %v1866_v53  ;;  %v2405_v27 = vmax.f32 %v1866_v53, %v1900_v59 }
 0x1d8   :  { %v2404_v47 = vmax.f32 %v1867_v7, %v1901_v39  ;;  %v7899_v4 = vrot.slane %v2403_v5, 9  ;;  %v3042_v12 = vmax.f32 %v2402_v31, %v7898_v49  ;;  %v3656_v30 = vrot.slane %v3040_v21, %v9239_v2  ;;  %v9959_v39 = vld [vmem:[#allocation2 + $0xc1] sm:$0xff] }
 0x1d9   :  { %v3660_v28 = vrot.slane %v3041_v0, %v9239_v2  ;;  %v2406_v33 = vmax.f32 %v1868_v43, %v1902_v24  ;;  %v7901_v32 = vrot.slane %v2405_v27, 9  ;;  %v1937_v10 = vcombine.high %v881_v13, %v881_v13 }
 0x1da   :  { %v7900_v26 = vrot.slane %v2404_v47, 9  ;;  %v3043_v9 = vmax.f32 %v2403_v5, %v7899_v4  ;;  %v3664_v45 = vrot.slane %v3042_v12, %v9239_v2  ;;  %v3843_v19 = vsel %vm3745_vm5, %v3656_v30, %v3652_v42 }
 0x1db   :  { %v1944_v6 = vrot.slane %v881_v13, %v9229_v52  ;;  %v3844_v46 = vsel %vm3747_vm6, %v3660_v28, %v3843_v19  ;;  %v7902_v44 = vrot.slane %v2406_v33, 9  ;;  %v3045_v8 = vmax.f32 %v2405_v27, %v7901_v32 }
 0x1dc   :  { %v3044_v14 = vmax.f32 %v2404_v47, %v7900_v26  ;;  %v3668_v3 = vrot.slane %v3043_v9, %v9239_v2  ;;  %v3845_v15 = vsel %vm3749_vm7, %v3664_v45, %v3844_v46  ;;  %v1951_v20 = vrot.slane %v1937_v10, %v9229_v52  ;;  %v8585_v10 = vld [vmem:[%s11130_s4 + $0xc8] sm:$0xff]  }
 0x1dd   :  { %v1952_v37 = vcombine.high %v1944_v6, %v1944_v6  ;;  %v3046_v55 = vmax.f32 %v2406_v33, %v7902_v44  ;;  %v3676_v11 = vrot.slane %v3045_v8, %v9239_v2  ;;  %v815_v40 = vadd.f32 %v9871_v1, %v744_v18  ;;  %8275 = vmatprep.subr.bf16.mxu1 %v8585_v10 }
 0x1de   :  { %v3672_v23 = vrot.slane %v3044_v14, %v9239_v2  ;;  %v3846_v22 = vsel %vm3751_vm8, %v3668_v3, %v3845_v15  ;;  %v1953_v50 = vcombine.high %v1951_v20, %v1951_v20  ;;  %v747_v16 = vmul.f32 %v9877_v60, %v9595_v41  ;;  %v8587_v3 = vld [vmem:[%s11130_s4 + $0xd0] sm:$0xff]  }
 0x1df   :  { %v745_v59 = vmul.f32 %v9877_v60, %v9603_v29  ;;  %v3680_v61 = vrot.slane %v3046_v55, %v9239_v2  ;;  %v879_v31 = vmax.f32 %v815_v40, 0.0  ;;  %v9965_v25 = vpack.c.bf16 %v9949_v62, %v9959_v39 }
 0x1e0   :  { %v3847_v35 = vsel %vm3753_vm9, %v3672_v23, %v3846_v22  ;;  %v818_v57 = vadd.f32 %v9871_v1, %v747_v16  ;;  %v750_v29 = vmul.f32 %v9877_v60, %v9629_v51  ;;  %v748_v24 = vmul.f32 %v9877_v60, %v9637_v36 }
 0x1e1   :  { %v3848_v18 = vsel %vm3755_vm10, %v3676_v11, %v3847_v35  ;;  %v816_v41 = vadd.f32 %v9871_v1, %v745_v59  ;;  %v1903_v58 = vcombine.high %v879_v31, %v879_v31  ;;  %v1910_v48 = vrot.slane %v879_v31, %v9229_v52  ;;  %3971 = vrot.lane.b32.xlu1 %v9965_v25, %s8908_s18 }
 0x1e2   :  { %v3849_v38 = vsel %vm3757_vm11, %v3680_v61, %v3848_v18  ;;  %v882_v53 = vmax.f32 %v818_v57, 0.0  ;;  %v821_v5 = vadd.f32 %v9871_v1, %v750_v29  ;;  %v9982_v51 = vmul.f32 %v9877_v60, %v9643_v34 }
 0x1e3   :  { %3894 = vst.msk [vmem:[#allocation2 + $0x101] sm:$0xff] %vm3063_vm3, %v3849_v38  ;;  %v880_v7 = vmax.f32 %v816_v41, 0.0  ;;  %v1917_v49 = vrot.slane %v1903_v58, %v9229_v52  ;;  %v1918_v21 = vcombine.high %v1910_v48, %v1910_v48  ;;  %v2407_v0 = vmax.f32 %v1910_v48, %v1944_v6  ;;  %v8586_v6 = vld [vmem:[%s11130_s4 + $0x88] sm:$0xff]  }
 0x1e4   :  { %v819_v42 = vadd.f32 %v9871_v1, %v748_v24  ;;  %v1954_v43 = vcombine.high %v882_v53, %v882_v53  ;;  %v1961_v47 = vrot.slane %v882_v53, %v9229_v52  ;;  %8276 = vmatpush3.bf16.msra.mxu1 %v8586_v6  ;;  %v885_v35 = vmax.f32 %v821_v5, 0.0 }
 0x1e5   :  { %v1920_v36 = vcombine.high %v880_v7, %v880_v7  ;;  %v1927_v27 = vrot.slane %v880_v7, %v9229_v52  ;;  %v1919_v4 = vcombine.high %v1917_v49, %v1917_v49  ;;  %v2408_v12 = vmax.f32 %v1918_v21, %v1952_v37  ;;  %8277 = vmatprep.subr.bf16.mxu1 %v8587_v3  ;;  %v10052_v3 = vld [vmem:[#allocation2 + $0x12] sm:$0xff] }
 0x1e6   :  { %v2409_v30 = vmax.f32 %v1917_v49, %v1951_v20  ;;  %v7903_v28 = vrot.slane %v2407_v0, 9  ;;  %v1968_v13 = vrot.slane %v1954_v43, %v9229_v52  ;;  %v1969_v34 = vcombine.high %v1961_v47, %v1961_v47 }
 0x1e7   :  { %v1934_v33 = vrot.slane %v1920_v36, %v9229_v52  ;;  %v1935_v26 = vcombine.high %v1927_v27, %v1927_v27  ;;  %v2410_v32 = vmax.f32 %v1919_v4, %v1953_v50  ;;  %v7904_v9 = vrot.slane %v2408_v12, 9  ;;  %v8588_v50 = vld [vmem:[%s11130_s4 + $0x90] sm:$0xff]  }
 0x1e8   :  { %v7905_v45 = vrot.slane %v2409_v30, 9  ;;  %v3047_v19 = vmax.f32 %v2407_v0, %v7903_v28  ;;  %v1970_v46 = vcombine.high %v1968_v13, %v1968_v13  ;;  %v2411_v14 = vmax.f32 %v1927_v27, %v1961_v47  ;;  %8278 = vmatpush3.bf16.msra.mxu1 %v8588_v50  ;;  %v10013_v47 = vld [vmem:[#allocation2 + $0xe0] sm:$0xff]  ;;  %v8589_v28 = vld [vmem:[%s11130_s4 + $0xd8] sm:$0xff]  }
 0x1e9   :  { %v1936_v44 = vcombine.high %v1934_v33, %v1934_v33  ;;  %v2412_v8 = vmax.f32 %v1935_v26, %v1969_v34  ;;  %v7906_v15 = vrot.slane %v2410_v32, 9  ;;  %v3048_v20 = vmax.f32 %v2408_v12, %v7904_v9  ;;  %v10033_v9 = vld [vmem:[#allocation2 + $0x22] sm:$0xff]  ;;  %8279 = vmatprep.subr.bf16.mxu1 %v8589_v28 }
 0x1ea   :  { %v3049_v37 = vmax.f32 %v2409_v30, %v7905_v45  ;;  %v3684_v55 = vrot.slane %v3047_v19, %v9239_v2  ;;  %v2413_v23 = vmax.f32 %v1934_v33, %v1968_v13  ;;  %v7907_v40 = vrot.slane %v2411_v14, 9  ;;  %v10018_v30 = vld [vmem:[#allocation2 + $0xf1] sm:$0xff]  ;;  %v8591_v45 = vld [vmem:[%s11130_s4 + $0xe0] sm:$0xff]  }
 0x1eb   :  { %v2414_v11 = vmax.f32 %v1936_v44, %v1970_v46  ;;  %v7908_v22 = vrot.slane %v2412_v8, 9  ;;  %v3050_v16 = vmax.f32 %v2410_v32, %v7906_v15  ;;  %v3688_v59 = vrot.slane %v3048_v20, %v9239_v2  ;;  %v8590_v13 = vld [vmem:[%s11130_s4 + $0x98] sm:$0xff]   ;;  %v10044_v44 = vld [vmem:[#allocation2 + $0x100] sm:$0xff] }
 0x1ec   :  { %v3692_v61 = vrot.slane %v3049_v37, %v9239_v2  ;;  %v7909_v31 = vrot.slane %v2413_v23, 9  ;;  %v3051_v57 = vmax.f32 %v2411_v14, %v7907_v40  ;;  %v2005_v58 = vcombine.high %v885_v35, %v885_v35  ;;  %8280 = vmatpush3.bf16.msra.mxu1 %v8590_v13  ;;  %v8592_v15 = vld [vmem:[%s11130_s4 + $0xa0] sm:$0xff]  }
 0x1ed   :  { %v7910_v18 = vrot.slane %v2414_v11, 9  ;;  %v3052_v41 = vmax.f32 %v2412_v8, %v7908_v22  ;;  %v3696_v29 = vrot.slane %v3050_v16, %v9239_v2  ;;  %v3850_v38 = vsel %vm3745_vm5, %v3688_v59, %v3684_v55  ;;  %8281 = vmatprep.subr.bf16.mxu1 %v8591_v45 }
 0x1ee   :  { %v2012_v48 = vrot.slane %v885_v35, %v9229_v52  ;;  %v3851_v24 = vsel %vm3747_vm6, %v3692_v61, %v3850_v38  ;;  %v3053_v53 = vmax.f32 %v2413_v23, %v7909_v31  ;;  %v3700_v49 = vrot.slane %v3051_v57, %v9239_v2  ;;  %v10062_v23 = vld [vmem:[#allocation2 + $0xf0] sm:$0xff]  ;;  %v8595_v38 = vld [vmem:[%s11130_s4 + $0xa8] sm:$0xff]  }
 0x1ef   :  { %v3054_v7 = vmax.f32 %v2414_v11, %v7910_v18  ;;  %v3704_v5 = vrot.slane %v3052_v41, %v9239_v2  ;;  %v3852_v21 = vsel %vm3749_vm7, %v3696_v29, %v3851_v24  ;;  %v2019_v0 = vrot.slane %v2005_v58, %v9229_v52  ;;  %v8594_v11 = vld [vmem:[%s11130_s4 + $0xe8] sm:$0xff]  }
 0x1f0   :  { %v2020_v43 = vcombine.high %v2012_v48, %v2012_v48  ;;  %v3708_v36 = vrot.slane %v3053_v53, %v9239_v2  ;;  %v3853_v4 = vsel %vm3751_vm8, %v3700_v49, %v3852_v21  ;;  %v883_v12 = vmax.f32 %v819_v42, 0.0  ;;  %v10031_v42 = vld [vmem:[#allocation2 + $0xd0] sm:$0xff]  ;;  %8282 = vmatpush3.bf16.msra.mxu1 %v8592_v15 }
 0x1f1   :  { %v3712_v27 = vrot.slane %v3054_v7, %v9239_v2  ;;  %v3854_v34 = vsel %vm3753_vm9, %v3704_v5, %v3853_v4  ;;  %v2021_v33 = vcombine.high %v2019_v0, %v2019_v0  ;;  %v822_v26 = vadd.f32 %v9871_v1, %v9982_v51  ;;  %v10042_v51 = vld [vmem:[#allocation2 + $0xe1] sm:$0xff]  ;;  %8283 = vmatprep.subr.bf16.mxu1 %v8594_v11  ;;  %v8596_v7 = vld [vmem:[%s11130_s4 + $0xf0] sm:$0xff]  }
 0x1f2   :  { %v749_v32 = vmul.f32 %v9877_v60, %v9652_v17  ;;  %v3855_v19 = vsel %vm3755_vm10, %v3708_v36, %v3854_v34  ;;  %v1971_v10 = vcombine.high %v883_v12, %v883_v12  ;;  %v1978_v6 = vrot.slane %v883_v12, %v9229_v52  ;;  %v10085_v36 = vpop.permute.xlu1 %4060 }
 0x1f3   :  { %v4047_v46 = vpack.c.bf16 %v10013_v47, %v10031_v42  ;;  %v3856_v17 = vsel %vm3757_vm11, %v3712_v27, %v3855_v19  ;;  %v886_v60 = vmax.f32 %v822_v26, 0.0  ;;  %v10050_v8 = vpack.c.bf16 %v10018_v30, %v10042_v51  ;;  %v8597_v19 = vld [vmem:[%s11130_s4 + $0xb0] sm:$0xff]  }
 0x1f4   :  { %v820_v14 = vadd.f32 %v9871_v1, %v749_v32  ;;  %3895 = vst.msk [vmem:[#allocation2 + $0x111] sm:$0xff] %vm3063_vm3, %v3856_v17  ;;  %v1985_v20 = vrot.slane %v1971_v10, %v9229_v52  ;;  %v1986_v37 = vcombine.high %v1978_v6, %v1978_v6  ;;  %v2415_v55 = vmax.f32 %v1978_v6, %v2012_v48  ;;  %v10088_v32 = vld [vmem:[#allocation2 + $0x21] sm:$0xff] }
 0x1f5   :  { %4068 = vrot.lane.b32.xlu0 %v4047_v46, %s8908_s18  ;;  %v4138_v1 = vpack.c.bf16 %v10033_v9, %v10052_v3  ;;  %v2022_v40 = vcombine.high %v886_v60, %v886_v60  ;;  %v2029_v22 = vrot.slane %v886_v60, %v9229_v52  ;;  %3973 = vrot.lane.b32.xlu1 %v10050_v8, %s8908_s18  ;;  %v4059_v60 = vpop.permute.xlu0 %4058 }
 0x1f6   :  { %v884_v50 = vmax.f32 %v820_v14, 0.0  ;;  %v4048_v16 = vpack.c.bf16 %v10044_v44, %v10062_v23  ;;  %v1987_v59 = vcombine.high %v1985_v20, %v1985_v20  ;;  %v2416_v61 = vmax.f32 %v1986_v37, %v2020_v43  ;;  %v10083_v43 = vld [vmem:[#allocation2 + $0x31] sm:$0xff]  ;;  %8284 = vmatpush3.bf16.msra.mxu1 %v8595_v38 }
 0x1f7   :  { %v2417_v35 = vmax.f32 %v1985_v20, %v2019_v0  ;;  %v7911_v31 = vrot.slane %v2415_v55, 9  ;;  %v2036_v18 = vrot.slane %v2022_v40, %v9229_v52  ;;  %v2037_v57 = vcombine.high %v2029_v22, %v2029_v22  ;;  %8285 = vmatprep.subr.bf16.mxu1 %v8596_v7  ;;  %v8598_v14 = vld [vmem:[%s11130_s4 + $0xf8] sm:$0xff]  }
 0x1f8   :  { %v1988_v41 = vcombine.high %v884_v50, %v884_v50  ;;  %v1995_v29 = vrot.slane %v884_v50, %v9229_v52  ;;  %v2418_v58 = vmax.f32 %v1987_v59, %v2021_v33  ;;  %v7912_v48 = vrot.slane %v2416_v61, 9  ;;  %v3994_v50 = vld [vmem:[#allocation2 + $0x2] sm:$0xff]  ;;  %v10122_v7 = vld [vmem:[#allocation2 + $0x52] sm:$0xff] }
 0x1f9   :  { %v7913_v24 = vrot.slane %v2417_v35, 9  ;;  %v3055_v53 = vmax.f32 %v2415_v55, %v7911_v31  ;;  %4070 = vrot.lane.b32.xlu0 %v4048_v16, %s8908_s18  ;;  %v2038_v49 = vcombine.high %v2036_v18, %v2036_v18  ;;  %4154 = vrot.lane.b32.xlu1 %v4138_v1, %s8908_s18  ;;  %v4235_v17 = vpack.c.bf16 %v10083_v43, %v10088_v32  ;;  %v10102_v1 = vld [vmem:[#allocation2 + $0x101] sm:$0xff] }
 0x1fa   :  { %v2002_v5 = vrot.slane %v1988_v41, %v9229_v52  ;;  %v2003_v21 = vcombine.high %v1995_v29, %v1995_v29  ;;  %v2419_v0 = vmax.f32 %v1995_v29, %v2029_v22  ;;  %v7914_v27 = vrot.slane %v2418_v58, 9  ;;  %v3897_v16 = vld [vmem:[#allocation2] sm:$0xff]  ;;  %v10112_v41 = vpop.permute.xlu1 %3963  ;;  %8286 = vmatpush3.bf16.msra.mxu1 %v8597_v19  ;;  %v8599_v29 = vld [vmem:[%s11130_s4 + $0xb8] sm:$0xff]  }
 0x1fb   :  { %v3056_v4 = vmax.f32 %v2416_v61, %v7912_v48  ;;  %v3057_v12 = vmax.f32 %v2417_v35, %v7913_v24  ;;  %v3716_v28 = vrot.slane %v3055_v53, %v9239_v2  ;;  %v10090_v45 = vld [vmem:[#allocation2 + $0x111] sm:$0xff]  ;;  %8287 = vmatprep.subr.bf16.mxu1 %v8598_v14 }
 0x1fc   :  { %v2004_v13 = vcombine.high %v2002_v5, %v2002_v5  ;;  %v2420_v34 = vmax.f32 %v2003_v21, %v2037_v57  ;;  %v2421_v33 = vmax.f32 %v2002_v5, %v2036_v18  ;;  %v7915_v26 = vrot.slane %v2419_v0, 9  ;;  %v4125_v18 = vld [vmem:[#allocation2 + $0x42] sm:$0xff]  ;;  %v3898_v57 = vld [vmem:[#allocation2 + $0x10] sm:$0xff] }
 0x1fd   :  { %v3058_v10 = vmax.f32 %v2418_v58, %v7914_v27  ;;  %v3720_v6 = vrot.slane %v3056_v4, %v9239_v2  ;;  %v3724_v46 = vrot.slane %v3057_v12, %v9239_v2  ;;  %4251 = vrot.lane.b32.xlu0 %v4235_v17, %s8908_s18  ;;  %v10109_v22 = vpack.c.bf16 %v10090_v45, %v10102_v1  ;;  %v4124_v48 = vld [vmem:[#allocation2 + $0x32] sm:$0xff]  ;;  %v10127_v21 = vld [vmem:[#allocation2 + $0x82] sm:$0xff] }
 0x1fe   :  { %v2422_v15 = vmax.f32 %v2004_v13, %v2038_v49  ;;  %v7916_v20 = vrot.slane %v2420_v34, 9  ;;  %v7917_v37 = vrot.slane %v2421_v33, 9  ;;  %v3059_v55 = vmax.f32 %v2419_v0, %v7915_v26  ;;  %v10124_v49 = vld [vmem:[#allocation2 + $0x62] sm:$0xff]  ;;  %v10131_v12 = vld [vmem:[#allocation2 + $0x72] sm:$0xff]  ;;  %v3962_v13 = vpop.permute.xlu0 %3961  ;;  %8288 = vmatpush3.bf16.msra.mxu1 %v8599_v29 }
 0x1ff   :  { %v3728_v11 = vrot.slane %v3058_v10, %v9239_v2  ;;  %v3857_v40 = vsel %vm3745_vm5, %v3720_v6, %v3716_v28  ;;  %3975 = vrot.lane.b32.xlu1 %v10109_v22, %s8908_s18  ;;  %v4010_v5 = vpack.c.bf16 %v10052_v3, %v3994_v50  ;;  %v4139_v4 = vpack.c.bf16 %v4125_v18, %v4124_v48  ;;  %v3902_v26 = vld [vmem:[#allocation2 + $0x50] sm:$0xff]  ;;  %v10136_v3 = vld [vmem:[#allocation2 + $0x41] sm:$0xff] }
 0x200   :  { %v3858_v59 = vsel %vm3747_vm6, %v3724_v46, %v3857_v40  ;;  %v7918_v61 = vrot.slane %v2422_v15, 9  ;;  %v3060_v35 = vmax.f32 %v2420_v34, %v7916_v20  ;;  %v3061_v31 = vmax.f32 %v2421_v33, %v7917_v37  ;;  %v3899_v34 = vld [vmem:[#allocation2 + $0x20] sm:$0xff]  ;;  %v3900_v33 = vld [vmem:[#allocation2 + $0x30] sm:$0xff] }
 0x201   :  { %v3732_v38 = vrot.slane %v3059_v55, %v9239_v2  ;;  %v3859_v58 = vsel %vm3749_vm7, %v3728_v11, %v3858_v59  ;;  %v3913_v28 = vpack.c.bf16 %v3898_v57, %v3897_v16  ;;  %4018 = vst.msk [vmem:[#allocation3 + $0x8] sm:$0xff] %vm3063_vm3, %v4010_v5  ;;  %v10138_v6 = vld [vmem:[#allocation2 + $0xb2] sm:$0xff]  ;;  %v3905_v17 = vld [vmem:[#allocation2 + $0xa0] sm:$0xff]  ;;  %v4141_v20 = vpack.c.bf16 %v10127_v21, %v10131_v12 }
 0x202   :  { %v3062_v24 = vmax.f32 %v2422_v15, %v7918_v61  ;;  %v3736_v53 = vrot.slane %v3060_v35, %v9239_v2  ;;  %v3740_v0 = vrot.slane %v3061_v31, %v9239_v2  ;;  %v3904_v46 = vld [vmem:[#allocation2 + $0x70] sm:$0xff]  ;;  %v4140_v15 = vpack.c.bf16 %v10124_v49, %v10122_v7  ;;  %4082 = vst.msk [vmem:[#allocation3 + $0x8] sm:$0xff] %vm3985_vm12, %v4059_v60  ;;  %v10148_v37 = vld [vmem:[#allocation2 + $0x61] sm:$0xff]  ;;  %v3966_v35 = vpop.permute.xlu1 %3965 }
 0x203   :  { %v3860_v27 = vsel %vm3751_vm8, %v3732_v38, %v3859_v58  ;;  %4156 = vrot.lane.b32.xlu1 %v4139_v4, %s8908_s18  ;;  %3921 = vst.msk [vmem:[#allocation3] sm:$0xff] %vm3063_vm3, %v3913_v28  ;;  %v10150_v55 = vld [vmem:[#allocation2 + $0xd2] sm:$0xff]  ;;  %v3901_v11 = vld [vmem:[#allocation2 + $0x40] sm:$0xff]  ;;  %v4011_v60 = vpack.c.bf16 %v4124_v48, %v10033_v9  ;;  %v3914_v61 = vpack.c.bf16 %v3900_v33, %v3899_v34  ;;  %v4063_v9 = vpop.permute.xlu0 %4062 }
 0x204   :  { %v3744_v19 = vrot.slane %v3062_v24, %v9239_v2  ;;  %v3861_v10 = vsel %vm3753_vm9, %v3736_v53, %v3860_v27  ;;  %v4002_v40 = vld [vmem:[#allocation2 + $0xa2] sm:$0xff]  ;;  %v10153_v16 = vld [vmem:[#allocation2 + $0x110] sm:$0xff]  ;;  %3986 = vst.msk [vmem:[#allocation3] sm:$0xff] %vm3985_vm12, %v3962_v13  ;;  %v3915_v31 = vpack.c.bf16 %v3902_v26, %v3901_v11  ;;  %v4013_v27 = vpack.c.bf16 %v10131_v12, %v10124_v49 }
 0x205   :  { %v3862_v14 = vsel %vm3755_vm10, %v3740_v0, %v3861_v10  ;;  %v10156_v59 = vld [vmem:[#allocation2 + $0xf2] sm:$0xff]  ;;  %v3903_v57 = vld [vmem:[#allocation2 + $0x60] sm:$0xff]  ;;  %v4012_v0 = vpack.c.bf16 %v10122_v7, %v4125_v18  ;;  %v3917_v4 = vpack.c.bf16 %v9913_v54, %v3905_v17  ;;  %4019 = vst.msk [vmem:[#allocation3 + $0x30] sm:$0xff] %vm3063_vm3, %v4011_v60  ;;  %3922 = vst.msk [vmem:[#allocation3 + $0x28] sm:$0xff] %vm3063_vm3, %v3914_v61 }
 0x206   :  { %v3863_v50 = vsel %vm3757_vm11, %v3744_v19, %v3862_v14  ;;  %v4090_v29 = vld [vmem:[#allocation2 + $0x11] sm:$0xff]  ;;  %v10162_v58 = vld [vmem:[#allocation2 + $0xc2] sm:$0xff]  ;;  %v3916_v48 = vpack.c.bf16 %v3904_v46, %v3903_v57  ;;  %3923 = vst.msk [vmem:[#allocation3 + $0x50] sm:$0xff] %vm3063_vm3, %v3915_v31  ;;  %v4014_v13 = vpack.c.bf16 %v10138_v6, %v4002_v40  ;;  %v3918_v18 = vpack.c.bf16 %v10031_v42, %v9904_v63 }
 0x207   :  { %3896 = vst.msk [vmem:[#allocation2 + $0x121] sm:$0xff] %vm3063_vm3, %v3863_v50  ;;  %v10160_v38 = vld [vmem:[#allocation2 + $0x51] sm:$0xff]  ;;  %v10166_v53 = vld [vmem:[#allocation2 + $0x81] sm:$0xff]  ;;  %v4015_v7 = vpack.c.bf16 %v10150_v55, %v10162_v58  ;;  %v3919_v49 = vpack.c.bf16 %v10062_v23, %v10013_v47  ;;  %4211 = vst.msk [vmem:[#allocation3 + $0x18] sm:$0xff] %vm3063_vm3, %v3914_v61  ;;  %4158 = vrot.lane.b32.xlu1 %v4140_v15, %s8908_s18  ;;  %v4106_v63 = vpack.c.bf16 %v10088_v32, %v4090_v29 }
 0x208   :  { %v10164_v24 = vld [vmem:[#allocation2 + $0x71] sm:$0xff]  ;;  %v10174_v28 = vld [vmem:[#allocation2 + $0xe2] sm:$0xff]  ;;  %4212 = vst.msk [vmem:[#allocation3 + $0x40] sm:$0xff] %vm3063_vm3, %v3915_v31  ;;  %4307 = vst.msk [vmem:[#allocation3 + $0x20] sm:$0xff] %vm3063_vm3, %v4011_v60  ;;  %v3920_v23 = vpack.c.bf16 %v10153_v16, %v10044_v44  ;;  %v4108_v44 = vpack.c.bf16 %v10148_v37, %v10160_v38  ;;  %v4111_v46 = vpack.c.bf16 %v10042_v51, %v9949_v62 }
 0x209   :  { %v10168_v5 = vld [vmem:[#allocation2 + $0x112] sm:$0xff]  ;;  %v4193_v54 = vld [vmem:[#allocation2 + $0x80] sm:$0xff]  ;;  %4083 = vst.msk [vmem:[#allocation3 + $0x30] sm:$0xff] %vm3985_vm12, %v10085_v36  ;;  %3987 = vst.msk [vmem:[#allocation3 + $0x28] sm:$0xff] %vm3985_vm12, %v10112_v41  ;;  %v4016_v47 = vpack.c.bf16 %v10156_v59, %v10174_v28  ;;  %v4107_v36 = vpack.c.bf16 %v10136_v3, %v10083_v43  ;;  %v4109_v32 = vpack.c.bf16 %v10166_v53, %v10164_v24 }
 0x20a   :  { %v4194_v34 = vld [vmem:[#allocation2 + $0x90] sm:$0xff]  ;;  %v10190_v33 = vld [vmem:[#allocation2 + $0x102] sm:$0xff]  ;;  %3988 = vst.msk [vmem:[#allocation3 + $0x50] sm:$0xff] %vm3985_vm12, %v3966_v35  ;;  %v4142_v12 = vpack.c.bf16 %v10162_v58, %v10138_v6  ;;  %v8600_v29 = vld [vmem:[%s11130_s4 + $0x118] sm:$0xff]   ;;  %v4237_v58 = vpack.c.bf16 %v10164_v24, %v10148_v37 }
 0x20b   :  { %4020 = vst.msk [vmem:[#allocation3 + $0x58] sm:$0xff] %vm3063_vm3, %v4012_v0  ;;  %3924 = vst.msk [vmem:[#allocation3 + $0x78] sm:$0xff] %vm3063_vm3, %v3916_v48  ;;  %v4098_v41 = vld [vmem:[#allocation2 + $0xb1] sm:$0xff]  ;;  %v4017_v43 = vpack.c.bf16 %v10168_v5, %v10190_v33  ;;  %v4195_v10 = vld [vmem:[#allocation2 + $0xc0] sm:$0xff]  ;;  %v4206_v17 = vpack.c.bf16 %v4194_v34, %v4193_v54  ;;  %v3968_v11 = vpop.permute.xlu1 %3967  ;;  %4160 = vrot.lane.b32.xlu1 %v4141_v20, %s8908_s18 }
 0x20c   :  { %4021 = vst.msk [vmem:[#allocation3 + $0x80] sm:$0xff] %vm3063_vm3, %v4013_v27  ;;  %3925 = vst.msk [vmem:[#allocation3 + $0xa0] sm:$0xff] %vm3063_vm3, %v3917_v4  ;;  %v4290_v26 = vld [vmem:[#allocation2 + $0x92] sm:$0xff]  ;;  %v4110_v19 = vpack.c.bf16 %v9959_v39, %v4098_v41  ;;  %v4112_v39 = vpack.c.bf16 %v10102_v1, %v10018_v30  ;;  %v4207_v14 = vpack.c.bf16 %v10031_v42, %v4195_v10  ;;  %v4316_v15 = vld [vmem:[#allocation3 + $0x8] sm:$0xff] }
 0x20d   :  { %4213 = vst.msk [vmem:[#allocation3 + $0x68] sm:$0xff] %vm3063_vm3, %v3916_v48  ;;  %4308 = vst.msk [vmem:[#allocation3 + $0x48] sm:$0xff] %vm3063_vm3, %v4012_v0  ;;  %v8584_v40 = vld [vmem:[%s11130_s4 + $0x108] sm:$0xff]   ;;  %v4302_v62 = vpack.c.bf16 %v4290_v26, %v10127_v21  ;;  %4699 = vmatprep.mubr.bf16.mxu0 %v4316_v15  ;;  %v4315_v30 = vld [vmem:[#allocation3] sm:$0xff] }
 0x20e   :  { %4309 = vst.msk [vmem:[#allocation3 + $0x70] sm:$0xff] %vm3063_vm3, %v4013_v27  ;;  %4022 = vst.msk [vmem:[#allocation3 + $0xa8] sm:$0xff] %vm3063_vm3, %v4014_v13  ;;  %v4202_v42 = vld [vmem:[#allocation2 + $0x130] sm:$0xff]  ;;  %v4041_v1 = vld [vmem:[#allocation2 + $0x120] sm:$0xff]  ;;  %4700 = vmatmul.mubr.bf16.vlgmr.msra.gmra.mrb[64].mxu0 %v4315_v30 }
 0x20f   :  { %4084 = vst.msk [vmem:[#allocation3 + $0x58] sm:$0xff] %vm3985_vm12, %v4063_v9  ;;  %3989 = vst.msk [vmem:[#allocation3 + $0x78] sm:$0xff] %vm3985_vm12, %v3968_v11  ;;  %v4298_v51 = vld [vmem:[#allocation2 + $0x132] sm:$0xff]  ;;  %v4137_v50 = vld [vmem:[#allocation2 + $0x122] sm:$0xff]  ;;  %v4049_v21 = vpack.c.bf16 %v4041_v1, %v10153_v16  ;;  %8449 = vmatpush3.bf16.msra.mxu0 %v9890_v56  ;;  %v4210_v31 = vpack.c.bf16 %v4202_v42, %v4041_v1  ;;  %4162 = vrot.lane.b32.xlu1 %v4142_v12, %s8908_s18 }
 0x210   :  { %3926 = vst.msk [vmem:[#allocation3 + $0xc8] sm:$0xff] %vm3063_vm3, %v3918_v18  ;;  %4023 = vst.msk [vmem:[#allocation3 + $0xd0] sm:$0xff] %vm3063_vm3, %v4015_v7  ;;  %v4233_v60 = vld [vmem:[#allocation2 + $0x121] sm:$0xff]  ;;  %v4321_v61 = vld [vmem:[#allocation3 + $0x30] sm:$0xff]  ;;  %8450 = vmatprep.subr.bf16.mxu0 %v8584_v40  ;;  %v4306_v57 = vpack.c.bf16 %v4298_v51, %v4137_v50  ;;  %v4236_v56 = vpack.c.bf16 %v10160_v38, %v10136_v3  ;;  %v4144_v3 = vpack.c.bf16 %v10190_v33, %v10156_v59 }
 0x211   :  { %3927 = vst.msk [vmem:[#allocation3 + $0xf0] sm:$0xff] %vm3063_vm3, %v3919_v49  ;;  %4216 = vst.msk [vmem:[#allocation3 + $0xe0] sm:$0xff] %vm3063_vm3, %v3919_v49  ;;  %v4113_v20 = vpack.c.bf16 %v4233_v60, %v10090_v45  ;;  %v8593_v35 = vld [vmem:[%s11130_s4 + $0x110] sm:$0xff]   ;;  %4072 = vrot.lane.b32.xlu0 %v4049_v21, %s8908_s18  ;;  %4707 = vmatprep.mubr.bf16.mxu0 %v4321_v61  ;;  %v4143_v45 = vpack.c.bf16 %v10174_v28, %v10150_v55  ;;  %v4320_v6 = vld [vmem:[#allocation3 + $0x28] sm:$0xff] }
 0x212   :  { %4311 = vst.msk [vmem:[#allocation3 + $0xc0] sm:$0xff] %vm3063_vm3, %v4015_v7  ;;  %4114 = vst.msk [vmem:[#allocation3 + $0x10] sm:$0xff] %vm3063_vm3, %v4106_v63  ;;  %v4226_v55 = vld [vmem:[#allocation2 + $0x91] sm:$0xff]  ;;  %v4145_v0 = vpack.c.bf16 %v4137_v50, %v10168_v5 }
 0x213   :  { %4024 = vst.msk [vmem:[#allocation3 + $0xf8] sm:$0xff] %vm3063_vm3, %v4016_v47  ;;  %3928 = vst.msk [vmem:[#allocation3 + $0x118] sm:$0xff] %vm3063_vm3, %v3920_v23  ;;  %8451 = vmatpush3.bf16.msra.mxu0 %v8584_v40  ;;  %4164 = vrot.lane.b32.xlu1 %v4143_v45, %s8908_s18  ;;  %v4238_v38 = vpack.c.bf16 %v4226_v55, %v10166_v53  ;;  %v4325_v37 = vld [vmem:[#allocation3 + $0x50] sm:$0xff] }
 0x214   :  { %4115 = vst.msk [vmem:[#allocation3 + $0x38] sm:$0xff] %vm3063_vm3, %v4107_v36  ;;  %4217 = vst.msk [vmem:[#allocation3 + $0x108] sm:$0xff] %vm3063_vm3, %v3920_v23  ;;  %8452 = vmatprep.subr.bf16.mxu0 %v8593_v35  ;;  %v4234_v53 = vld [vmem:[#allocation2 + $0x131] sm:$0xff]  ;;  %v4324_v51 = vld [vmem:[#allocation3 + $0x48] sm:$0xff] }
 0x215   :  { %4312 = vst.msk [vmem:[#allocation3 + $0xe8] sm:$0xff] %vm3063_vm3, %v4016_v47  ;;  %4116 = vst.msk [vmem:[#allocation3 + $0x60] sm:$0xff] %vm3063_vm3, %v4108_v44  ;;  %4253 = vrot.lane.b32.xlu0 %v4236_v56, %s8908_s18  ;;  %v4242_v9 = vpack.c.bf16 %v4234_v53, %v4233_v60  ;;  %v4329_v1 = vld [vmem:[#allocation3 + $0x70] sm:$0xff] }
 0x216   :  { %4025 = vst.msk [vmem:[#allocation3 + $0x120] sm:$0xff] %vm3063_vm3, %v4017_v43  ;;  %4117 = vst.msk [vmem:[#allocation3 + $0x88] sm:$0xff] %vm3063_vm3, %v4109_v32  ;;  %v4326_v16 = vld [vmem:[#allocation3 + $0x58] sm:$0xff]  ;;  %4708 = vmatmul.mubr.bf16.gmra.mrb[68].mxu0 %v4320_v6 }
 0x217   :  { %4118 = vst.msk [vmem:[#allocation3 + $0xb0] sm:$0xff] %vm3063_vm3, %v4110_v19  ;;  %4313 = vst.msk [vmem:[#allocation3 + $0x110] sm:$0xff] %vm3063_vm3, %v4017_v43  ;;  %4715 = vmatprep.mubr.bf16.mxu0 %v4326_v16  ;;  %8453 = vmatpush3.bf16.msra.mxu0 %v8593_v35  ;;  %v4330_v5 = vld [vmem:[#allocation3 + $0x78] sm:$0xff] }
 0x218   :  { %4119 = vst.msk [vmem:[#allocation3 + $0xd8] sm:$0xff] %vm3063_vm3, %v4111_v46  ;;  %4214 = vst.msk [vmem:[#allocation3 + $0x90] sm:$0xff] %vm3063_vm3, %v4206_v17  ;;  %8454 = vmatprep.subr.bf16.mxu0 %v8600_v29  ;;  %4166 = vrot.lane.b32.xlu1 %v4144_v3, %s8908_s18  ;;  %v8604_v53 = vld [vmem:[%s11133_s7 + $0x10] ss:$8 sps:$4 sm:$0xff]  }
 0x219   :  { %4120 = vst.msk [vmem:[#allocation3 + $0x100] sm:$0xff] %vm3063_vm3, %v4112_v39  ;;  %4215 = vst.msk [vmem:[#allocation3 + $0xb8] sm:$0xff] %vm3063_vm3, %v4207_v14  ;;  %4255 = vrot.lane.b32.xlu0 %v4237_v58, %s8908_s18  ;;  %v4319_v14 = vld [vmem:[#allocation3 + $0x20] sm:$0xff] }
 0x21a   :  { %4310 = vst.msk [vmem:[#allocation3 + $0x98] sm:$0xff] %vm3063_vm3, %v4302_v62  ;;  %4121 = vst.msk [vmem:[#allocation3 + $0x128] sm:$0xff] %vm3063_vm3, %v4113_v20  ;;  %v4339_v61 = vld [vmem:[#allocation3 + $0xc0] sm:$0xff] }
 0x21b   :  { %4218 = vst.msk [vmem:[#allocation3 + $0x130] sm:$0xff] %vm3063_vm3, %v4210_v31  ;;  %4314 = vst.msk [vmem:[#allocation3 + $0x138] sm:$0xff] %vm3063_vm3, %v4306_v57  ;;  %8455 = vmatpush3.bf16.msra.mxu0 %v8600_v29 }
 0x21c   :  { %4168 = vrot.lane.b32.xlu1 %v4145_v0, %s8908_s18  ;;  %v4344_v56 = vld [vmem:[#allocation3 + $0xe8] sm:$0xff] }
 0x21d   :  { %4257 = vrot.lane.b32.xlu0 %v4238_v38, %s8908_s18 }
 0x21e   :  { %4716 = vmatmul.mubr.bf16.gmra.mrb[72].mxu0 %v4325_v37  ;;  %v4349_v45 = vld [vmem:[#allocation3 + $0x110] sm:$0xff]  ;;  %v8601_v37 = vld [vmem:[%s11133_s7] ss:$8 sps:$4 sm:$0xff]  }
 0x21f   :  { %v4065_v59 = vpop.permute.xlu0 %4064 }
 0x220   :  { %4085 = vst.msk [vmem:[#allocation3 + $0x80] sm:$0xff] %vm3985_vm12, %v4065_v59  ;;  %v8603_v59 = vld [vmem:[%s11133_s7 + $0x4] ss:$8 sps:$4 sm:$0xff]  }
 0x221   :  { %4259 = vrot.lane.b32.xlu0 %v9965_v25, %s8908_s18  ;;  %v4334_v20 = vld [vmem:[#allocation3 + $0x98] sm:$0xff]  ;;  %6912 = vmatprep.subr.bf16.mxu1 %v8603_v59 }
 0x222   :  { %v4354_v29 = vld [vmem:[#allocation3 + $0x138] sm:$0xff] }
 0x223   :  { %v8654_v59 = vld [vmem:[%s11133_s7 + $0x434] ss:$8 sps:$4 sm:$0xff]  }
 0x225   :  { %4261 = vrot.lane.b32.xlu0 %v10050_v8, %s8908_s18 }
 0x227   :  { %v4331_v24 = vld [vmem:[#allocation3 + $0x80] sm:$0xff] }
 0x228   :  { %4723 = vmatprep.mubr.bf16.mxu0 %v4331_v24  ;;  %v8606_v24 = vld [vmem:[%s11133_s7 + $0x14] ss:$8 sps:$4 sm:$0xff]  }
 0x229   :  { %4263 = vrot.lane.b32.xlu0 %v10109_v22, %s8908_s18  ;;  %4724 = vmatmul.mubr.bf16.gmra.mrb[76].mxu0 %v4330_v5  ;;  %v8609_v5 = vld [vmem:[%s11133_s7 + $0x24] ss:$8 sps:$4 sm:$0xff]  }
 0x22d   :  { %4265 = vrot.lane.b32.xlu0 %v4242_v9, %s8908_s18  ;;  %v8607_v9 = vld [vmem:[%s11133_s7 + $0x20] ss:$8 sps:$4 sm:$0xff]  }
 0x22f   :  { %v3970_v48 = vpop.permute.xlu1 %3969 }
 0x230   :  { %3990 = vst.msk [vmem:[#allocation3 + $0xa0] sm:$0xff] %vm3985_vm12, %v3970_v48 }
 0x237   :  { %v4335_v8 = vld [vmem:[#allocation3 + $0xa0] sm:$0xff] }
 0x242   :  { %v4067_v27 = vpop.permute.xlu0 %4066 }
 0x243   :  { %4086 = vst.msk [vmem:[#allocation3 + $0xa8] sm:$0xff] %vm3985_vm12, %v4067_v27 }
 0x24a   :  { %v4336_v25 = vld [vmem:[#allocation3 + $0xa8] sm:$0xff] }
 0x24b   :  { %4731 = vmatprep.mubr.bf16.mxu0 %v4336_v25 }
 0x24c   :  { %4732 = vmatmul.mubr.bf16.gmra.mrb[80].mxu0 %v4335_v8 }
 0x253   :  { %v3972_v4 = vpop.permute.xlu1 %3971 }
 0x254   :  { %3991 = vst.msk [vmem:[#allocation3 + $0xc8] sm:$0xff] %vm3985_vm12, %v3972_v4 }
 0x25b   :  { %v4340_v49 = vld [vmem:[#allocation3 + $0xc8] sm:$0xff] }
 0x267   :  { %v4069_v28 = vpop.permute.xlu0 %4068  ;;  %v3974_v22 = vpop.permute.xlu1 %3973 }
 0x268   :  { %4087 = vst.msk [vmem:[#allocation3 + $0xd0] sm:$0xff] %vm3985_vm12, %v4069_v28  ;;  %3992 = vst.msk [vmem:[#allocation3 + $0xf0] sm:$0xff] %vm3985_vm12, %v3974_v22  ;;  %v8610_v28 = vld [vmem:[%s11133_s7 + $0x30] ss:$8 sps:$4 sm:$0xff]   ;;  %v8612_v22 = vld [vmem:[%s11133_s7 + $0x34] ss:$8 sps:$4 sm:$0xff]  }
 0x26b   :  { %v4071_v13 = vpop.permute.xlu0 %4070  ;;  %v4155_v18 = vpop.permute.xlu1 %4154 }
 0x26c   :  { %4088 = vst.msk [vmem:[#allocation3 + $0xf8] sm:$0xff] %vm3985_vm12, %v4071_v13  ;;  %4178 = vst.msk [vmem:[#allocation3 + $0x10] sm:$0xff] %vm3985_vm12, %v4155_v18  ;;  %v8613_v18 = vld [vmem:[%s11133_s7 + $0x40] ss:$8 sps:$4 sm:$0xff]  }
 0x26f   :  { %v4341_v7 = vld [vmem:[#allocation3 + $0xd0] sm:$0xff]  ;;  %v4252_v54 = vpop.permute.xlu0 %4251 }
 0x270   :  { %4739 = vmatprep.mubr.bf16.mxu0 %v4341_v7  ;;  %4275 = vst.msk [vmem:[#allocation3 + $0x18] sm:$0xff] %vm3985_vm12, %v4252_v54  ;;  %v4345_v47 = vld [vmem:[#allocation3 + $0xf0] sm:$0xff]  ;;  %v8615_v7 = vld [vmem:[%s11133_s7 + $0x44] ss:$8 sps:$4 sm:$0xff]  }
 0x271   :  { %4740 = vmatmul.mubr.bf16.gmra.mrb[84].mxu0 %v4340_v49  ;;  %v3976_v34 = vpop.permute.xlu1 %3975 }
 0x272   :  { %3993 = vst.msk [vmem:[#allocation3 + $0x118] sm:$0xff] %vm3985_vm12, %v3976_v34 }
 0x273   :  { %v4346_v33 = vld [vmem:[#allocation3 + $0xf8] sm:$0xff]  ;;  %v4317_v36 = vld [vmem:[#allocation3 + $0x10] sm:$0xff] }
 0x274   :  { %4747 = vmatprep.mubr.bf16.mxu0 %v4346_v33 }
 0x275   :  { %v4157_v63 = vpop.permute.xlu1 %4156 }
 0x276   :  { %4179 = vst.msk [vmem:[#allocation3 + $0x38] sm:$0xff] %vm3985_vm12, %v4157_v63 }
 0x277   :  { %v4318_v23 = vld [vmem:[#allocation3 + $0x18] sm:$0xff] }
 0x278   :  { %4796 = vmatprep.mubr.bf16.mxu1 %v4318_v23 }
 0x279   :  { %4748 = vmatmul.mubr.bf16.gmra.mrb[88].mxu0 %v4345_v47  ;;  %4797 = vmatmul.mubr.bf16.vlgmr.msra.gmra.mrb[0].mxu1 %v4317_v36  ;;  %v4159_v41 = vpop.permute.xlu1 %4158  ;;  %v4350_v39 = vld [vmem:[#allocation3 + $0x118] sm:$0xff] }
 0x27a   :  { %4180 = vst.msk [vmem:[#allocation3 + $0x60] sm:$0xff] %vm3985_vm12, %v4159_v41  ;;  %6913 = vmatpush1.bf16.msra.mxu1 %v8601_v37  ;;  %v8651_v37 = vld [vmem:[%s11133_s7 + $0xd4] ss:$8 sps:$4 sm:$0xff]  }
 0x27b   :  { %6914 = vmatprep.subr.bf16.mxu1 %v8606_v24  ;;  %v8649_v24 = vld [vmem:[%s11133_s7 + $0xd0] ss:$8 sps:$4 sm:$0xff]  }
 0x27d   :  { %v4161_v26 = vpop.permute.xlu1 %4160  ;;  %v4322_v62 = vld [vmem:[#allocation3 + $0x38] sm:$0xff] }
 0x27e   :  { %4181 = vst.msk [vmem:[#allocation3 + $0x88] sm:$0xff] %vm3985_vm12, %v4161_v26  ;;  %6915 = vmatpush1.bf16.msra.mxu1 %v8604_v53  ;;  %v8652_v53 = vld [vmem:[%s11133_s7 + $0x430] ss:$8 sps:$4 sm:$0xff]  }
 0x27f   :  { %6916 = vmatprep.subr.bf16.mxu1 %v8609_v5  ;;  %v8657_v5 = vld [vmem:[%s11133_s7 + $0xe4] ss:$8 sps:$4 sm:$0xff]  }
 0x281   :  { %v4163_v43 = vpop.permute.xlu1 %4162  ;;  %v4327_v60 = vld [vmem:[#allocation3 + $0x60] sm:$0xff] }
 0x282   :  { %4182 = vst.msk [vmem:[#allocation3 + $0xb0] sm:$0xff] %vm3985_vm12, %v4163_v43  ;;  %6917 = vmatpush1.bf16.msra.mxu1 %v8607_v9  ;;  %v8660_v9 = vld [vmem:[%s11133_s7 + $0x444] ss:$8 sps:$4 sm:$0xff]  }
 0x283   :  { %v4073_v44 = vpop.permute.xlu0 %4072  ;;  %6918 = vmatprep.subr.bf16.mxu1 %v8612_v22  ;;  %v8664_v22 = vld [vmem:[%s11133_s7 + $0x450] ss:$8 sps:$4 sm:$0xff]  }
 0x284   :  { %4089 = vst.msk [vmem:[#allocation3 + $0x120] sm:$0xff] %vm3985_vm12, %v4073_v44 }
 0x285   :  { %v4165_v19 = vpop.permute.xlu1 %4164  ;;  %v4332_v31 = vld [vmem:[#allocation3 + $0x88] sm:$0xff] }
 0x286   :  { %4183 = vst.msk [vmem:[#allocation3 + $0xd8] sm:$0xff] %vm3985_vm12, %v4165_v19  ;;  %6919 = vmatpush1.bf16.msra.mxu1 %v8610_v28  ;;  %v8661_v28 = vld [vmem:[%s11133_s7 + $0xf0] ss:$8 sps:$4 sm:$0xff]  }
 0x287   :  { %v4254_v32 = vpop.permute.xlu0 %4253  ;;  %6920 = vmatprep.subr.bf16.mxu1 %v8615_v7 }
 0x288   :  { %4276 = vst.msk [vmem:[#allocation3 + $0x40] sm:$0xff] %vm3985_vm12, %v4254_v32 }
 0x289   :  { %v4337_v6 = vld [vmem:[#allocation3 + $0xb0] sm:$0xff] }
 0x28a   :  { %v4167_v17 = vpop.permute.xlu1 %4166  ;;  %6921 = vmatpush1.bf16.msra.mxu1 %v8613_v18 }
 0x28b   :  { %v4256_v10 = vpop.permute.xlu0 %4255  ;;  %v4351_v46 = vld [vmem:[#allocation3 + $0x120] sm:$0xff]  ;;  %4184 = vst.msk [vmem:[#allocation3 + $0x100] sm:$0xff] %vm3985_vm12, %v4167_v17 }
 0x28c   :  { %4277 = vst.msk [vmem:[#allocation3 + $0x68] sm:$0xff] %vm3985_vm12, %v4256_v10  ;;  %4755 = vmatprep.mubr.bf16.mxu0 %v4351_v46 }
 0x28d   :  { %4756 = vmatmul.mubr.bf16.gmra.mrb[92].mxu0 %v4350_v39  ;;  %v4342_v58 = vld [vmem:[#allocation3 + $0xd8] sm:$0xff] }
 0x28e   :  { %8456 = vmatprep.mubr.msk.bf16.mxu0 %vm3063_vm3, %v4319_v14  ;;  %v4169_v40 = vpop.permute.xlu1 %4168  ;;  %v8616_v14 = vld [vmem:[%s11133_s7 + $0x50] ss:$8 sps:$4 sm:$0xff]  }
 0x28f   :  { %v4258_v15 = vpop.permute.xlu0 %4257  ;;  %v4323_v11 = vld [vmem:[#allocation3 + $0x40] sm:$0xff]  ;;  %4185 = vst.msk [vmem:[#allocation3 + $0x128] sm:$0xff] %vm3985_vm12, %v4169_v40 }
 0x290   :  { %4278 = vst.msk [vmem:[#allocation3 + $0x90] sm:$0xff] %vm3985_vm12, %v4258_v15  ;;  %4804 = vmatprep.mubr.bf16.mxu1 %v4323_v11  ;;  %v8618_v15 = vld [vmem:[%s11133_s7 + $0x54] ss:$8 sps:$4 sm:$0xff]   ;;  %v8621_v11 = vld [vmem:[%s11133_s7 + $0x64] ss:$8 sps:$4 sm:$0xff]  }
 0x291   :  { %4805 = vmatmul.mubr.bf16.gmra.mrb[4].mxu1 %v4322_v62  ;;  %6922 = vmatprep.subr.bf16.mxu1 %v8618_v15  ;;  %v8619_v40 = vld [vmem:[%s11133_s7 + $0x60] ss:$8 sps:$4 sm:$0xff]   ;;  %v8622_v62 = vld [vmem:[%s11133_s7 + $0x70] ss:$8 sps:$4 sm:$0xff]  }
 0x292   :  { %v4347_v55 = vld [vmem:[#allocation3 + $0x100] sm:$0xff]  ;;  %6923 = vmatpush1.bf16.msra.mxu1 %v8616_v14 }
 0x293   :  { %v4260_v30 = vpop.permute.xlu0 %4259  ;;  %v4328_v42 = vld [vmem:[#allocation3 + $0x68] sm:$0xff]  ;;  %6924 = vmatprep.subr.bf16.mxu1 %v8621_v11 }
 0x294   :  { %4279 = vst.msk [vmem:[#allocation3 + $0xb8] sm:$0xff] %vm3985_vm12, %v4260_v30  ;;  %4812 = vmatprep.mubr.bf16.mxu1 %v4328_v42  ;;  %v8624_v30 = vld [vmem:[%s11133_s7 + $0x74] ss:$8 sps:$4 sm:$0xff]  }
 0x295   :  { %8457 = vmatmul.mubr.msk.bf16.vlgmr.msra.gmra.mrb[96].mxu0 %vm3063_vm3, %v4324_v51 }
 0x296   :  { %8460 = vmatprep.mubr.msk.bf16.mxu0 %vm3063_vm3, %v4329_v1  ;;  %v4352_v0 = vld [vmem:[#allocation3 + $0x128] sm:$0xff]  ;;  %6925 = vmatpush1.bf16.msra.mxu1 %v8619_v40 }
 0x297   :  { %v4262_v50 = vpop.permute.xlu0 %4261  ;;  %v4333_v21 = vld [vmem:[#allocation3 + $0x90] sm:$0xff]  ;;  %6926 = vmatprep.subr.bf16.mxu1 %v8624_v30  ;;  %v8625_v1 = vld [vmem:[%s11133_s7 + $0x80] ss:$8 sps:$4 sm:$0xff]  }
 0x298   :  { %4280 = vst.msk [vmem:[#allocation3 + $0xe0] sm:$0xff] %vm3985_vm12, %v4262_v50  ;;  %v8627_v50 = vld [vmem:[%s11133_s7 + $0x84] ss:$8 sps:$4 sm:$0xff]  }
 0x299   :  { %4813 = vmatmul.mubr.bf16.gmra.mrb[8].mxu1 %v4327_v60 }
 0x29a   :  { %4820 = vmatprep.mubr.bf16.mxu1 %v4333_v21  ;;  %6927 = vmatpush1.bf16.msra.mxu1 %v8622_v62 }
 0x29b   :  { %v4264_v12 = vpop.permute.xlu0 %4263  ;;  %v4338_v57 = vld [vmem:[#allocation3 + $0xb8] sm:$0xff]  ;;  %6928 = vmatprep.subr.bf16.mxu1 %v8627_v50 }
 0x29c   :  { %4281 = vst.msk [vmem:[#allocation3 + $0x108] sm:$0xff] %vm3985_vm12, %v4264_v12  ;;  %v8630_v12 = vld [vmem:[%s11133_s7 + $0x94] ss:$8 sps:$4 sm:$0xff]  }
 0x29d   :  { %8461 = vmatmul.mubr.msk.bf16.gmra.mrb[100].mxu0 %vm3063_vm3, %v4334_v20 }
 0x29e   :  { %8464 = vmatprep.mubr.msk.bf16.mxu0 %vm3063_vm3, %v4339_v61  ;;  %6929 = vmatpush1.bf16.msra.mxu1 %v8625_v1 }
 0x29f   :  { %v4266_v35 = vpop.permute.xlu0 %4265  ;;  %v4343_v16 = vld [vmem:[#allocation3 + $0xe0] sm:$0xff]  ;;  %6930 = vmatprep.subr.bf16.mxu1 %v8630_v12 }
 0x2a0   :  { %4282 = vst.msk [vmem:[#allocation3 + $0x130] sm:$0xff] %vm3985_vm12, %v4266_v35  ;;  %v8628_v35 = vld [vmem:[%s11133_s7 + $0x90] ss:$8 sps:$4 sm:$0xff]  }
 0x2a1   :  { %4821 = vmatmul.mubr.bf16.gmra.mrb[12].mxu1 %v4332_v31  ;;  %v8634_v31 = vld [vmem:[%s11133_s7 + $0x400] ss:$8 sps:$4 sm:$0xff]  }
 0x2a2   :  { %4828 = vmatprep.mubr.bf16.mxu1 %v4338_v57  ;;  %v8633_v57 = vld [vmem:[%s11133_s7 + $0xa4] ss:$8 sps:$4 sm:$0xff]   ;;  %6931 = vmatpush1.bf16.msra.mxu1 %v8628_v35 }
 0x2a3   :  { %v4348_v3 = vld [vmem:[#allocation3 + $0x108] sm:$0xff]  ;;  %6932 = vmatprep.subr.bf16.mxu1 %v8633_v57 }
 0x2a5   :  { %8465 = vmatmul.mubr.msk.bf16.gmra.mrb[104].mxu0 %vm3063_vm3, %v4344_v56  ;;  %v8636_v56 = vld [vmem:[%s11133_s7 + $0x404] ss:$8 sps:$4 sm:$0xff]  }
 0x2a6   :  { %8468 = vmatprep.mubr.msk.bf16.mxu0 %vm3063_vm3, %v4349_v45  ;;  %v8642_v45 = vld [vmem:[%s11133_s7 + $0x414] ss:$8 sps:$4 sm:$0xff]   ;;  %7124 = vmatprep.subr.bf16.mxu0 %v8636_v56 }
 0x2a7   :  { %v4353_v38 = vld [vmem:[#allocation3 + $0x130] sm:$0xff]  ;;  %7125 = vmatpush1.bf16.msra.mxu0 %v8634_v31 }
 0x2a8   :  { %7126 = vmatprep.subr.bf16.mxu0 %v8642_v45 }
 0x2a9   :  { %4829 = vmatmul.mubr.bf16.gmra.mrb[16].mxu1 %v4337_v6  ;;  %v8631_v6 = vld [vmem:[%s11133_s7 + $0xa0] ss:$8 sps:$4 sm:$0xff]  }
 0x2aa   :  { %4836 = vmatprep.mubr.bf16.mxu1 %v4343_v16  ;;  %v8640_v16 = vld [vmem:[%s11133_s7 + $0x410] ss:$8 sps:$4 sm:$0xff]   ;;  %6933 = vmatpush1.bf16.msra.mxu1 %v8631_v6 }
 0x2ab   :  { %7127 = vmatpush1.bf16.msra.mxu0 %v8640_v16 }
 0x2ad   :  { %8469 = vmatmul.mubr.msk.bf16.gmra.mrb[108].mxu0 %vm3063_vm3, %v4354_v29  ;;  %v8639_v29 = vld [vmem:[%s11133_s7 + $0xb4] ss:$8 sps:$4 sm:$0xff]  }
 0x2ae   :  { %6934 = vmatprep.subr.bf16.mxu1 %v8639_v29 }
 0x2b1   :  { %4837 = vmatmul.mubr.bf16.gmra.mrb[20].mxu1 %v4342_v58  ;;  %v8637_v58 = vld [vmem:[%s11133_s7 + $0xb0] ss:$8 sps:$4 sm:$0xff]  }
 0x2b2   :  { %4844 = vmatprep.mubr.bf16.mxu1 %v4348_v3  ;;  %6935 = vmatpush1.bf16.msra.mxu1 %v8637_v58  ;;  %v8643_v3 = vld [vmem:[%s11133_s7 + $0xc0] ss:$8 sps:$4 sm:$0xff]  }
 0x2b9   :  { %4845 = vmatmul.mubr.bf16.gmra.mrb[24].mxu1 %v4347_v55  ;;  %v8645_v55 = vld [vmem:[%s11133_s7 + $0xc4] ss:$8 sps:$4 sm:$0xff]  }
 0x2ba   :  { %4852 = vmatprep.mubr.bf16.mxu1 %v4353_v38  ;;  %v8646_v38 = vld [vmem:[%s11133_s7 + $0x420] ss:$8 sps:$4 sm:$0xff]   ;;  %6936 = vmatprep.subr.bf16.mxu1 %v8645_v55 }
 0x2bb   :  { %6937 = vmatpush1.bf16.msra.mxu1 %v8643_v3 }
 0x2bc   :  { %6938 = vmatprep.subr.bf16.mxu1 %v8651_v37 }
 0x2bf   :  { %6939 = vmatpush1.bf16.msra.mxu1 %v8649_v24 }
 0x2c0   :  { %6940 = vmatprep.subr.bf16.mxu1 %v8657_v5  ;;  %v10519_v5 = vld [vmem:[%s11132_s6] ss:$0 sm:$0xff] }
 0x2c1   :  { %4853 = vmatmul.mubr.bf16.gmra.mrb[28].mxu1 %v4352_v0  ;;  %v8648_v0 = vld [vmem:[%s11133_s7 + $0x424] ss:$8 sps:$4 sm:$0xff]  }
 0x2c2   :  { %7128 = vmatprep.subr.bf16.mxu0 %v8648_v0 }
 0x2c3   :  { %7129 = vmatpush1.bf16.msra.mxu0 %v8646_v38 }
 0x2c4   :  { %7130 = vmatprep.subr.bf16.mxu0 %v8654_v59 }
 0x2c7   :  { %7131 = vmatpush1.bf16.msra.mxu0 %v8652_v53 }
 0x2c8   :  { %7132 = vmatprep.subr.bf16.mxu0 %v8660_v9 }
 0x2e1   :  { %v8225_v48 = vpop.f32.mrb[64].mxu0 }
 0x2e2   :  { %v8226_v27 = vpop.f32.mrb[65].mxu0 }
 0x2e3   :  { %v10345_v25 = vadd.f32 %v8226_v27, %v8225_v48  ;;  %v8228_v8 = vpop.f32.mrb[66].mxu0  ;;  %v8655_v48 = vld [vmem:[%s11133_s7 + $0xe0] ss:$8 sps:$4 sm:$0xff]  }
 0x2e4   :  { %v8229_v4 = vpop.f32.mrb[67].mxu0  ;;  %v8658_v27 = vld [vmem:[%s11133_s7 + $0x440] ss:$8 sps:$4 sm:$0xff]   ;;  %6941 = vmatpush1.bf16.msra.mxu1 %v8655_v48 }
 0x2e5   :  { %v10353_v13 = vadd.f32 %v8229_v4, %v8228_v8  ;;  %v8663_v8 = vld [vmem:[%s11133_s7 + $0xf4] ss:$8 sps:$4 sm:$0xff]   ;;  %7133 = vmatpush1.bf16.msra.mxu0 %v8658_v27 }
 0x2e6   :  { %v8666_v4 = vld [vmem:[%s11133_s7 + $0x454] ss:$8 sps:$4 sm:$0xff]   ;;  %6942 = vmatprep.subr.bf16.mxu1 %v8663_v8 }
 0x2e7   :  { %7134 = vmatprep.subr.bf16.mxu0 %v8666_v4 }
 0x2e8   :  { %6943 = vmatpush1.bf16.msra.mxu1 %v8661_v28 }
 0x2e9   :  { %v8231_v49 = vpop.f32.mrb[68].mxu0  ;;  %7135 = vmatpush1.bf16.msra.mxu0 %v8664_v22 }
 0x2ea   :  { %v8232_v54 = vpop.f32.mrb[69].mxu0 }
 0x2eb   :  { %v10361_v34 = vadd.f32 %v8232_v54, %v8231_v49  ;;  %v8234_v33 = vpop.f32.mrb[70].mxu0 }
 0x2ec   :  { %v8235_v63 = vpop.f32.mrb[71].mxu0 }
 0x2ed   :  { %v10363_v47 = vadd.f32 %v8235_v63, %v8234_v33  ;;  %v8671_v63 = vld [vmem:[%s11133_s7 + $0x104] ss:$8 sps:$4 sm:$0xff]  }
 0x2ee   :  { %6965 = vmatprep.subr.bf16.mxu1 %v8671_v63 }
 0x2f1   :  { %v8237_v23 = vpop.f32.mrb[72].mxu0 }
 0x2f2   :  { %v8238_v36 = vpop.f32.mrb[73].mxu0 }
 0x2f3   :  { %v10365_v41 = vadd.f32 %v8238_v36, %v8237_v23  ;;  %v8240_v26 = vpop.f32.mrb[74].mxu0  ;;  %v8672_v36 = vld [vmem:[%s11133_s7 + $0x460] ss:$8 sps:$4 sm:$0xff]  }
 0x2f4   :  { %v8241_v44 = vpop.f32.mrb[75].mxu0 }
 0x2f5   :  { %v10367_v43 = vadd.f32 %v8241_v44, %v8240_v26  ;;  %v8674_v26 = vld [vmem:[%s11133_s7 + $0x464] ss:$8 sps:$4 sm:$0xff]   ;;  %v8909_v44 = vmov 0  }
 0x2f6   :  { %7156 = vmatprep.mubr.bf16.mxu0 %v8909_v44  ;;  %7136 = vmatprep.subr.bf16.mxu0 %v8674_v26 }
 0x2f7   :  { %7137 = vmatpush1.bf16.msra.mxu0 %v8672_v36 }
 0x2fc   :  { %v8243_v32 = vpop.f32.mrb[76].mxu0 }
 0x2fd   :  { %v8244_v19 = vpop.f32.mrb[77].mxu0 }
 0x2fe   :  { %v10369_v10 = vadd.f32 %v8244_v19, %v8243_v32  ;;  %v8246_v46 = vpop.f32.mrb[78].mxu0  ;;  %v8682_v32 = vld [vmem:[%s11133_s7 + $0x474] ss:$8 sps:$4 sm:$0xff]   ;;  %v8680_v19 = vld [vmem:[%s11133_s7 + $0x470] ss:$8 sps:$4 sm:$0xff]  }
 0x2ff   :  { %v8247_v17 = vpop.f32.mrb[79].mxu0  ;;  %7138 = vmatprep.subr.bf16.mxu0 %v8682_v32 }
 0x300   :  { %v10371_v39 = vadd.f32 %v8247_v17, %v8246_v46  ;;  %7139 = vmatpush1.bf16.msra.mxu0 %v8680_v19 }
 0x31f   :  { %v8249_v42 = vpop.f32.mrb[80].mxu0 }
 0x320   :  { %v8250_v51 = vpop.f32.mrb[81].mxu0 }
 0x321   :  { %v10397_v60 = vadd.f32 %v8250_v51, %v8249_v42  ;;  %v8252_v21 = vpop.f32.mrb[82].mxu0 }
 0x322   :  { %v8253_v20 = vpop.f32.mrb[83].mxu0 }
 0x323   :  { %v10402_v61 = vadd.f32 %v8253_v20, %v8252_v21 }
 0x344   :  { %v8255_v18 = vpop.f32.mrb[84].mxu0 }
 0x345   :  { %v8256_v7 = vpop.f32.mrb[85].mxu0 }
 0x346   :  { %v10479_v49 = vadd.f32 %v8256_v7, %v8255_v18  ;;  %v8258_v54 = vpop.f32.mrb[86].mxu0 }
 0x347   :  { %v8259_v33 = vpop.f32.mrb[87].mxu0 }
 0x348   :  { %v10484_v23 = vadd.f32 %v8259_v33, %v8258_v54 }
 0x34c   :  { %v8261_v46 = vpop.f32.mrb[88].mxu0  ;;  %v8289_v11 = vpop.f32.mrb[0].mxu1 }
 0x34d   :  { %v8262_v17 = vpop.f32.mrb[89].mxu0  ;;  %v8290_v62 = vpop.f32.mrb[1].mxu1 }
 0x34e   :  { %v10499_v14 = vadd.f32 %v8262_v17, %v8261_v46  ;;  %v8264_v15 = vpop.f32.mrb[90].mxu0  ;;  %v8291_v42 = vadd.f32 %v8290_v62, %v8289_v11  ;;  %v8292_v51 = vpop.f32.mrb[2].mxu1 }
 0x34f   :  { %v8265_v40 = vpop.f32.mrb[91].mxu0  ;;  %v8293_v1 = vpop.f32.mrb[3].mxu1 }
 0x350   :  { %v10501_v30 = vadd.f32 %v8265_v40, %v8264_v15  ;;  %v8294_v50 = vadd.f32 %v8293_v1, %v8292_v51  ;;  %v4799_v21 = vadd.f32 %v8291_v42, %v10345_v25  ;;  %v10513_v25 = vld [vmem:[%s11131_s5] ss:$0 sm:$0xff] }
 0x352   :  { %v4802_v12 = vadd.f32 %v8294_v50, %v10353_v13 }
 0x360   :  { %v8267_v20 = vpop.f32.mrb[92].mxu0 }
 0x361   :  { %v8268_v35 = vpop.f32.mrb[93].mxu0 }
 0x362   :  { %v10505_v31 = vadd.f32 %v8268_v35, %v8267_v20  ;;  %v8270_v57 = vpop.f32.mrb[94].mxu0 }
 0x363   :  { %v8271_v56 = vpop.f32.mrb[95].mxu0 }
 0x364   :  { %v10507_v45 = vadd.f32 %v8271_v56, %v8270_v57  ;;  %v8295_v6 = vpop.f32.mrb[4].mxu1 }
 0x365   :  { %v8296_v16 = vpop.f32.mrb[5].mxu1 }
 0x366   :  { %v8297_v29 = vadd.f32 %v8296_v16, %v8295_v6  ;;  %v8298_v58 = vpop.f32.mrb[6].mxu1 }
 0x367   :  { %v8299_v3 = vpop.f32.mrb[7].mxu1 }
 0x368   :  { %v8300_v55 = vadd.f32 %v8299_v3, %v8298_v58  ;;  %v4807_v38 = vadd.f32 %v8297_v29, %v10361_v34  ;;  %v8458_v0 = vpop.f32.mrb[96].mxu0 }
 0x369   :  { %v4895_v13 = vpop.f32.mrb[97].mxu0 }
 0x36a   :  { %v4904_v37 = vadd.f32 %v8458_v0, %v4807_v38  ;;  %v4896_v59 = vadd.f32 %v4895_v13, %v4799_v21  ;;  %v4810_v24 = vadd.f32 %v8300_v55, %v10363_v47  ;;  %v8459_v53 = vpop.f32.mrb[98].mxu0 }
 0x36b   :  { %v4898_v9 = vpop.f32.mrb[99].mxu0 }
 0x36c   :  { %v4967_v34 = vmul.f32 %v10513_v25, %v4904_v37  ;;  %v4965_v48 = vmul.f32 %v10513_v25, %v4896_v59  ;;  %v4907_v27 = vadd.f32 %v8459_v53, %v4810_v24  ;;  %v4899_v8 = vadd.f32 %v4898_v9, %v4802_v12  ;;  %v8301_v4 = vpop.f32.mrb[8].mxu1 }
 0x36d   :  { %v8302_v28 = vpop.f32.mrb[9].mxu1 }
 0x36e   :  { %v4990_v22 = vadd.f32 %v10519_v5, %v4967_v34  ;;  %v4988_v18 = vadd.f32 %v10519_v5, %v4965_v48  ;;  %v4968_v47 = vmul.f32 %v10513_v25, %v4907_v27  ;;  %v4966_v7 = vmul.f32 %v10513_v25, %v4899_v8  ;;  %v8304_v54 = vpop.f32.mrb[10].mxu1 }
 0x36f   :  { %v8303_v33 = vadd.f32 %v8302_v28, %v8301_v4  ;;  %v8305_v63 = vpop.f32.mrb[11].mxu1 }
 0x370   :  { %v5006_v36 = vmax.f32 %v4990_v22, 0.0  ;;  %v5004_v26 = vmax.f32 %v4988_v18, 0.0  ;;  %v4991_v32 = vadd.f32 %v10519_v5, %v4968_v47  ;;  %v4989_v19 = vadd.f32 %v10519_v5, %v4966_v7  ;;  %v10529_v46 = vpop.f32.mrb[100].mxu0 }
 0x371   :  { %v8306_v17 = vadd.f32 %v8305_v63, %v8304_v54  ;;  %v4815_v15 = vadd.f32 %v8303_v33, %v10365_v41  ;;  %v4911_v11 = vpop.f32.mrb[101].mxu0 }
 0x372   :  { %v5070_v40 = vcombine.high %v5006_v36, %v5006_v36  ;;  %v5077_v62 = vrot.slane %v5006_v36, %v9229_v52  ;;  %v5036_v42 = vcombine.high %v5004_v26, %v5004_v26  ;;  %v5043_v51 = vrot.slane %v5004_v26, %v9229_v52  ;;  %v10534_v1 = vpop.f32.mrb[102].mxu0 }
 0x373   :  { %v5007_v50 = vmax.f32 %v4991_v32, 0.0  ;;  %v5005_v21 = vmax.f32 %v4989_v19, 0.0  ;;  %v4912_v12 = vadd.f32 %v4911_v11, %v4815_v15  ;;  %v4818_v20 = vadd.f32 %v8306_v17, %v10367_v43  ;;  %v4914_v35 = vpop.f32.mrb[103].mxu0 }
 0x374   :  { %v5084_v57 = vrot.slane %v5070_v40, %v9229_v52  ;;  %v5085_v56 = vcombine.high %v5077_v62, %v5077_v62  ;;  %v5050_v41 = vrot.slane %v5036_v42, %v9229_v52  ;;  %v5051_v6 = vcombine.high %v5043_v51, %v5043_v51  ;;  %v10539_v16 = vpop.f32.mrb[12].mxu1 }
 0x375   :  { %v5087_v29 = vcombine.high %v5007_v50, %v5007_v50  ;;  %v5094_v58 = vrot.slane %v5007_v50, %v9229_v52  ;;  %v5053_v3 = vcombine.high %v5005_v21, %v5005_v21  ;;  %v5060_v55 = vrot.slane %v5005_v21, %v9229_v52  ;;  %v10543_v38 = vpop.f32.mrb[13].mxu1 }
 0x376   :  { %v5086_v0 = vcombine.high %v5084_v57, %v5084_v57  ;;  %v5052_v13 = vcombine.high %v5050_v41, %v5050_v41  ;;  %v4969_v43 = vmul.f32 %v10513_v25, %v4912_v12  ;;  %v4915_v37 = vadd.f32 %v4914_v35, %v4818_v20  ;;  %v10546_v59 = vpop.f32.mrb[14].mxu1 }
 0x377   :  { %v5101_v24 = vrot.slane %v5087_v29, %v9229_v52  ;;  %v5102_v53 = vcombine.high %v5094_v58, %v5094_v58  ;;  %v5376_v9 = vmax.f32 %v5077_v62, %v5094_v58  ;;  %v5067_v34 = vrot.slane %v5053_v3, %v9229_v52  ;;  %v10550_v48 = vpop.f32.mrb[15].mxu1 }
 0x378   :  { %v5068_v27 = vcombine.high %v5060_v55, %v5060_v55  ;;  %v5372_v8 = vmax.f32 %v5043_v51, %v5060_v55  ;;  %v4992_v4 = vadd.f32 %v10519_v5, %v4969_v43  ;;  %v4970_v28 = vmul.f32 %v10513_v25, %v4915_v37  ;;  %v10554_v22 = vpop.f32.mrb[104].mxu0 }
 0x379   :  { %v5103_v18 = vcombine.high %v5101_v24, %v5101_v24  ;;  %v5377_v47 = vmax.f32 %v5085_v56, %v5102_v53  ;;  %v5378_v7 = vmax.f32 %v5084_v57, %v5101_v24  ;;  %v7969_v54 = vrot.slane %v5376_v9, 9  ;;  %v10556_v33 = vpop.f32.mrb[105].mxu0 }
 0x37a   :  { %v5069_v63 = vcombine.high %v5067_v34, %v5067_v34  ;;  %v5373_v36 = vmax.f32 %v5051_v6, %v5068_v27  ;;  %v5374_v26 = vmax.f32 %v5050_v41, %v5067_v34  ;;  %v7965_v32 = vrot.slane %v5372_v8, 9  ;;  %v10558_v19 = vpop.f32.mrb[106].mxu0 }
 0x37b   :  { %v5379_v17 = vmax.f32 %v5086_v0, %v5103_v18  ;;  %v7970_v15 = vrot.slane %v5377_v47, 9  ;;  %v7971_v11 = vrot.slane %v5378_v7, 9  ;;  %v5536_v40 = vmax.f32 %v5376_v9, %v7969_v54  ;;  %v10560_v62 = vpop.f32.mrb[107].mxu0 }
 0x37c   :  { %v5375_v42 = vmax.f32 %v5052_v13, %v5069_v63  ;;  %v7966_v51 = vrot.slane %v5373_v36, 9  ;;  %v7967_v50 = vrot.slane %v5374_v26, 9  ;;  %v5532_v21 = vmax.f32 %v5372_v8, %v7965_v32  ;;  %v8313_v12 = vpop.f32.mrb[16].mxu1 }
 0x37d   :  { %v7972_v20 = vrot.slane %v5379_v17, 9  ;;  %v5537_v35 = vmax.f32 %v5377_v47, %v7970_v15  ;;  %v5538_v57 = vmax.f32 %v5378_v7, %v7971_v11  ;;  %v5627_v56 = vrot.slane %v5536_v40, %v9239_v2  ;;  %v8314_v41 = vpop.f32.mrb[17].mxu1 }
 0x37e   :  { %v7968_v6 = vrot.slane %v5375_v42, 9  ;;  %v5533_v29 = vmax.f32 %v5373_v36, %v7966_v51  ;;  %v5534_v58 = vmax.f32 %v5374_v26, %v7967_v50  ;;  %v5611_v3 = vrot.slane %v5532_v21, %v9239_v2  ;;  %v8316_v55 = vpop.f32.mrb[18].mxu1 }
 0x37f   :  { %v5539_v0 = vmax.f32 %v5379_v17, %v7972_v20  ;;  %v5631_v43 = vrot.slane %v5537_v35, %v9239_v2  ;;  %v5635_v13 = vrot.slane %v5538_v57, %v9239_v2  ;;  %v5008_v37 = vmax.f32 %v4992_v4, 0.0  ;;  %v8317_v24 = vpop.f32.mrb[19].mxu1 }
 0x380   :  { %v5535_v53 = vmax.f32 %v5375_v42, %v7968_v6  ;;  %v5615_v9 = vrot.slane %v5533_v29, %v9239_v2  ;;  %v5619_v34 = vrot.slane %v5534_v58, %v9239_v2  ;;  %v4993_v27 = vadd.f32 %v10519_v5, %v4970_v28  ;;  %v10569_v8 = vpop.f32.mrb[108].mxu0 }
 0x381   :  { %v5639_v18 = vrot.slane %v5539_v0, %v9239_v2  ;;  %v5739_v47 = vsel %vm3745_vm5, %v5631_v43, %v5627_v56  ;;  %v5104_v7 = vcombine.high %v5008_v37, %v5008_v37  ;;  %v5111_v54 = vrot.slane %v5008_v37, %v9229_v52  ;;  %v10574_v63 = vpop.f32.mrb[109].mxu0 }
 0x382   :  { %v5740_v4 = vsel %vm3747_vm6, %v5635_v13, %v5739_v47  ;;  %v5623_v36 = vrot.slane %v5535_v53, %v9239_v2  ;;  %v5736_v26 = vsel %vm3745_vm5, %v5615_v9, %v5611_v3  ;;  %v5009_v32 = vmax.f32 %v4993_v27, 0.0  ;;  %v10579_v17 = vpop.f32.mrb[110].mxu0 }
 0x383   :  { %v5741_v28 = vsel %vm3749_vm7, %v5639_v18, %v5740_v4  ;;  %v5737_v15 = vsel %vm3747_vm6, %v5619_v34, %v5736_v26  ;;  %v5118_v11 = vrot.slane %v5104_v7, %v9229_v52  ;;  %v5119_v40 = vcombine.high %v5111_v54, %v5111_v54  ;;  %v10584_v42 = vpop.f32.mrb[111].mxu0 }
 0x384   :  { %5770 = vst [vmem:[#allocation4 + $0x11] sm:$0xf] %v5741_v28  ;;  %v5738_v51 = vsel %vm3749_vm7, %v5623_v36, %v5737_v15  ;;  %v5121_v50 = vcombine.high %v5009_v32, %v5009_v32  ;;  %v5128_v21 = vrot.slane %v5009_v32, %v9229_v52  ;;  %v8309_v20 = vadd.f32 %v10543_v38, %v10539_v16  ;;  %v8319_v35 = vpop.f32.mrb[20].mxu1 }
 0x385   :  { %5769 = vst [vmem:[#allocation4 + $0x9] sm:$0xf] %v5738_v51  ;;  %v5120_v57 = vcombine.high %v5118_v11, %v5118_v11  ;;  %v8312_v56 = vadd.f32 %v10550_v48, %v10546_v59  ;;  %v8315_v6 = vadd.f32 %v8314_v41, %v8313_v12  ;;  %v8318_v29 = vadd.f32 %v8317_v24, %v8316_v55  ;;  %v8320_v58 = vpop.f32.mrb[21].mxu1 }
 0x386   :  { %v5135_v3 = vrot.slane %v5121_v50, %v9229_v52  ;;  %v5136_v0 = vcombine.high %v5128_v21, %v5128_v21  ;;  %v5380_v43 = vmax.f32 %v5111_v54, %v5128_v21  ;;  %v4823_v13 = vadd.f32 %v8309_v20, %v10369_v10  ;;  %v8322_v37 = vpop.f32.mrb[22].mxu1 }
 0x387   :  { %v4826_v53 = vadd.f32 %v8312_v56, %v10371_v39  ;;  %v4831_v16 = vadd.f32 %v8315_v6, %v10397_v60  ;;  %v4834_v38 = vadd.f32 %v8318_v29, %v10402_v61  ;;  %v8321_v9 = vadd.f32 %v8320_v58, %v8319_v35  ;;  %v8323_v34 = vpop.f32.mrb[23].mxu1 }
 0x388   :  { %v5137_v27 = vcombine.high %v5135_v3, %v5135_v3  ;;  %v5381_v59 = vmax.f32 %v5119_v40, %v5136_v0  ;;  %v5382_v48 = vmax.f32 %v5118_v11, %v5135_v3  ;;  %v7973_v12 = vrot.slane %v5380_v43, 9 }
 0x389   :  { %v4920_v41 = vadd.f32 %v10529_v46, %v4823_v13  ;;  %v4923_v55 = vadd.f32 %v10534_v1, %v4826_v53  ;;  %v4928_v24 = vadd.f32 %v10556_v33, %v4831_v16  ;;  %v4931_v10 = vadd.f32 %v10560_v62, %v4834_v38 }
 0x38a   :  { %v5383_v18 = vmax.f32 %v5120_v57, %v5137_v27  ;;  %v7974_v39 = vrot.slane %v5381_v59, 9  ;;  %v7975_v47 = vrot.slane %v5382_v48, 9  ;;  %v5540_v60 = vmax.f32 %v5380_v43, %v7973_v12 }
 0x38b   :  { %v4971_v61 = vmul.f32 %v10513_v25, %v4920_v41  ;;  %v4972_v7 = vmul.f32 %v10513_v25, %v4923_v55  ;;  %v4973_v54 = vmul.f32 %v10513_v25, %v4928_v24  ;;  %v4974_v4 = vmul.f32 %v10513_v25, %v4931_v10 }
 0x38c   :  { %v7976_v36 = vrot.slane %v5383_v18, 9  ;;  %v5541_v46 = vmax.f32 %v5381_v59, %v7974_v39  ;;  %v5542_v26 = vmax.f32 %v5382_v48, %v7975_v47  ;;  %v5643_v1 = vrot.slane %v5540_v60, %v9239_v2  ;;  %v10606_v33 = vpop.f32.mrb[24].mxu1 }
 0x38d   :  { %v4994_v62 = vadd.f32 %v10519_v5, %v4971_v61  ;;  %v4995_v32 = vadd.f32 %v10519_v5, %v4972_v7  ;;  %v4996_v28 = vadd.f32 %v10519_v5, %v4973_v54  ;;  %v4997_v15 = vadd.f32 %v10519_v5, %v4974_v4  ;;  %v10612_v11 = vpop.f32.mrb[25].mxu1 }
 0x38e   :  { %v5543_v40 = vmax.f32 %v5383_v18, %v7976_v36  ;;  %v5647_v51 = vrot.slane %v5541_v46, %v9239_v2  ;;  %v5651_v50 = vrot.slane %v5542_v26, %v9239_v2  ;;  %v4839_v21 = vadd.f32 %v8321_v9, %v10479_v49  ;;  %v10617_v20 = vpop.f32.mrb[26].mxu1 }
 0x38f   :  { %v5010_v35 = vmax.f32 %v4994_v62, 0.0  ;;  %v5011_v57 = vmax.f32 %v4995_v32, 0.0  ;;  %v5012_v56 = vmax.f32 %v4996_v28, 0.0  ;;  %v5013_v6 = vmax.f32 %v4997_v15, 0.0  ;;  %v10619_v29 = vpop.f32.mrb[27].mxu1 }
 0x390   :  { %v5655_v58 = vrot.slane %v5543_v40, %v9239_v2  ;;  %v5742_v3 = vsel %vm3745_vm5, %v5647_v51, %v5643_v1  ;;  %v4936_v0 = vadd.f32 %v10554_v22, %v4839_v21  ;;  %v8324_v43 = vadd.f32 %v8323_v34, %v8322_v37 }
 0x391   :  { %v5743_v13 = vsel %vm3747_vm6, %v5651_v50, %v5742_v3  ;;  %v5138_v53 = vcombine.high %v5010_v35, %v5010_v35  ;;  %v5145_v49 = vrot.slane %v5010_v35, %v9229_v52  ;;  %v5155_v16 = vcombine.high %v5011_v57, %v5011_v57 }
 0x392   :  { %v5744_v38 = vsel %vm3749_vm7, %v5655_v58, %v5743_v13  ;;  %v5162_v9 = vrot.slane %v5011_v57, %v9229_v52  ;;  %v5172_v27 = vcombine.high %v5012_v56, %v5012_v56  ;;  %v5179_v59 = vrot.slane %v5012_v56, %v9229_v52 }
 0x393   :  { %5771 = vst [vmem:[#allocation4 + $0x19] sm:$0xf] %v5744_v38  ;;  %v5152_v48 = vrot.slane %v5138_v53, %v9229_v52  ;;  %v5153_v12 = vcombine.high %v5145_v49, %v5145_v49  ;;  %v5169_v22 = vrot.slane %v5155_v16, %v9229_v52  ;;  %v5189_v37 = vcombine.high %v5013_v6, %v5013_v6 }
 0x394   :  { %v5170_v34 = vcombine.high %v5162_v9, %v5162_v9  ;;  %v5384_v41 = vmax.f32 %v5145_v49, %v5162_v9  ;;  %v5186_v55 = vrot.slane %v5172_v27, %v9229_v52  ;;  %v5187_v24 = vcombine.high %v5179_v59, %v5179_v59  ;;  %v8331_v10 = vpop.f32.mrb[28].mxu1 }
 0x395   :  { %v5154_v18 = vcombine.high %v5152_v48, %v5152_v48  ;;  %v5171_v39 = vcombine.high %v5169_v22, %v5169_v22  ;;  %v5386_v47 = vmax.f32 %v5152_v48, %v5169_v22  ;;  %v5196_v60 = vrot.slane %v5013_v6, %v9229_v52  ;;  %v8332_v61 = vpop.f32.mrb[29].mxu1 }
 0x396   :  { %v5385_v7 = vmax.f32 %v5153_v12, %v5170_v34  ;;  %v7977_v54 = vrot.slane %v5384_v41, 9  ;;  %v5188_v4 = vcombine.high %v5186_v55, %v5186_v55  ;;  %v5203_v36 = vrot.slane %v5189_v37, %v9229_v52  ;;  %v8334_v46 = vpop.f32.mrb[30].mxu1 }
 0x397   :  { %v5387_v26 = vmax.f32 %v5154_v18, %v5171_v39  ;;  %v7979_v1 = vrot.slane %v5386_v47, 9  ;;  %v5204_v62 = vcombine.high %v5196_v60, %v5196_v60  ;;  %v5388_v32 = vmax.f32 %v5179_v59, %v5196_v60  ;;  %v8335_v28 = vpop.f32.mrb[31].mxu1 }
 0x398   :  { %v7978_v15 = vrot.slane %v5385_v7, 9  ;;  %v5544_v40 = vmax.f32 %v5384_v41, %v7977_v54  ;;  %v5205_v51 = vcombine.high %v5203_v36, %v5203_v36  ;;  %v5390_v50 = vmax.f32 %v5186_v55, %v5203_v36 }
 0x399   :  { %v7980_v21 = vrot.slane %v5387_v26, 9  ;;  %v5546_v35 = vmax.f32 %v5386_v47, %v7979_v1  ;;  %v5389_v57 = vmax.f32 %v5187_v24, %v5204_v62  ;;  %v7981_v56 = vrot.slane %v5388_v32, 9 }
 0x39a   :  { %v5545_v6 = vmax.f32 %v5385_v7, %v7978_v15  ;;  %v5659_v58 = vrot.slane %v5544_v40, %v9239_v2  ;;  %v5391_v3 = vmax.f32 %v5188_v4, %v5205_v51  ;;  %v7983_v13 = vrot.slane %v5390_v50, 9  ;;  %v8667_v51 = vld [vmem:[#allocation4 + $0x1] ss:$8 sps:$4 sm:$0xff]  }
 0x39b   :  { %v5547_v53 = vmax.f32 %v5387_v26, %v7980_v21  ;;  %v5667_v49 = vrot.slane %v5546_v35, %v9239_v2  ;;  %v7982_v16 = vrot.slane %v5389_v57, 9  ;;  %v5548_v38 = vmax.f32 %v5388_v32, %v7981_v56  ;;  %v8676_v32 = vld [vmem:[#allocation4 + $0x10] ss:$8 sps:$4 sm:$0xff]   ;;  %v8675_v21 = vld [vmem:[#allocation4] ss:$8 sps:$4 sm:$0xff]  }
 0x39c   :  { %v5663_v9 = vrot.slane %v5545_v6, %v9239_v2  ;;  %v7984_v27 = vrot.slane %v5391_v3, 9  ;;  %v5550_v59 = vmax.f32 %v5390_v50, %v7983_v13  ;;  %v4975_v48 = vmul.f32 %v10513_v25, %v4936_v0  ;;  %v8686_v13 = vld [vmem:[#allocation4 + $0x12] ss:$8 sps:$4 sm:$0xff]  }
 0x39d   :  { %v5671_v12 = vrot.slane %v5547_v53, %v9239_v2  ;;  %v5549_v22 = vmax.f32 %v5389_v57, %v7982_v16  ;;  %v5675_v37 = vrot.slane %v5548_v38, %v9239_v2  ;;  %v4842_v34 = vadd.f32 %v8324_v43, %v10484_v23 }
 0x39e   :  { %v5745_v41 = vsel %vm3745_vm5, %v5663_v9, %v5659_v58  ;;  %v5551_v55 = vmax.f32 %v5391_v3, %v7984_v27  ;;  %v5683_v24 = vrot.slane %v5550_v59, %v9239_v2  ;;  %v4998_v18 = vadd.f32 %v10519_v5, %v4975_v48 }
 0x39f   :  { %v5746_v39 = vsel %vm3747_vm6, %v5667_v49, %v5745_v41  ;;  %v5679_v47 = vrot.slane %v5549_v22, %v9239_v2  ;;  %v4939_v0 = vadd.f32 %v10558_v19, %v4842_v34  ;;  %v8327_v60 = vadd.f32 %v10612_v11, %v10606_v33  ;;  %v8668_v19 = vld [vmem:[#allocation4 + $0x11] ss:$8 sps:$4 sm:$0xff]  }
 0x3a0   :  { %v5747_v7 = vsel %vm3749_vm7, %v5671_v12, %v5746_v39  ;;  %v5687_v23 = vrot.slane %v5551_v55, %v9239_v2  ;;  %v5014_v43 = vmax.f32 %v4998_v18, 0.0  ;;  %v8330_v54 = vadd.f32 %v10619_v29, %v10617_v20  ;;  %v8677_v12 = vld [vmem:[%s11133_s7 + $0x110] ss:$8 sps:$4 sm:$0xff]  }
 0x3a1   :  { %5772 = vst [vmem:[#allocation4 + $0x21] sm:$0xf] %v5747_v7  ;;  %v5748_v4 = vsel %vm3745_vm5, %v5679_v47, %v5675_v37  ;;  %v4976_v36 = vmul.f32 %v10513_v25, %v4939_v0  ;;  %v4847_v26 = vadd.f32 %v8327_v60, %v10499_v14  ;;  %v8333_v1 = vadd.f32 %v8332_v61, %v8331_v10 }
 0x3a2   :  { %v5749_v62 = vsel %vm3747_vm6, %v5683_v24, %v5748_v4  ;;  %v5206_v33 = vcombine.high %v5014_v43, %v5014_v43  ;;  %v4850_v11 = vadd.f32 %v8330_v54, %v10501_v30  ;;  %v5213_v14 = vrot.slane %v5014_v43, %v9229_v52  ;;  %v8683_v4 = vld [vmem:[%s11133_s7 + $0x120] ss:$8 sps:$4 sm:$0xff]  }
 0x3a3   :  { %v5750_v15 = vsel %vm3749_vm7, %v5687_v23, %v5749_v62  ;;  %v4999_v40 = vadd.f32 %v10519_v5, %v4976_v36  ;;  %v4944_v20 = vadd.f32 %v10574_v63, %v4847_v26  ;;  %v4855_v29 = vadd.f32 %v8333_v1, %v10505_v31  ;;  %v8669_v31 = vld [vmem:[%s11133_s7 + $0x100] ss:$8 sps:$4 sm:$0xff]   ;;  %v8690_v62 = vld [vmem:[%s11133_s7 + $0x134] ss:$8 sps:$4 sm:$0xff]  }
 0x3a4   :  { %5773 = vst [vmem:[#allocation4 + $0x39] sm:$0xf] %v5750_v15  ;;  %v5220_v10 = vrot.slane %v5206_v33, %v9229_v52  ;;  %v4947_v61 = vadd.f32 %v10584_v42, %v4850_v11  ;;  %v8336_v50 = vadd.f32 %v8335_v28, %v8334_v46  ;;  %v5829_v56 = vpack.c.bf16 %v8668_v19, %v8667_v51  ;;  %v8679_v42 = vld [vmem:[%s11133_s7 + $0x114] ss:$8 sps:$4 sm:$0xff]  }
 0x3a5   :  { %v5015_v30 = vmax.f32 %v4999_v40, 0.0  ;;  %v4977_v35 = vmul.f32 %v10513_v25, %v4944_v20  ;;  %v4952_v57 = vadd.f32 %v10569_v8, %v4855_v29  ;;  %v5801_v58 = vpack.c.bf16 %v8676_v32, %v8675_v21 }
 0x3a6   :  { %v4978_v63 = vmul.f32 %v10513_v25, %v4947_v61  ;;  %v4858_v6 = vadd.f32 %v8336_v50, %v10507_v45  ;;  %6944 = vmatprep.mubr.bf16.mxu1 %v5829_v56  ;;  %v5221_v53 = vcombine.high %v5213_v14, %v5213_v14  ;;  %v5222_v49 = vcombine.high %v5220_v10, %v5220_v10  ;;  %v8688_v50 = vld [vmem:[%s11133_s7 + $0x130] ss:$8 sps:$4 sm:$0xff]   ;;  %v8693_v56 = vld [vmem:[%s11133_s7 + $0x144] ss:$8 sps:$4 sm:$0xff]  }
 0x3a7   :  { %v5223_v46 = vcombine.high %v5015_v30, %v5015_v30  ;;  %v5230_v28 = vrot.slane %v5015_v30, %v9229_v52  ;;  %v5000_v3 = vadd.f32 %v10519_v5, %v4977_v35  ;;  %v4979_v8 = vmul.f32 %v10513_v25, %v4952_v57  ;;  %6945 = vmatmul.mubr.bf16.vlgmr.msra.gmra.mrb[32].mxu1 %v5801_v58 }
 0x3a8   :  { %v5001_v16 = vadd.f32 %v10519_v5, %v4978_v63  ;;  %v4955_v45 = vadd.f32 %v10579_v17, %v4858_v6  ;;  %v8687_v38 = vld [vmem:[#allocation4 + $0x22] ss:$8 sps:$4 sm:$0xff]   ;;  %6966 = vmatpush1.bf16.msra.mxu1 %v8669_v31 }
 0x3a9   :  { %v5237_v9 = vrot.slane %v5223_v46, %v9229_v52  ;;  %v5238_v27 = vcombine.high %v5230_v28, %v5230_v28  ;;  %v5392_v59 = vmax.f32 %v5213_v14, %v5230_v28  ;;  %v5016_v48 = vmax.f32 %v5000_v3, 0.0  ;;  %6967 = vmatprep.subr.bf16.mxu1 %v8679_v42  ;;  %v8685_v17 = vld [vmem:[%s11133_s7 + $0x124] ss:$8 sps:$4 sm:$0xff]  }
 0x3aa   :  { %v5017_v22 = vmax.f32 %v5001_v16, 0.0  ;;  %v5002_v37 = vadd.f32 %v10519_v5, %v4979_v8  ;;  %v4980_v34 = vmul.f32 %v10513_v25, %v4955_v45  ;;  %v6026_v41 = vpack.c.bf16 %v8687_v38, %v8686_v13  ;;  %v8691_v16 = vld [vmem:[%s11133_s7 + $0x140] ss:$8 sps:$4 sm:$0xff]  }
 0x3ab   :  { %v5239_v55 = vcombine.high %v5237_v9, %v5237_v9  ;;  %v5393_v24 = vmax.f32 %v5221_v53, %v5238_v27  ;;  %v5394_v18 = vmax.f32 %v5220_v10, %v5237_v9  ;;  %v7985_v39 = vrot.slane %v5392_v59, 9  ;;  %v8696_v27 = vld [vmem:[%s11133_s7 + $0x154] ss:$8 sps:$4 sm:$0xff]  }
 0x3ac   :  { %v5240_v47 = vcombine.high %v5016_v48, %v5016_v48  ;;  %v5247_v0 = vrot.slane %v5016_v48, %v9229_v52  ;;  %v5257_v60 = vcombine.high %v5017_v22, %v5017_v22  ;;  %v5264_v7 = vrot.slane %v5017_v22, %v9229_v52  ;;  %7157 = vmatmul.mubr.bf16.vlgmr.msra.gmra.mrb[112].mxu0 %v6026_v41 }
 0x3ad   :  { %v5395_v23 = vmax.f32 %v5222_v49, %v5239_v55  ;;  %v7986_v43 = vrot.slane %v5393_v24, 9  ;;  %v7987_v25 = vrot.slane %v5394_v18, 9  ;;  %v5552_v54 = vmax.f32 %v5392_v59, %v7985_v39  ;;  %6968 = vmatpush1.bf16.msra.mxu1 %v8677_v12  ;;  %7166 = vmatprep.mubr.bf16.mxu0 %v8909_v44  ;;  %v8694_v55 = vld [vmem:[%s11133_s7 + $0x150] ss:$8 sps:$4 sm:$0xff]  }
 0x3ae   :  { %v5254_v36 = vrot.slane %v5240_v47, %v9229_v52  ;;  %v5255_v26 = vcombine.high %v5247_v0, %v5247_v0  ;;  %v5271_v1 = vrot.slane %v5257_v60, %v9229_v52  ;;  %v5272_v19 = vcombine.high %v5264_v7, %v5264_v7  ;;  %6969 = vmatprep.subr.bf16.mxu1 %v8685_v17 }
 0x3af   :  { %v7988_v33 = vrot.slane %v5395_v23, 9  ;;  %v5553_v11 = vmax.f32 %v5393_v24, %v7986_v43  ;;  %v5554_v32 = vmax.f32 %v5394_v18, %v7987_v25  ;;  %v5691_v15 = vrot.slane %v5552_v54, %v9239_v2  ;;  %v8697_v54 = vld [vmem:[%s11133_s7 + $0x160] ss:$8 sps:$4 sm:$0xff]  }
 0x3b0   :  { %v5256_v40 = vcombine.high %v5254_v36, %v5254_v36  ;;  %v5273_v20 = vcombine.high %v5271_v1, %v5271_v1  ;;  %v5396_v29 = vmax.f32 %v5247_v0, %v5264_v7  ;;  %v5397_v44 = vmax.f32 %v5255_v26, %v5272_v19  ;;  %v8699_v0 = vld [vmem:[%s11133_s7 + $0x164] ss:$8 sps:$4 sm:$0xff]   ;;  %v8702_v19 = vld [vmem:[%s11133_s7 + $0x174] ss:$8 sps:$4 sm:$0xff]  }
 0x3b1   :  { %v5555_v51 = vmax.f32 %v5395_v23, %v7988_v33  ;;  %v5695_v14 = vrot.slane %v5553_v11, %v9239_v2  ;;  %v5699_v10 = vrot.slane %v5554_v32, %v9239_v2  ;;  %v5398_v61 = vmax.f32 %v5254_v36, %v5271_v1  ;;  %6970 = vmatpush1.bf16.msra.mxu1 %v8683_v4  ;;  %v8700_v32 = vld [vmem:[%s11133_s7 + $0x170] ss:$8 sps:$4 sm:$0xff]  }
 0x3b2   :  { %v5399_v21 = vmax.f32 %v5256_v40, %v5273_v20  ;;  %v7989_v30 = vrot.slane %v5396_v29, 9  ;;  %v7990_v35 = vrot.slane %v5397_v44, 9  ;;  %v5018_v57 = vmax.f32 %v5002_v37, 0.0  ;;  %6971 = vmatprep.subr.bf16.mxu1 %v8690_v62  ;;  %v8707_v40 = vld [vmem:[%s11133_s7 + $0x184] ss:$8 sps:$4 sm:$0xff]  }
 0x3b3   :  { %v5703_v31 = vrot.slane %v5555_v51, %v9239_v2  ;;  %v5751_v63 = vsel %vm3745_vm5, %v5695_v14, %v5691_v15  ;;  %v7991_v6 = vrot.slane %v5398_v61, 9  ;;  %v5003_v58 = vadd.f32 %v10519_v5, %v4980_v34  ;;  %v8703_v15 = vld [vmem:[#allocation4 + $0x31] ss:$8 sps:$4 sm:$0xff]  }
 0x3b4   :  { %v5752_v42 = vsel %vm3747_vm6, %v5699_v10, %v5751_v63  ;;  %v7992_v46 = vrot.slane %v5399_v21, 9  ;;  %v5556_v28 = vmax.f32 %v5396_v29, %v7989_v30  ;;  %v5557_v3 = vmax.f32 %v5397_v44, %v7990_v35  ;;  %v8711_v20 = vld [vmem:[#allocation4 + $0x18] ss:$8 sps:$4 sm:$0xff]  }
 0x3b5   :  { %v5753_v8 = vsel %vm3749_vm7, %v5703_v31, %v5752_v42  ;;  %v5558_v13 = vmax.f32 %v5398_v61, %v7991_v6  ;;  %v5274_v53 = vcombine.high %v5018_v57, %v5018_v57  ;;  %v5281_v49 = vrot.slane %v5018_v57, %v9229_v52  ;;  %6972 = vmatpush1.bf16.msra.mxu1 %v8688_v50  ;;  %v8708_v61 = vld [vmem:[#allocation4 + $0x30] ss:$8 sps:$4 sm:$0xff]   ;;  %v8705_v31 = vld [vmem:[%s11133_s7 + $0x180] ss:$8 sps:$4 sm:$0xff]   ;;  %v8714_v42 = vld [vmem:[%s11133_s7 + $0x194] ss:$8 sps:$4 sm:$0xff]  }
 0x3b6   :  { %5774 = vst [vmem:[#allocation4 + $0x41] sm:$0xf] %v5753_v8  ;;  %v5559_v45 = vmax.f32 %v5399_v21, %v7992_v46  ;;  %v5707_v5 = vrot.slane %v5556_v28, %v9239_v2  ;;  %v5711_v38 = vrot.slane %v5557_v3, %v9239_v2  ;;  %v5019_v9 = vmax.f32 %v5003_v58, 0.0  ;;  %6973 = vmatprep.subr.bf16.mxu1 %v8693_v56  ;;  %v8710_v57 = vld [vmem:[#allocation4 + $0x8] ss:$8 sps:$4 sm:$0xff]  }
 0x3b7   :  { %v5715_v59 = vrot.slane %v5558_v13, %v9239_v2  ;;  %v5288_v48 = vrot.slane %v5274_v53, %v9229_v52  ;;  %v5289_v41 = vcombine.high %v5281_v49, %v5281_v49  ;;  %v5885_v58 = vpack.c.bf16 %v8711_v20, %v8710_v57  ;;  %v8712_v46 = vld [vmem:[%s11133_s7 + $0x190] ss:$8 sps:$4 sm:$0xff]   ;;  %v8717_v28 = vld [vmem:[%s11133_s7 + $0x1a4] ss:$8 sps:$4 sm:$0xff]   ;;  %v8715_v3 = vld [vmem:[%s11133_s7 + $0x1a0] ss:$8 sps:$4 sm:$0xff]  }
 0x3b8   :  { %v5719_v12 = vrot.slane %v5559_v45, %v9239_v2  ;;  %v5754_v22 = vsel %vm3745_vm5, %v5711_v38, %v5707_v5  ;;  %v5291_v37 = vcombine.high %v5019_v9, %v5019_v9  ;;  %v5298_v34 = vrot.slane %v5019_v9, %v9229_v52  ;;  %v8722_v13 = vld [vmem:[%s11133_s7 + $0x1b4] ss:$8 sps:$4 sm:$0xff]   ;;  %v8725_v45 = vld [vmem:[%s11133_s7 + $0x1c4] ss:$8 sps:$4 sm:$0xff]   ;;  %v8723_v5 = vld [vmem:[%s11133_s7 + $0x1c0] ss:$8 sps:$4 sm:$0xff]  }
 0x3b9   :  { %v5755_v17 = vsel %vm3747_vm6, %v5715_v59, %v5754_v22  ;;  %6974 = vmatpush1.bf16.msra.mxu1 %v8691_v16  ;;  %v5290_v60 = vcombine.high %v5288_v48, %v5288_v48  ;;  %v8720_v16 = vld [vmem:[%s11133_s7 + $0x1b0] ss:$8 sps:$4 sm:$0xff]   ;;  %v8728_v38 = vld [vmem:[%s11133_s7 + $0x1d4] ss:$8 sps:$4 sm:$0xff]   ;;  %v8729_v59 = vld [vmem:[%s11133_s7 + $0x1e0] ss:$8 sps:$4 sm:$0xff]  }
 0x3ba   :  { %v5756_v24 = vsel %vm3749_vm7, %v5719_v12, %v5755_v17  ;;  %v5305_v18 = vrot.slane %v5291_v37, %v9229_v52  ;;  %v5306_v39 = vcombine.high %v5298_v34, %v5298_v34  ;;  %v5400_v47 = vmax.f32 %v5281_v49, %v5298_v34  ;;  %6975 = vmatprep.subr.bf16.mxu1 %v8696_v27  ;;  %v8726_v9 = vld [vmem:[%s11133_s7 + $0x1d0] ss:$8 sps:$4 sm:$0xff]   ;;  %v8731_v27 = vld [vmem:[%s11133_s7 + $0x1e4] ss:$8 sps:$4 sm:$0xff]  }
 0x3bb   :  { %5775 = vst [vmem:[#allocation4 + $0x49] sm:$0xf] %v5756_v24  ;;  %v8732_v12 = vld [vmem:[%s11133_s7 + $0x1f0] ss:$8 sps:$4 sm:$0xff]   ;;  %v8739_v37 = vld [vmem:[%s11133_s7 + $0x204] ss:$8 sps:$4 sm:$0xff]  }
 0x3bc   :  { %v5307_v7 = vcombine.high %v5305_v18, %v5305_v18  ;;  %v5401_v23 = vmax.f32 %v5289_v41, %v5306_v39  ;;  %v5402_v43 = vmax.f32 %v5288_v48, %v5305_v18  ;;  %v7993_v25 = vrot.slane %v5400_v47, 9  ;;  %v8734_v48 = vld [vmem:[%s11133_s7 + $0x1f4] ss:$8 sps:$4 sm:$0xff]   ;;  %v8735_v17 = vld [vmem:[#allocation4 + $0x2] ss:$8 sps:$4 sm:$0xff]  }
 0x3bd   :  { %6976 = vmatpush1.bf16.msra.mxu1 %v8694_v55  ;;  %v8736_v22 = vld [vmem:[#allocation4 + $0x12] ss:$8 sps:$4 sm:$0xff]   ;;  %v8737_v41 = vld [vmem:[%s11133_s7 + $0x200] ss:$8 sps:$4 sm:$0xff]   ;;  %v8769_v20 = vld [vmem:[%s11133_s7 + $0x284] ss:$8 sps:$4 sm:$0xff]  }
 0x3be   :  { %v5403_v4 = vmax.f32 %v5290_v60, %v5307_v7  ;;  %v7994_v36 = vrot.slane %v5401_v23, 9  ;;  %v7995_v26 = vrot.slane %v5402_v43, 9  ;;  %v5560_v1 = vmax.f32 %v5400_v47, %v7993_v25  ;;  %6977 = vmatprep.subr.bf16.mxu1 %v8699_v0  ;;  %v8740_v55 = vld [vmem:[#allocation4 + $0x38] ss:$8 sps:$4 sm:$0xff]   ;;  %v8744_v18 = vld [vmem:[%s11133_s7 + $0x214] ss:$8 sps:$4 sm:$0xff]  }
 0x3bf   :  { %v5857_v24 = vpack.c.bf16 %v8736_v22, %v8735_v17  ;;  %v8742_v47 = vld [vmem:[%s11133_s7 + $0x210] ss:$8 sps:$4 sm:$0xff]   ;;  %v8749_v60 = vld [vmem:[%s11133_s7 + $0x224] ss:$8 sps:$4 sm:$0xff]   ;;  %v8811_v17 = vld [vmem:[%s11133_s7 + $0x340] ss:$8 sps:$4 sm:$0xff]  }
 0x3c0   :  { %v7996_v62 = vrot.slane %v5403_v4, 9  ;;  %v5561_v33 = vmax.f32 %v5401_v23, %v7994_v36  ;;  %v5562_v11 = vmax.f32 %v5402_v43, %v7995_v26  ;;  %v5723_v44 = vrot.slane %v5560_v1, %v9239_v2  ;;  %v8751_v7 = vld [vmem:[#allocation4 + $0x1a] ss:$8 sps:$4 sm:$0xff]   ;;  %v8750_v25 = vld [vmem:[#allocation4 + $0xa] ss:$8 sps:$4 sm:$0xff]  }
 0x3c1   :  { %6978 = vmatpush1.bf16.msra.mxu1 %v8697_v54  ;;  %v8745_v23 = vld [vmem:[#allocation4 + $0x32] ss:$8 sps:$4 sm:$0xff]   ;;  %v8747_v43 = vld [vmem:[%s11133_s7 + $0x220] ss:$8 sps:$4 sm:$0xff]   ;;  %v5941_v36 = vpack.c.bf16 %v8751_v7, %v8750_v25  ;;  %v8757_v1 = vld [vmem:[%s11133_s7 + $0x244] ss:$8 sps:$4 sm:$0xff]  }
 0x3c2   :  { %v5563_v29 = vmax.f32 %v5403_v4, %v7996_v62  ;;  %v5727_v51 = vrot.slane %v5561_v33, %v9239_v2  ;;  %v5731_v14 = vrot.slane %v5562_v11, %v9239_v2  ;;  %6979 = vmatprep.subr.bf16.mxu1 %v8702_v19  ;;  %v8704_v10 = vld [vmem:[#allocation4 + $0x41] ss:$8 sps:$4 sm:$0xff]   ;;  %v8754_v4 = vld [vmem:[%s11133_s7 + $0x234] ss:$8 sps:$4 sm:$0xff]   ;;  %v8752_v26 = vld [vmem:[%s11133_s7 + $0x230] ss:$8 sps:$4 sm:$0xff]  }
 0x3c3   :  { %v8709_v50 = vld [vmem:[#allocation4 + $0x40] ss:$8 sps:$4 sm:$0xff]   ;;  %v5830_v35 = vpack.c.bf16 %v8704_v10, %v8703_v15  ;;  %v8760_v62 = vld [vmem:[%s11133_s7 + $0x254] ss:$8 sps:$4 sm:$0xff]   ;;  %v8758_v33 = vld [vmem:[%s11133_s7 + $0x250] ss:$8 sps:$4 sm:$0xff]  }
 0x3c4   :  { %v5735_v21 = vrot.slane %v5563_v29, %v9239_v2  ;;  %v5757_v30 = vsel %vm3745_vm5, %v5727_v51, %v5723_v44  ;;  %v5802_v63 = vpack.c.bf16 %v8709_v50, %v8708_v61  ;;  %v8718_v8 = vld [vmem:[#allocation4 + $0x42] ss:$8 sps:$4 sm:$0xff]   ;;  %v8766_v15 = vld [vmem:[%s11133_s7 + $0x274] ss:$8 sps:$4 sm:$0xff]   ;;  %v8770_v51 = vld [vmem:[%s11133_s7 + $0x290] ss:$8 sps:$4 sm:$0xff]  }
 0x3c5   :  { %v5758_v56 = vsel %vm3747_vm6, %v5731_v14, %v5757_v30  ;;  %6980 = vmatpush1.bf16.msra.mxu1 %v8700_v32  ;;  %6954 = vmatprep.mubr.bf16.mxu1 %v5830_v35  ;;  %v8746_v0 = vld [vmem:[#allocation4 + $0x42] ss:$8 sps:$4 sm:$0xff]   ;;  %v8772_v44 = vld [vmem:[%s11133_s7 + $0x294] ss:$8 sps:$4 sm:$0xff]   ;;  %v8776_v50 = vld [vmem:[%s11133_s7 + $0x2b0] ss:$8 sps:$4 sm:$0xff]  }
 0x3c6   :  { %v5759_v6 = vsel %vm3749_vm7, %v5735_v21, %v5758_v56  ;;  %6981 = vmatprep.subr.bf16.mxu1 %v8707_v40  ;;  %6955 = vmatmul.mubr.bf16.gmra.mrb[36].mxu1 %v5802_v63  ;;  %v5858_v54 = vpack.c.bf16 %v8746_v0, %v8745_v23  ;;  %v8755_v19 = vld [vmem:[%s11133_s7 + $0x240] ss:$8 sps:$4 sm:$0xff]   ;;  %v8763_v11 = vld [vmem:[%s11133_s7 + $0x264] ss:$8 sps:$4 sm:$0xff]   ;;  %v8764_v40 = vld [vmem:[%s11133_s7 + $0x270] ss:$8 sps:$4 sm:$0xff]  }
 0x3c7   :  { %5776 = vst [vmem:[#allocation4 + $0x51] sm:$0xf] %v5759_v6  ;;  %6997 = vmatprep.mubr.bf16.mxu1 %v5885_v58  ;;  %v8761_v32 = vld [vmem:[%s11133_s7 + $0x260] ss:$8 sps:$4 sm:$0xff]   ;;  %v8775_v14 = vld [vmem:[%s11133_s7 + $0x2a4] ss:$8 sps:$4 sm:$0xff]  }
 0x3c8   :  { %v8767_v29 = vld [vmem:[%s11133_s7 + $0x280] ss:$8 sps:$4 sm:$0xff]   ;;  %v8778_v61 = vld [vmem:[%s11133_s7 + $0x2b4] ss:$8 sps:$4 sm:$0xff]   ;;  %v8781_v21 = vld [vmem:[%s11133_s7 + $0x2c4] ss:$8 sps:$4 sm:$0xff]  }
 0x3c9   :  { %6982 = vmatpush1.bf16.msra.mxu1 %v8705_v31  ;;  %v8773_v10 = vld [vmem:[%s11133_s7 + $0x2a0] ss:$8 sps:$4 sm:$0xff]   ;;  %v8784_v35 = vld [vmem:[%s11133_s7 + $0x2d4] ss:$8 sps:$4 sm:$0xff]   ;;  %v8782_v57 = vld [vmem:[%s11133_s7 + $0x2d0] ss:$8 sps:$4 sm:$0xff]  }
 0x3ca   :  { %6983 = vmatprep.subr.bf16.mxu1 %v8714_v42  ;;  %v8779_v30 = vld [vmem:[%s11133_s7 + $0x2c0] ss:$8 sps:$4 sm:$0xff]   ;;  %v8787_v56 = vld [vmem:[%s11133_s7 + $0x2e4] ss:$8 sps:$4 sm:$0xff]   ;;  %v8790_v63 = vld [vmem:[%s11133_s7 + $0x2f4] ss:$8 sps:$4 sm:$0xff]  }
 0x3cb   :  { %v8785_v31 = vld [vmem:[%s11133_s7 + $0x2e0] ss:$8 sps:$4 sm:$0xff]   ;;  %v8788_v6 = vld [vmem:[%s11133_s7 + $0x2f0] ss:$8 sps:$4 sm:$0xff]   ;;  %v8795_v42 = vld [vmem:[%s11133_s7 + $0x304] ss:$8 sps:$4 sm:$0xff]  }
 0x3cc   :  { %v8792_v58 = vld [vmem:[#allocation4 + $0x19] ss:$8 sps:$4 sm:$0xff]  }
 0x3cd   :  { %6984 = vmatpush1.bf16.msra.mxu1 %v8712_v46  ;;  %v8825_v0 = vld [vmem:[%s11133_s7 + $0x384] ss:$8 sps:$4 sm:$0xff]   ;;  %v8828_v7 = vld [vmem:[%s11133_s7 + $0x394] ss:$8 sps:$4 sm:$0xff]   ;;  %v8826_v23 = vld [vmem:[%s11133_s7 + $0x390] ss:$8 sps:$4 sm:$0xff]  }
 0x3ce   :  { %6985 = vmatprep.subr.bf16.mxu1 %v8717_v28  ;;  %v8719_v53 = vld [vmem:[#allocation4 + $0x52] ss:$8 sps:$4 sm:$0xff]   ;;  %v8829_v25 = vld [vmem:[%s11133_s7 + $0x3a0] ss:$8 sps:$4 sm:$0xff]  }
 0x3cf   :  { %v6027_v49 = vpack.c.bf16 %v8719_v53, %v8718_v8  ;;  %v8741_v34 = vld [vmem:[#allocation4 + $0x48] ss:$8 sps:$4 sm:$0xff]   ;;  %v8796_v8 = vld [vmem:[#allocation4 + $0x3a] ss:$8 sps:$4 sm:$0xff]  }
 0x3d0   :  { %v5886_v39 = vpack.c.bf16 %v8741_v34, %v8740_v55  ;;  %v8797_v46 = vld [vmem:[#allocation4 + $0x4a] ss:$8 sps:$4 sm:$0xff]  }
 0x3d1   :  { %6986 = vmatpush1.bf16.msra.mxu1 %v8715_v3  ;;  %7167 = vmatmul.mubr.bf16.gmra.mrb[116].mxu0 %v6027_v49  ;;  %v8791_v28 = vld [vmem:[#allocation4 + $0x9] ss:$8 sps:$4 sm:$0xff]   ;;  %v5942_v49 = vpack.c.bf16 %v8797_v46, %v8796_v8  ;;  %v8859_v8 = vld [vmem:[%s11136_s10 + $0x58] sm:$0xff]  }
 0x3d2   :  { %6987 = vmatprep.subr.bf16.mxu1 %v8722_v13  ;;  %v8793_v3 = vld [vmem:[%s11133_s7 + $0x300] ss:$8 sps:$4 sm:$0xff]   ;;  %v5913_v13 = vpack.c.bf16 %v8792_v58, %v8791_v28  ;;  %v8800_v53 = vld [vmem:[%s11133_s7 + $0x314] ss:$8 sps:$4 sm:$0xff]   ;;  %v8813_v34 = vld [vmem:[%s11133_s7 + $0x344] ss:$8 sps:$4 sm:$0xff]  }
 0x3d3   :  { %v8814_v55 = vld [vmem:[%s11133_s7 + $0x350] ss:$8 sps:$4 sm:$0xff]   ;;  %v8854_v58 = vld [vmem:[%s11136_s10] sm:$0xff]   ;;  %v8856_v46 = vld [vmem:[%s11136_s10 + $0x8] sm:$0xff]  }
 0x3d4   :  { %v8857_v28 = vld [vmem:[%s11136_s10 + $0x50] sm:$0xff]  }
 0x3d5   :  { %6988 = vmatpush1.bf16.msra.mxu1 %v8720_v16  ;;  %v8798_v16 = vld [vmem:[%s11133_s7 + $0x310] ss:$8 sps:$4 sm:$0xff]  }
 0x3d6   :  { %6989 = vmatprep.subr.bf16.mxu1 %v8725_v45  ;;  %v8802_v45 = vld [vmem:[#allocation4 + $0x49] ss:$8 sps:$4 sm:$0xff]  }
 0x3d9   :  { %6990 = vmatpush1.bf16.msra.mxu1 %v8723_v5  ;;  %v8805_v5 = vld [vmem:[%s11133_s7 + $0x324] ss:$8 sps:$4 sm:$0xff]  }
 0x3da   :  { %6991 = vmatprep.subr.bf16.mxu1 %v8728_v38  ;;  %v8807_v38 = vld [vmem:[#allocation4 + $0x21] ss:$8 sps:$4 sm:$0xff]  }
 0x3dd   :  { %6992 = vmatpush1.bf16.msra.mxu1 %v8726_v9  ;;  %v8801_v9 = vld [vmem:[#allocation4 + $0x39] ss:$8 sps:$4 sm:$0xff]  }
 0x3de   :  { %6993 = vmatprep.subr.bf16.mxu1 %v8731_v27  ;;  %v8803_v27 = vld [vmem:[%s11133_s7 + $0x320] ss:$8 sps:$4 sm:$0xff]  }
 0x3e1   :  { %6994 = vmatpush1.bf16.msra.mxu1 %v8729_v59  ;;  %v8806_v59 = vld [vmem:[#allocation4 + $0x11] ss:$8 sps:$4 sm:$0xff]  }
 0x3e2   :  { %6995 = vmatprep.subr.bf16.mxu1 %v8734_v48  ;;  %v5914_v48 = vpack.c.bf16 %v8802_v45, %v8801_v9  ;;  %v5998_v22 = vpack.c.bf16 %v8807_v38, %v8806_v59  ;;  %v8864_v45 = vld [vmem:[%s11136_s10 + $0x28] sm:$0xff]   ;;  %v8866_v38 = vld [vmem:[%s11136_s10 + $0x30] sm:$0xff]   ;;  %v8867_v9 = vld [vmem:[%s11136_s10 + $0x78] sm:$0xff]   ;;  %v11146_v59 = vmov 0.0  }
 0x3e5   :  { %6996 = vmatpush1.bf16.msra.mxu1 %v8732_v12  ;;  %v8810_v12 = vld [vmem:[%s11133_s7 + $0x334] ss:$8 sps:$4 sm:$0xff]  }
 0x3e6   :  { %7018 = vmatprep.subr.bf16.mxu1 %v8739_v37  ;;  %v8808_v37 = vld [vmem:[%s11133_s7 + $0x330] ss:$8 sps:$4 sm:$0xff]  }
 0x3e8   :  { %6998 = vmatmul.mubr.bf16.vlgmr.msra.gmra.mrb[32].mxu1 %v5857_v24  ;;  %v8819_v24 = vld [vmem:[%s11133_s7 + $0x364] ss:$8 sps:$4 sm:$0xff]  }
 0x3e9   :  { %7007 = vmatprep.mubr.bf16.mxu1 %v5886_v39  ;;  %7019 = vmatpush1.bf16.msra.mxu1 %v8737_v41  ;;  %v8816_v41 = vld [vmem:[%s11133_s7 + $0x354] ss:$8 sps:$4 sm:$0xff]  }
 0x3ea   :  { %7020 = vmatprep.subr.bf16.mxu1 %v8744_v18  ;;  %v8817_v18 = vld [vmem:[%s11133_s7 + $0x360] ss:$8 sps:$4 sm:$0xff]   ;;  %v8822_v39 = vld [vmem:[%s11133_s7 + $0x374] ss:$8 sps:$4 sm:$0xff]  }
 0x3ed   :  { %7021 = vmatpush1.bf16.msra.mxu1 %v8742_v47  ;;  %v8820_v47 = vld [vmem:[%s11133_s7 + $0x370] ss:$8 sps:$4 sm:$0xff]  }
 0x3ee   :  { %7022 = vmatprep.subr.bf16.mxu1 %v8749_v60  ;;  %v8823_v60 = vld [vmem:[%s11133_s7 + $0x380] ss:$8 sps:$4 sm:$0xff]  }
 0x3f0   :  { %7008 = vmatmul.mubr.bf16.gmra.mrb[36].mxu1 %v5858_v54  ;;  %v8834_v54 = vld [vmem:[%s11133_s7 + $0x3b4] ss:$8 sps:$4 sm:$0xff]  }
 0x3f1   :  { %7023 = vmatpush1.bf16.msra.mxu1 %v8747_v43  ;;  %7050 = vmatprep.mubr.bf16.mxu1 %v5941_v36  ;;  %v8831_v43 = vld [vmem:[%s11133_s7 + $0x3a4] ss:$8 sps:$4 sm:$0xff]  }
 0x3f2   :  { %7024 = vmatprep.subr.bf16.mxu1 %v8754_v4  ;;  %v8832_v4 = vld [vmem:[%s11133_s7 + $0x3b0] ss:$8 sps:$4 sm:$0xff]   ;;  %v8837_v36 = vld [vmem:[%s11133_s7 + $0x3c4] ss:$8 sps:$4 sm:$0xff]  }
 0x3f5   :  { %7025 = vmatpush1.bf16.msra.mxu1 %v8752_v26  ;;  %v8835_v26 = vld [vmem:[%s11133_s7 + $0x3c0] ss:$8 sps:$4 sm:$0xff]  }
 0x3f6   :  { %7026 = vmatprep.subr.bf16.mxu1 %v8757_v1  ;;  %v8840_v1 = vld [vmem:[%s11133_s7 + $0x3d4] ss:$8 sps:$4 sm:$0xff]  }
 0x3f9   :  { %7027 = vmatpush1.bf16.msra.mxu1 %v8755_v19  ;;  %v8838_v19 = vld [vmem:[%s11133_s7 + $0x3d0] ss:$8 sps:$4 sm:$0xff]  }
 0x3fa   :  { %7028 = vmatprep.subr.bf16.mxu1 %v8760_v62  ;;  %v8843_v62 = vld [vmem:[%s11133_s7 + $0x3e4] ss:$8 sps:$4 sm:$0xff]  }
 0x3fd   :  { %7029 = vmatpush1.bf16.msra.mxu1 %v8758_v33  ;;  %v8841_v33 = vld [vmem:[%s11133_s7 + $0x3e0] ss:$8 sps:$4 sm:$0xff]  }
 0x3fe   :  { %7030 = vmatprep.subr.bf16.mxu1 %v8763_v11  ;;  %v8846_v11 = vld [vmem:[%s11133_s7 + $0x3f4] ss:$8 sps:$4 sm:$0xff]  }
 0x401   :  { %7031 = vmatpush1.bf16.msra.mxu1 %v8761_v32  ;;  %v8844_v32 = vld [vmem:[%s11133_s7 + $0x3f0] ss:$8 sps:$4 sm:$0xff]  }
 0x402   :  { %7032 = vmatprep.subr.bf16.mxu1 %v8766_v15  ;;  %v8848_v15 = vld [vmem:[#allocation4 + $0x20] ss:$8 sps:$4 sm:$0xff]  }
 0x405   :  { %7033 = vmatpush1.bf16.msra.mxu1 %v8764_v40  ;;  %v8850_v40 = vld [vmem:[#allocation4 + $0x51] ss:$8 sps:$4 sm:$0xff]  }
 0x406   :  { %7034 = vmatprep.subr.bf16.mxu1 %v8769_v20  ;;  %v8847_v20 = vld [vmem:[#allocation4 + $0x10] ss:$8 sps:$4 sm:$0xff]  }
 0x409   :  { %7035 = vmatpush1.bf16.msra.mxu1 %v8767_v29  ;;  %v8849_v29 = vld [vmem:[#allocation4 + $0x41] ss:$8 sps:$4 sm:$0xff]  }
 0x40a   :  { %7036 = vmatprep.subr.bf16.mxu1 %v8772_v44  ;;  %v5970_v44 = vpack.c.bf16 %v8848_v15, %v8847_v20 }
 0x40d   :  { %7037 = vmatpush1.bf16.msra.mxu1 %v8770_v51  ;;  %v5999_v51 = vpack.c.bf16 %v8850_v40, %v8849_v29 }
 0x40e   :  { %7038 = vmatprep.subr.bf16.mxu1 %v8775_v14  ;;  %v8852_v14 = vld [vmem:[#allocation4 + $0x50] ss:$8 sps:$4 sm:$0xff]  }
 0x411   :  { %7039 = vmatpush1.bf16.msra.mxu1 %v8773_v10  ;;  %v8851_v10 = vld [vmem:[#allocation4 + $0x40] ss:$8 sps:$4 sm:$0xff]  }
 0x412   :  { %7040 = vmatprep.subr.bf16.mxu1 %v8778_v61  ;;  %v5971_v61 = vpack.c.bf16 %v8852_v14, %v8851_v10 }
 0x415   :  { %7041 = vmatpush1.bf16.msra.mxu1 %v8776_v50 }
 0x416   :  { %7042 = vmatprep.subr.bf16.mxu1 %v8781_v21 }
 0x419   :  { %7043 = vmatpush1.bf16.msra.mxu1 %v8779_v30 }
 0x41a   :  { %7044 = vmatprep.subr.bf16.mxu1 %v8784_v35 }
 0x41d   :  { %7045 = vmatpush1.bf16.msra.mxu1 %v8782_v57 }
 0x41e   :  { %7046 = vmatprep.subr.bf16.mxu1 %v8787_v56 }
 0x421   :  { %7047 = vmatpush1.bf16.msra.mxu1 %v8785_v31 }
 0x422   :  { %7048 = vmatprep.subr.bf16.mxu1 %v8790_v63 }
 0x425   :  { %7049 = vmatpush1.bf16.msra.mxu1 %v8788_v6  ;;  %v8853_v6 = vld [vmem:[%s11136_s10 + $0x40] sm:$0xff]  }
 0x426   :  { %7071 = vmatprep.subr.bf16.mxu1 %v8795_v42  ;;  %v8855_v42 = vld [vmem:[%s11136_s10 + $0x48] sm:$0xff]   ;;  %8349 = vmatprep.subr.bf16.mxu0 %v8853_v6 }
 0x427   :  { %8350 = vmatpush3.bf16.msra.mxu0 %v8854_v58 }
 0x428   :  { %7051 = vmatmul.mubr.bf16.vlgmr.msra.gmra.mrb[32].mxu1 %v5913_v13  ;;  %8351 = vmatprep.subr.bf16.mxu0 %v8855_v42  ;;  %v8860_v13 = vld [vmem:[%s11136_s10 + $0x18] sm:$0xff]  }
 0x429   :  { %7060 = vmatprep.mubr.bf16.mxu1 %v5942_v49  ;;  %7072 = vmatpush1.bf16.msra.mxu1 %v8793_v3  ;;  %v8858_v3 = vld [vmem:[%s11136_s10 + $0x10] sm:$0xff]   ;;  %v8862_v49 = vld [vmem:[%s11136_s10 + $0x20] sm:$0xff]  }
 0x42a   :  { %7073 = vmatprep.subr.bf16.mxu1 %v8800_v53  ;;  %v8861_v53 = vld [vmem:[%s11136_s10 + $0x60] sm:$0xff]  }
 0x42b   :  { %8352 = vmatpush3.bf16.msra.mxu0 %v8856_v46 }
 0x42c   :  { %8353 = vmatprep.subr.bf16.mxu0 %v8857_v28 }
 0x42d   :  { %7074 = vmatpush1.bf16.msra.mxu1 %v8798_v16  ;;  %v8863_v16 = vld [vmem:[%s11136_s10 + $0x68] sm:$0xff]  }
 0x42e   :  { %7075 = vmatprep.subr.bf16.mxu1 %v8805_v5  ;;  %v8865_v5 = vld [vmem:[%s11136_s10 + $0x70] sm:$0xff]  }
 0x42f   :  { %8354 = vmatpush3.bf16.msra.mxu0 %v8858_v3 }
 0x430   :  { %7061 = vmatmul.mubr.bf16.gmra.mrb[36].mxu1 %v5914_v48  ;;  %8355 = vmatprep.subr.bf16.mxu0 %v8859_v8  ;;  %v7177_v48 = vld [vmem:[%s11134_s8] sm:$0x3] }
 0x431   :  { %7076 = vmatpush1.bf16.msra.mxu1 %v8803_v27  ;;  %7103 = vmatprep.mubr.bf16.mxu1 %v5998_v22  ;;  %v8868_v27 = vld [vmem:[%s11136_s10 + $0x38] sm:$0xff]  }
 0x432   :  { %7077 = vmatprep.subr.bf16.mxu1 %v8810_v12  ;;  %v11147_v12 = vld [vmem:[#allocation9_spill] sm:$0xff] }
 0x433   :  { %8356 = vmatpush3.bf16.msra.mxu0 %v8860_v13  ;;  %v7185_v22 = vsub.s32 1, %v11147_v12 }
 0x434   :  { %8357 = vmatprep.subr.bf16.mxu0 %v8861_v53 }
 0x435   :  { %7078 = vmatpush1.bf16.msra.mxu1 %v8808_v37  ;;  %v7197_v37 = vld [vmem:[%s11135_s9] sm:$0x3] }
 0x436   :  { %7079 = vmatprep.subr.bf16.mxu1 %v8813_v34  ;;  %v7182_v34 = vrot.slane %v7177_v48, %v9239_v2 }
 0x437   :  { %8358 = vmatpush3.bf16.msra.mxu0 %v8862_v49 }
 0x438   :  { %8359 = vmatprep.subr.bf16.mxu0 %v8863_v16 }
 0x439   :  { %7080 = vmatpush1.bf16.msra.mxu1 %v8811_v17 }
 0x43a   :  { %7081 = vmatprep.subr.bf16.mxu1 %v8816_v41  ;;  %v7186_v41 = vrot.slane %v7177_v48, %v7185_v22 }
 0x43b   :  { %8360 = vmatpush3.bf16.msra.mxu0 %v8864_v45 }
 0x43c   :  { %8361 = vmatprep.subr.bf16.mxu0 %v8865_v5 }
 0x43d   :  { %7082 = vmatpush1.bf16.msra.mxu1 %v8814_v55 }
 0x43e   :  { %7083 = vmatprep.subr.bf16.mxu1 %v8819_v24  ;;  %v7202_v24 = vrot.slane %v7197_v37, %v9239_v2 }
 0x43f   :  { %8362 = vmatpush3.bf16.msra.mxu0 %v8866_v38 }
 0x440   :  { %8363 = vmatprep.subr.bf16.mxu0 %v8867_v9 }
 0x441   :  { %7084 = vmatpush1.bf16.msra.mxu1 %v8817_v18 }
 0x442   :  { %7085 = vmatprep.subr.bf16.mxu1 %v8822_v39 }
 0x443   :  { %8364 = vmatpush3.bf16.msra.mxu0 %v8868_v27 }
 0x444   :  { %8472 = vmatprep.subr.bf16.mxu0 %v11146_v59 }
 0x445   :  { %7086 = vmatpush1.bf16.msra.mxu1 %v8820_v47  ;;  %v7206_v47 = vrot.slane %v7197_v37, %v7185_v22 }
 0x446   :  { %7087 = vmatprep.subr.bf16.mxu1 %v8825_v0 }
 0x449   :  { %7088 = vmatpush1.bf16.msra.mxu1 %v8823_v60 }
 0x44a   :  { %7089 = vmatprep.subr.bf16.mxu1 %v8828_v7 }
 0x44d   :  { %7090 = vmatpush1.bf16.msra.mxu1 %v8826_v23 }
 0x44e   :  { %7091 = vmatprep.subr.bf16.mxu1 %v8831_v43 }
 0x451   :  { %7092 = vmatpush1.bf16.msra.mxu1 %v8829_v25 }
 0x452   :  { %7093 = vmatprep.subr.bf16.mxu1 %v8834_v54 }
 0x455   :  { %7094 = vmatpush1.bf16.msra.mxu1 %v8832_v4 }
 0x456   :  { %7095 = vmatprep.subr.bf16.mxu1 %v8837_v36 }
 0x459   :  { %7096 = vmatpush1.bf16.msra.mxu1 %v8835_v26 }
 0x45a   :  { %7097 = vmatprep.subr.bf16.mxu1 %v8840_v1 }
 0x45d   :  { %7098 = vmatpush1.bf16.msra.mxu1 %v8838_v19 }
 0x45e   :  { %7099 = vmatprep.subr.bf16.mxu1 %v8843_v62 }
 0x461   :  { %7100 = vmatpush1.bf16.msra.mxu1 %v8841_v33 }
 0x462   :  { %7101 = vmatprep.subr.bf16.mxu1 %v8846_v11 }
 0x465   :  { %7102 = vmatpush1.bf16.msra.mxu1 %v8844_v32 }
 0x468   :  { %7104 = vmatmul.mubr.bf16.vlgmr.msra.gmra.mrb[32].mxu1 %v5970_v44 }
 0x469   :  { %7113 = vmatprep.mubr.bf16.mxu1 %v5999_v51 }
 0x470   :  { %7114 = vmatmul.mubr.bf16.gmra.mrb[36].mxu1 %v5971_v61 }
 0x47f   :  { %v7158_v50 = vpop.f32.mrb[112].mxu0 }
 0x480   :  { %v7160_v21 = vpop.f32.mrb[113].mxu0 }
 0x481   :  { %v7162_v30 = vpop.f32.mrb[114].mxu0 }
 0x482   :  { %v7164_v35 = vpop.f32.mrb[115].mxu0 }
 0x4a4   :  { %v10993_v57 = vpop.f32.mrb[116].mxu0 }
 0x4a5   :  { %v10995_v56 = vpop.f32.mrb[117].mxu0 }
 0x4a6   :  { %v10997_v31 = vpop.f32.mrb[118].mxu0 }
 0x4a7   :  { %v10999_v63 = vpop.f32.mrb[119].mxu0 }
 0x53b   :  { %v7105_v17 = vpop.f32.mrb[32].mxu1 }
 0x53c   :  { %v8492_v55 = vadd.f32 %v7158_v50, %v7105_v17  ;;  %v7107_v18 = vpop.f32.mrb[33].mxu1 }
 0x53d   :  { %v8493_v39 = vadd.f32 %v7160_v21, %v7107_v18  ;;  %v7109_v0 = vpop.f32.mrb[34].mxu1 }
 0x53e   :  { %v7189_v60 = vmul.f32 %v8492_v55, %v7182_v34  ;;  %v8494_v7 = vadd.f32 %v7162_v30, %v7109_v0  ;;  %v7111_v23 = vpop.f32.mrb[35].mxu1 }
 0x53f   :  { %v7190_v43 = vmul.f32 %v8493_v39, %v7186_v41  ;;  %v8495_v25 = vadd.f32 %v7164_v35, %v7111_v23 }
 0x540   :  { %v7209_v54 = vadd.f32 %v7202_v24, %v7189_v60  ;;  %v7191_v4 = vmul.f32 %v8494_v7, %v7182_v34 }
 0x541   :  { %v7210_v36 = vadd.f32 %v7206_v47, %v7190_v43  ;;  %v7192_v26 = vmul.f32 %v8495_v25, %v7186_v41 }
 0x542   :  { %v7217_v1 = vmax.f32 %v7209_v54, 0.0  ;;  %v7211_v19 = vadd.f32 %v7202_v24, %v7191_v4 }
 0x543   :  { %v7218_v62 = vmax.f32 %v7210_v36, 0.0  ;;  %v7212_v33 = vadd.f32 %v7206_v47, %v7192_v26  ;;  %v7115_v11 = vpop.f32.mrb[36].mxu1 }
 0x544   :  { %v7219_v32 = vmax.f32 %v7211_v19, 0.0  ;;  %v8496_v15 = vadd.f32 %v10993_v57, %v7115_v11  ;;  %v7117_v40 = vpop.f32.mrb[37].mxu1 }
 0x545   :  { %v7233_v20 = vcombine.low %v7217_v1, %v7218_v62  ;;  %v7234_v29 = vcombine.high %v7217_v1, %v7218_v62  ;;  %v7220_v44 = vmax.f32 %v7212_v33, 0.0  ;;  %v8497_v51 = vadd.f32 %v10995_v56, %v7117_v40  ;;  %v7119_v14 = vpop.f32.mrb[38].mxu1 }
 0x546   :  { %v7193_v10 = vmul.f32 %v8496_v15, %v7182_v34  ;;  %v8498_v61 = vadd.f32 %v10997_v31, %v7119_v14  ;;  %v7121_v50 = vpop.f32.mrb[39].mxu1 }
 0x547   :  { %v7241_v21 = vrot.slane %v7233_v20, %v9229_v52  ;;  %v7248_v30 = vrot.slane %v7234_v29, %v9229_v52  ;;  %v7251_v35 = vcombine.low %v7219_v32, %v7220_v44  ;;  %v7252_v6 = vcombine.high %v7219_v32, %v7220_v44 }
 0x548   :  { %v7213_v58 = vadd.f32 %v7202_v24, %v7193_v10  ;;  %v7194_v42 = vmul.f32 %v8497_v51, %v7186_v41  ;;  %v7195_v57 = vmul.f32 %v8498_v61, %v7182_v34  ;;  %v8499_v46 = vadd.f32 %v10999_v63, %v7121_v50 }
 0x549   :  { %v7249_v28 = vcombine.high %v7241_v21, %v7241_v21  ;;  %v7250_v3 = vcombine.high %v7248_v30, %v7248_v30  ;;  %v7321_v8 = vmax.f32 %v7241_v21, %v7248_v30  ;;  %v7259_v56 = vrot.slane %v7251_v35, %v9229_v52 }
 0x54a   :  { %v7266_v13 = vrot.slane %v7252_v6, %v9229_v52  ;;  %v7221_v31 = vmax.f32 %v7213_v58, 0.0  ;;  %v7214_v53 = vadd.f32 %v7206_v47, %v7194_v42  ;;  %v7215_v49 = vadd.f32 %v7202_v24, %v7195_v57 }
 0x54b   :  { %v7322_v16 = vmax.f32 %v7249_v28, %v7250_v3  ;;  %v8141_v45 = vrot.slane %v7321_v8, 9  ;;  %v7267_v5 = vcombine.high %v7259_v56, %v7259_v56  ;;  %v7196_v38 = vmul.f32 %v8499_v46, %v7186_v41 }
 0x54c   :  { %v7268_v9 = vcombine.high %v7266_v13, %v7266_v13  ;;  %v7323_v27 = vmax.f32 %v7259_v56, %v7266_v13  ;;  %v7222_v48 = vmax.f32 %v7214_v53, 0.0  ;;  %v7223_v37 = vmax.f32 %v7215_v49, 0.0 }
 0x54d   :  { %v8142_v22 = vrot.slane %v7322_v16, 9  ;;  %v7216_v63 = vadd.f32 %v7206_v47, %v7196_v38  ;;  %v7361_v39 = vmax.f32 %v7321_v8, %v8141_v45 }
 0x54e   :  { %v7324_v34 = vmax.f32 %v7267_v5, %v7268_v9  ;;  %v8143_v17 = vrot.slane %v7323_v27, 9  ;;  %v7269_v55 = vcombine.low %v7221_v31, %v7222_v48  ;;  %v7270_v18 = vcombine.high %v7221_v31, %v7222_v48 }
 0x54f   :  { %v7362_v0 = vmax.f32 %v7322_v16, %v8142_v22  ;;  %v7224_v60 = vmax.f32 %v7216_v63, 0.0  ;;  %v8870_v22 = vld [vmem:[%s11138_s12 + $0x8] sm:$0xff]   ;;  %v8872_v63 = vld [vmem:[%s11138_s12 + $0x18] sm:$0xff]  }
 0x550   :  { %v8144_v7 = vrot.slane %v7324_v34, 9  ;;  %v7277_v24 = vrot.slane %v7269_v55, %v9229_v52  ;;  %v7284_v23 = vrot.slane %v7270_v18, %v9229_v52  ;;  %v7363_v41 = vmax.f32 %v7323_v27, %v8143_v17  ;;  %v8874_v17 = vld [vmem:[%s11138_s12 + $0x28] sm:$0xff]   ;;  %v8875_v55 = vld [vmem:[%s11138_s12 + $0x30] sm:$0xff]   ;;  %v8876_v18 = vld [vmem:[%s11138_s12 + $0x38] sm:$0xff]  }
 0x551   :  { %v7369_v43 = vadd.f32 %v7362_v0, %v7361_v39  ;;  %v7287_v25 = vcombine.low %v7223_v37, %v7224_v60  ;;  %v7288_v54 = vcombine.high %v7223_v37, %v7224_v60  ;;  %v8871_v37 = vld [vmem:[%s11138_s12 + $0x10] sm:$0xff]   ;;  %v8149_v0 = vld [vmem:[%s11137_s11] ss:$0 sm:$0xff] }
 0x552   :  { %v7285_v4 = vcombine.high %v7277_v24, %v7277_v24  ;;  %v7286_v36 = vcombine.high %v7284_v23, %v7284_v23  ;;  %v7325_v26 = vmax.f32 %v7277_v24, %v7284_v23  ;;  %v7364_v19 = vmax.f32 %v7324_v34, %v8144_v7  ;;  %v8873_v34 = vld [vmem:[%s11138_s12 + $0x20] sm:$0xff]  }
 0x553   :  { %v7295_v47 = vrot.slane %v7287_v25, %v9229_v52  ;;  %v7302_v1 = vrot.slane %v7288_v54, %v9229_v52  ;;  %v7371_v62 = vadd.f32 %v7369_v43, %v7363_v41  ;;  %v7385_v52 = vsub.s32 2, %v11147_v12  ;;  %v8166_v54 = vld [vmem:[%s11139_s13] ss:$0 sm:$0xff] }
 0x554   :  { %v7326_v33 = vmax.f32 %v7285_v4, %v7286_v36  ;;  %v8145_v11 = vrot.slane %v7325_v26, 9 }
 0x555   :  { %v7303_v32 = vcombine.high %v7295_v47, %v7295_v47  ;;  %v7304_v15 = vcombine.high %v7302_v1, %v7302_v1  ;;  %v7327_v40 = vmax.f32 %v7295_v47, %v7302_v1  ;;  %v7373_v20 = vadd.f32 %v7371_v62, %v7364_v19 }
 0x556   :  { %v8146_v29 = vrot.slane %v7326_v33, 9  ;;  %v7365_v14 = vmax.f32 %v7325_v26, %v8145_v11 }
 0x557   :  { %v7328_v44 = vmax.f32 %v7303_v32, %v7304_v15  ;;  %v8147_v51 = vrot.slane %v7327_v40, 9  ;;  %v7375_v6 = vmul.f32 0.25, %v7373_v20 }
 0x558   :  { %v7366_v10 = vmax.f32 %v7326_v33, %v8146_v29 }
 0x559   :  { %v8148_v61 = vrot.slane %v7328_v44, 9  ;;  %v7367_v21 = vmax.f32 %v7327_v40, %v8147_v51  ;;  %v7382_v57 = vrot.slane %v7375_v6, %v9239_v2  ;;  %v7386_v46 = vrot.slane %v7375_v6, %v7385_v52 }
 0x55a   :  { %v7370_v50 = vadd.f32 %v7366_v10, %v7365_v14 }
 0x55b   :  { %v7368_v30 = vmax.f32 %v7328_v44, %v8148_v61  ;;  %v7399_v8 = vpack.c.bf16 %v7382_v57, %v7382_v57  ;;  %v7400_v56 = vpack.c.bf16 %v7386_v46, %v7386_v46 }
 0x55c   :  { %v7372_v35 = vadd.f32 %v7370_v50, %v7367_v21 }
 0x55d   :  { %v7446_v16 = vunpack.c.l.b16 %v7399_v8  ;;  %v7447_v45 = vunpack.c.l.b16 %v7400_v56 }
 0x55e   :  { %v7374_v58 = vadd.f32 %v7372_v35, %v7368_v30 }
 0x560   :  { %v7376_v42 = vmul.f32 0.25, %v7374_v58 }
 0x562   :  { %v7390_v28 = vrot.slane %v7376_v42, %v9239_v2  ;;  %v7394_v3 = vrot.slane %v7376_v42, %v7385_v52  ;;  %v8869_v2 = vld [vmem:[%s11138_s12] sm:$0xff]   ;;  %s8911_s12 = smov [#allocation6]  }
 0x563   :  { %s7715_s25 = sshll.u32 %s8911_s12, 4  ;;  %s7716_s25 = int_to_ptr.vmem [resolvable:$true] %s7715_s25 }
 0x564   :  { %v7401_v13 = vpack.c.bf16 %v7390_v28, %v7390_v28  ;;  %v7402_v31 = vpack.c.bf16 %v7394_v3, %v7394_v3  ;;  %s8881_s11 = scalar_lea.vmem %s7716_s25, 32  ;;  %p8886_p1 = scmp.lt.s32.totalorder %s7716_s25, %s7716_s25 }
 0x565   :  { %p8882_p0 = scmp.ne.s32.totalorder %s7716_s25, %s8881_s11  ;;  %p8887_p2 = scmp.lt.s32.totalorder %s8881_s11, %s8881_s11 }
 0x566   :  { %v7448_v53 = vunpack.c.l.b16 %v7401_v13  ;;  %v7449_v49 = vunpack.c.l.b16 %v7402_v31 }
 0x567   :  { %p8888_p3 = por %p8887_p2, %p8886_p1 }
 0x568   :  { %v7450_v5 = vrot.slane %v7448_v53, 7  ;;  %v7452_v38 = vrot.slane %v7449_v49, 7 }
 0x569   :  { %p8889_p4 = pnand %p8888_p3, %p8882_p0 }
 0x56a   :  { %v7453_v12 = vsel %vm3745_vm5, %v7452_v38, %v7447_v45  ;;  %v7451_v9 = vsel %vm3745_vm5, %v7450_v5, %v7446_v16 }
 0x56b   :  { %v7455_v27 = vpack.c.b16 %v7453_v12, %v7453_v12  ;;  %v7454_v48 = vpack.c.b16 %v7451_v9, %v7451_v9 }
 0x56d   :  { %7586 = vmatprep.mubr.bf16.mxu0 %v7455_v27 }
 0x56e   :  { %7587 = vmatmul.mubr.bf16.vlgmr.msra.gmra.mrb[120].mxu0 %v7454_v48 }
 0x56f   :  { %8473 = vmatpush3.bf16.msra.mxu0 %v8869_v2  ;;  %8488 = vmatprep.mubr.msk.bf16.mxu0 %vm8910_vm13, %v11146_v59 }
 0x570   :  { %8474 = vmatprep.subr.bf16.mxu0 %v11146_v59 }
 0x573   :  { %8475 = vmatpush3.bf16.msra.mxu0 %v8870_v22 }
 0x574   :  { %8476 = vmatprep.subr.bf16.mxu0 %v11146_v59 }
 0x577   :  { %8477 = vmatpush3.bf16.msra.mxu0 %v8871_v37 }
 0x578   :  { %8478 = vmatprep.subr.bf16.mxu0 %v11146_v59 }
 0x57b   :  { %8479 = vmatpush3.bf16.msra.mxu0 %v8872_v63 }
 0x57c   :  { %8480 = vmatprep.subr.bf16.mxu0 %v11146_v59 }
 0x57f   :  { %8481 = vmatpush3.bf16.msra.mxu0 %v8873_v34 }
 0x580   :  { %8482 = vmatprep.subr.bf16.mxu0 %v11146_v59 }
 0x583   :  { %8483 = vmatpush3.bf16.msra.mxu0 %v8874_v17 }
 0x584   :  { %8484 = vmatprep.subr.bf16.mxu0 %v11146_v59 }
 0x587   :  { %8485 = vmatpush3.bf16.msra.mxu0 %v8875_v55 }
 0x588   :  { %8486 = vmatprep.subr.bf16.mxu0 %v11146_v59 }
 0x58b   :  { %8487 = vmatpush3.bf16.msra.mxu0 %v8876_v18 }
 0x641   :  { %v8365_v39 = vpop.f32.mrb[120].mxu0 }
 0x642   :  { %v8366_v60 = vpop.f32.mrb[121].mxu0 }
 0x643   :  { %v8367_v7 = vadd.f32 %v8366_v60, %v8365_v39  ;;  %v8368_v24 = vpop.f32.mrb[122].mxu0 }
 0x644   :  { %v8369_v23 = vpop.f32.mrb[123].mxu0 }
 0x645   :  { %v7589_v43 = vadd.f32 %v8367_v7, %v8149_v0 }
 0x647   :  { %v7594_v41 = vmax.f32 %v7589_v43, 0.0 }
 0x649   :  { %v7595_v25 = vpack.c.bf16 %v7594_v41, %v7594_v41 }
 0x64b   :  { %8489 = vmatmul.mubr.bf16.vlgmr.msra.gmra.mrb[124].mxu0 %v7595_v25 }
 0x71e   :  { %v7701_v59 = vpop.f32.mrb[124].mxu0 }
 0x71f   :  { %v7702_v4 = vadd.f32 %v8166_v54, %v7701_v59  ;;  %v8490_v36 = vpop.f32.mrb[125].mxu0 }
 0x720   :  { %v7704_v26 = vpop.f32.mrb[126].mxu0 }
 0x721   :  { %v8491_v47 = vpop.f32.mrb[127].mxu0  ;;  %7708 = vst.msk [vmem:[#allocation6] sm:$0x3] %vm7707_vm14, %v7702_v4 }
 0x722   :  { %8892 = shalt.err (!%p8889_p4)
}
 0x723   :  { %s8893_s13 = scalar_lea.hbm %s11140_s14, 32 }
 0x724   :  { %p8894_p5 = scmp.ne.s32.totalorder %s11140_s14, %s8893_s13  ;;  %p8897_p6 = scmp.lt.u32.totalorder %s8893_s13, %s11140_s14 }
 0x726   :  { %p8899_p7 = pnand %p8897_p6, %p8894_p5 }
 0x728   :  { %8902 = shalt.err (!%p8899_p7)
}
 0x729   :  { %7718 = dma.vmem_to_hbm [thread:$0]  %s7716_s25, 32, %s11140_s14, [#allocation7]  }
 0x72a   :  { %8903 = dma.done.wait [#allocation7], 32  }
 0x72b   :  { %8904 = vsyncadd [#allocation7], 4294967264 }
 0x72c   :  { %7722 = vsyncpa [#allocation7], 1 }

</bundles_post_ra>
